<compile_context>
chip_gen: v7x
topology: tpu7x:2x2x1
jax: 0.10.0
libtpu: 0.0.40
codegen_flags: <defaults>
</compile_context>

<pallas_src>
import numpy as np
import jax
import jax.numpy as jnp
from jax.experimental import pallas as pl
from jax.experimental.pallas import tpu as pltpu


# ---------------------------------------------------------------------------
# Host-side construction of the (small) linear operators (parameter glue).
# ---------------------------------------------------------------------------
def _adaptive_pool_matrix(out_size: int, in_size: int) -> np.ndarray:
    """Rows average PyTorch AdaptiveAvgPool2d bins along one axis."""
    m = np.zeros((out_size, in_size), dtype=np.float32)
    for i in range(out_size):
        start = (i * in_size) // out_size
        end = -((-(i + 1) * in_size) // out_size)  # ceil div
        m[i, start:end] = 1.0 / (end - start)
    return m


def _shift_matrix(p: int, k: int) -> np.ndarray:
    """A_k[i, j] = 1 iff j == i + k - 1 (zero-padded 3x3-conv shift, 1 axis)."""
    a = np.zeros((p, p), dtype=np.float32)
    for i in range(p):
        j = i + k - 1
        if 0 <= j < p:
            a[i, j] = 1.0
    return a


def _bilinear_matrix(out_size: int, in_size: int) -> np.ndarray:
    """F.interpolate(mode='bilinear', align_corners=True) along one axis."""
    m = np.zeros((out_size, in_size), dtype=np.float32)
    if in_size == 1:
        m[:, 0] = 1.0
        return m
    scale = (in_size - 1) / (out_size - 1)
    for i in range(out_size):
        src = i * scale
        i0 = min(int(np.floor(src)), in_size - 2)
        frac = src - i0
        m[i, i0] = 1.0 - frac
        m[i, i0 + 1] = frac
    return m


def _stage_operators(pool_size: int, h: int, w: int, pp_max: int):
    """Pooling, per-tap shift, and upsample operators for one pyramid stage,
    zero-padded so all stages share the pp_max-sized layout."""
    pp = pool_size * pool_size
    # AdaptiveAvgPool2d as a right-multiply operator: pooled = x @ P, (HW, pp).
    pm = np.kron(_adaptive_pool_matrix(pool_size, h),
                 _adaptive_pool_matrix(pool_size, w))          # (pp, HW)
    p_op = np.zeros((h * w, pp_max), np.float32)
    p_op[:, :pp] = pm.T
    # 3x3-conv spatial shifts on the pooled map (right-multiply), per tap.
    s_ops = np.zeros((9, pp_max, pp_max), np.float32)
    for ki in range(3):
        a_ki = _shift_matrix(pool_size, ki)
        for kj in range(3):
            a_kj = _shift_matrix(pool_size, kj)
            s_ops[ki * 3 + kj, :pp, :pp] = np.kron(a_ki, a_kj).T
    # Bilinear upsample (align_corners=True) back to (H, W), right-multiply.
    um = np.kron(_bilinear_matrix(h, pool_size),
                 _bilinear_matrix(w, pool_size))               # (HW, pp)
    u_op = np.zeros((pp_max, h * w), np.float32)
    u_op[:pp, :] = um.T
    return p_op, s_ops, u_op


# ---------------------------------------------------------------------------
# Fused Pallas kernel: all pyramid stages + identity concat, one batch element.
# ---------------------------------------------------------------------------
def _psp_fused_kernel(x_ref, p_ref, s_ref, w_ref, b_ref, u_ref, o_ref):
    n_stages = p_ref.shape[0]
    pp = p_ref.shape[2]
    c_out = w_ref.shape[1]

    x = x_ref[0]                                   # (C, HW), f32
    x_bf = x.astype(jnp.bfloat16)

    for s in range(n_stages):                      # static loop over stages
        # AdaptiveAvgPool2d: ONE HW-length contraction per stage (bf16 in,
        # f32 accumulate).
        pooled = jnp.dot(x_bf, p_ref[s],
                         preferred_element_type=jnp.float32)   # (C, pp)
        # Conv2d(3x3, padding=1, bias=False) on the tiny pooled map; the
        # eval-mode BN scale is already folded into the tap weights.
        y = jnp.zeros((c_out, pp), dtype=jnp.float32)
        for t in range(9):                         # static loop over taps
            h_t = jnp.dot(w_ref[s * 9 + t], pooled,
                          preferred_element_type=jnp.float32)  # (c_out, pp)
            y = y + jnp.dot(h_t, s_ref[s * 9 + t],
                            preferred_element_type=jnp.float32)
        # ABN epilogue: folded BN bias + ReLU (f32 on the VPU).
        z = jnp.maximum(y + b_ref[s], 0.0)
        # Bilinear upsample (align_corners=True) back to (H, W).
        out_s = jnp.dot(z.astype(jnp.bfloat16), u_ref[s],
                        preferred_element_type=jnp.float32)    # (c_out, HW)
        o_ref[0, s * c_out:(s + 1) * c_out, :] = out_s.astype(o_ref.dtype)

    # Identity branch of the channel concat (exact f32 pass-through).
    o_ref[0, n_stages * c_out:, :] = x.astype(o_ref.dtype)


def psp_block(x, params, pool_sizes=(1, 2, 3, 6)):
    """PSPBlock.forward: concat([stage(x) for stage in stages] + [x], dim=1)."""
    b, c, h, w = x.shape
    n_stages = len(pool_sizes)
    c_out = params[0]["conv_w"].shape[0]
    hw = h * w
    pp = max(ps * ps for ps in pool_sizes)
    c_total = n_stages * c_out + c

    p_list, s_list, u_list, w_list, bias_list = [], [], [], [], []
    for ps, prm in zip(pool_sizes, params):
        p_op, s_ops, u_op = _stage_operators(ps, h, w, pp)
        p_list.append(p_op)
        s_list.append(s_ops)
        u_list.append(u_op)
        # Conv taps (t = kh*3 + kw) with the eval-mode BN scale folded in.
        taps = jnp.transpose(prm["conv_w"], (2, 3, 0, 1)).reshape(9, c_out, c)
        w_list.append(taps * prm["bn_scale"].reshape(1, c_out, 1))
        bias_list.append(prm["bn_bias"].reshape(c_out, 1))

    pool_op = jnp.asarray(np.stack(p_list, 0), dtype=jnp.bfloat16)   # (S, HW, pp)
    shift_op = jnp.asarray(np.concatenate(s_list, 0))                # (9S, pp, pp)
    ups_op = jnp.asarray(np.stack(u_list, 0), dtype=jnp.bfloat16)    # (S, pp, HW)
    conv_w = jnp.concatenate(w_list, axis=0).astype(jnp.float32)     # (9S, c_out, C)
    bias = jnp.stack(bias_list, 0).astype(jnp.float32)               # (S, c_out, 1)

    xf = x.reshape(b, c, hw)

    out_flat = pl.pallas_call(
        _psp_fused_kernel,
        out_shape=jax.ShapeDtypeStruct((b, c_total, hw), x.dtype),
        grid_spec=pltpu.PrefetchScalarGridSpec(
            num_scalar_prefetch=0,
            grid=(b,),
            in_specs=[
                pl.BlockSpec((1, c, hw), lambda i: (i, 0, 0)),
                pl.BlockSpec((n_stages, hw, pp), lambda i: (0, 0, 0)),
                pl.BlockSpec((9 * n_stages, pp, pp), lambda i: (0, 0, 0)),
                pl.BlockSpec((9 * n_stages, c_out, c), lambda i: (0, 0, 0)),
                pl.BlockSpec((n_stages, c_out, 1), lambda i: (0, 0, 0)),
                pl.BlockSpec((n_stages, pp, hw), lambda i: (0, 0, 0)),
            ],
            out_specs=pl.BlockSpec((1, c_total, hw), lambda i: (i, 0, 0)),
        ),
        compiler_params=pltpu.CompilerParams(
            dimension_semantics=("parallel",)),
    )(xf, pool_op, shift_op, conv_w, bias, ups_op)
    return out_flat.reshape(b, c_total, h, w)


# ---------------------------------------------------------------------------
# Deterministic parameter init (shapes dictated by the module's __init__).
# ---------------------------------------------------------------------------
def init_params(key, in_channels, pool_sizes=(1, 2, 3, 6)):
    out_channels = in_channels // len(pool_sizes)
    params = []
    eps = 1e-5
    for ps in pool_sizes:
        key, kw, kg, kb, km, kv = jax.random.split(key, 6)
        conv_w = 0.1 * jax.random.normal(
            kw, (out_channels, in_channels, 3, 3), jnp.float32)
        use_bn = ps != 1  # PyramidBlock disables BN when pool_size == 1
        if use_bn:
            # TODO(synk): BN is implemented in eval mode only (running stats
            # folded to per-channel scale/bias); training-mode batch statistics
            # are not computed in the kernel.
            gamma = 1.0 + 0.1 * jax.random.normal(kg, (out_channels,), jnp.float32)
            beta = 0.1 * jax.random.normal(kb, (out_channels,), jnp.float32)
            mean = 0.1 * jax.random.normal(km, (out_channels,), jnp.float32)
            var = jnp.abs(jax.random.normal(kv, (out_channels,), jnp.float32)) + 0.5
            scale = gamma / jnp.sqrt(var + eps)
            bias = beta - mean * scale
        else:
            scale = jnp.ones((out_channels,), jnp.float32)
            bias = jnp.zeros((out_channels,), jnp.float32)
        params.append({"conv_w": conv_w, "bn_scale": scale, "bn_bias": bias})
    return params


# ---------------------------------------------------------------------------
# Pure-JAX reference for validation.
# ---------------------------------------------------------------------------
def _adaptive_avg_pool_ref(x, p):
    _, _, h, w = x.shape
    rows = []
    for i in range(p):
        hs, he = (i * h) // p, -((-(i + 1) * h) // p)
        cols = []
        for j in range(p):
            ws, we = (j * w) // p, -((-(j + 1) * w) // p)
            cols.append(jnp.mean(x[:, :, hs:he, ws:we], axis=(2, 3)))
        rows.append(jnp.stack(cols, axis=-1))
    return jnp.stack(rows, axis=-2)


def _reference_stage(x, conv_w, scale, bias, pool_size):
    pooled = _adaptive_avg_pool_ref(x, pool_size)
    y = jax.lax.conv_general_dilated(
        pooled, conv_w, (1, 1), [(1, 1), (1, 1)],
        dimension_numbers=("NCHW", "OIHW", "NCHW"))
    z = jax.nn.relu(y * scale[None, :, None, None] + bias[None, :, None, None])
    uh = jnp.asarray(_bilinear_matrix(x.shape[2], pool_size))
    uw = jnp.asarray(_bilinear_matrix(x.shape[3], pool_size))
    return jnp.einsum("hp,bopq,wq->bohw", uh, z, uw)


if __name__ == "__main__":
    key = jax.random.PRNGKey(0)
    k_x, k_p = jax.random.split(key)

    in_channels = 8
    pool_sizes = (1, 2, 3, 6)
    x = jax.random.normal(k_x, (2, in_channels, 16, 16), jnp.float32)
    params = init_params(k_p, in_channels, pool_sizes)

    out = jax.block_until_ready(psp_block(x, params, pool_sizes))

    expected_channels = in_channels + len(pool_sizes) * (in_channels // len(pool_sizes))
    assert out.shape == (2, expected_channels, 16, 16), out.shape

    ref = jnp.concatenate(
        [_reference_stage(x, p["conv_w"], p["bn_scale"], p["bn_bias"], ps)
         for ps, p in zip(pool_sizes, params)] + [x], axis=1)
    # Pooling/upsample matmul operands are bfloat16 (f32 accumulation), so
    # compare against the pure-f32 reference with a correspondingly looser
    # tolerance; the identity channels match exactly.
    np.testing.assert_allclose(np.asarray(out), np.asarray(ref),
                               rtol=5e-2, atol=5e-2)
    print("KERNEL_OK")
</pallas_src>

<mosaic_0001>
module attributes {stable_mosaic.version = 11 : i64} {
  func.func @_psp_fused_kernel(%arg0: i32, %arg1: memref<1x8x256xf32, #tpu.memory_space<vmem>>, %arg2: memref<4x256x36xbf16, #tpu.memory_space<vmem>>, %arg3: memref<36x36x36xf32, #tpu.memory_space<vmem>>, %arg4: memref<36x2x8xf32, #tpu.memory_space<vmem>>, %arg5: memref<4x2x1xf32, #tpu.memory_space<vmem>>, %arg6: memref<4x36x256xbf16, #tpu.memory_space<vmem>>, %arg7: memref<1x16x256xf32, #tpu.memory_space<vmem>>) attributes {dimension_semantics = [#tpu.dimension_semantics<parallel>], iteration_bounds = array<i64: 2>, scalar_prefetch = 0 : i64, scratch_operands = 0 : i64, tpu.core_type = #tpu.core_type<tc>, window_params = [{transform_indices = @transform_0, window_bounds = array<i64: 1, 8, 256>}, {pipeline_mode = #tpu.pipeline_mode<synchronous>, transform_indices = @transform_1, window_bounds = array<i64: 4, 256, 36>}, {pipeline_mode = #tpu.pipeline_mode<synchronous>, transform_indices = @transform_2, window_bounds = array<i64: 36, 36, 36>}, {pipeline_mode = #tpu.pipeline_mode<synchronous>, transform_indices = @transform_3, window_bounds = array<i64: 36, 2, 8>}, {pipeline_mode = #tpu.pipeline_mode<synchronous>, transform_indices = @transform_4, window_bounds = array<i64: 4, 2, 1>}, {pipeline_mode = #tpu.pipeline_mode<synchronous>, transform_indices = @transform_5, window_bounds = array<i64: 4, 36, 256>}, {transform_indices = @transform_6, window_bounds = array<i64: 1, 16, 256>}]} {
    %c0 = arith.constant 0 : index
    %c0_0 = arith.constant 0 : index
    %c0_1 = arith.constant 0 : index
    %0 = vector.load %arg1[%c0, %c0_0, %c0_1] : memref<1x8x256xf32, #tpu.memory_space<vmem>>, vector<1x8x256xf32>
    %1 = vector.shape_cast %0 : vector<1x8x256xf32> to vector<8x256xf32>
    %2 = arith.truncf %1 : vector<8x256xf32> to vector<8x256xbf16>
    %c0_2 = arith.constant 0 : index
    %c0_3 = arith.constant 0 : index
    %c0_4 = arith.constant 0 : index
    %3 = vector.load %arg2[%c0_2, %c0_3, %c0_4] : memref<4x256x36xbf16, #tpu.memory_space<vmem>>, vector<1x256x36xbf16>
    %4 = vector.shape_cast %3 : vector<1x256x36xbf16> to vector<256x36xbf16>
    %cst = arith.constant dense<0.000000e+00> : vector<8x36xf32>
    %5 = tpu.matmul %2, %4, %cst {dimension_numbers = #tpu.dot_dimension_numbers<[1], [0], [0], [1], [0, 0, 1, 1], [], []>} : vector<8x256xbf16>, vector<256x36xbf16>, vector<8x36xf32> -> vector<8x36xf32>
    %cst_5 = arith.constant 0.000000e+00 : f32
    %6 = vector.broadcast %cst_5 : f32 to vector<2x36xf32>
    %c0_6 = arith.constant 0 : index
    %c0_7 = arith.constant 0 : index
    %c0_8 = arith.constant 0 : index
    %7 = vector.load %arg4[%c0_6, %c0_7, %c0_8] : memref<36x2x8xf32, #tpu.memory_space<vmem>>, vector<1x2x8xf32>
    %8 = vector.shape_cast %7 : vector<1x2x8xf32> to vector<2x8xf32>
    %cst_9 = arith.constant dense<0.000000e+00> : vector<2x36xf32>
    %9 = tpu.matmul %8, %5, %cst_9 {dimension_numbers = #tpu.dot_dimension_numbers<[1], [0], [0], [1], [0, 0, 1, 1], [], []>} : vector<2x8xf32>, vector<8x36xf32>, vector<2x36xf32> -> vector<2x36xf32>
    %c0_10 = arith.constant 0 : index
    %c0_11 = arith.constant 0 : index
    %c0_12 = arith.constant 0 : index
    %10 = vector.load %arg3[%c0_10, %c0_11, %c0_12] : memref<36x36x36xf32, #tpu.memory_space<vmem>>, vector<1x36x36xf32>
    %11 = vector.shape_cast %10 : vector<1x36x36xf32> to vector<36x36xf32>
    %cst_13 = arith.constant dense<0.000000e+00> : vector<2x36xf32>
    %12 = tpu.matmul %9, %11, %cst_13 {dimension_numbers = #tpu.dot_dimension_numbers<[1], [0], [0], [1], [0, 0, 1, 1], [], []>} : vector<2x36xf32>, vector<36x36xf32>, vector<2x36xf32> -> vector<2x36xf32>
    %13 = arith.addf %6, %12 : vector<2x36xf32>
    %c1 = arith.constant 1 : index
    %c0_14 = arith.constant 0 : index
    %c0_15 = arith.constant 0 : index
    %14 = vector.load %arg4[%c1, %c0_14, %c0_15] : memref<36x2x8xf32, #tpu.memory_space<vmem>>, vector<1x2x8xf32>
    %15 = vector.shape_cast %14 : vector<1x2x8xf32> to vector<2x8xf32>
    %cst_16 = arith.constant dense<0.000000e+00> : vector<2x36xf32>
    %16 = tpu.matmul %15, %5, %cst_16 {dimension_numbers = #tpu.dot_dimension_numbers<[1], [0], [0], [1], [0, 0, 1, 1], [], []>} : vector<2x8xf32>, vector<8x36xf32>, vector<2x36xf32> -> vector<2x36xf32>
    %c1_17 = arith.constant 1 : index
    %c0_18 = arith.constant 0 : index
    %c0_19 = arith.constant 0 : index
    %17 = vector.load %arg3[%c1_17, %c0_18, %c0_19] : memref<36x36x36xf32, #tpu.memory_space<vmem>>, vector<1x36x36xf32>
    %18 = vector.shape_cast %17 : vector<1x36x36xf32> to vector<36x36xf32>
    %cst_20 = arith.constant dense<0.000000e+00> : vector<2x36xf32>
    %19 = tpu.matmul %16, %18, %cst_20 {dimension_numbers = #tpu.dot_dimension_numbers<[1], [0], [0], [1], [0, 0, 1, 1], [], []>} : vector<2x36xf32>, vector<36x36xf32>, vector<2x36xf32> -> vector<2x36xf32>
    %20 = arith.addf %13, %19 : vector<2x36xf32>
    %c2 = arith.constant 2 : index
    %c0_21 = arith.constant 0 : index
    %c0_22 = arith.constant 0 : index
    %21 = vector.load %arg4[%c2, %c0_21, %c0_22] : memref<36x2x8xf32, #tpu.memory_space<vmem>>, vector<1x2x8xf32>
    %22 = vector.shape_cast %21 : vector<1x2x8xf32> to vector<2x8xf32>
    %cst_23 = arith.constant dense<0.000000e+00> : vector<2x36xf32>
    %23 = tpu.matmul %22, %5, %cst_23 {dimension_numbers = #tpu.dot_dimension_numbers<[1], [0], [0], [1], [0, 0, 1, 1], [], []>} : vector<2x8xf32>, vector<8x36xf32>, vector<2x36xf32> -> vector<2x36xf32>
    %c2_24 = arith.constant 2 : index
    %c0_25 = arith.constant 0 : index
    %c0_26 = arith.constant 0 : index
    %24 = vector.load %arg3[%c2_24, %c0_25, %c0_26] : memref<36x36x36xf32, #tpu.memory_space<vmem>>, vector<1x36x36xf32>
    %25 = vector.shape_cast %24 : vector<1x36x36xf32> to vector<36x36xf32>
    %cst_27 = arith.constant dense<0.000000e+00> : vector<2x36xf32>
    %26 = tpu.matmul %23, %25, %cst_27 {dimension_numbers = #tpu.dot_dimension_numbers<[1], [0], [0], [1], [0, 0, 1, 1], [], []>} : vector<2x36xf32>, vector<36x36xf32>, vector<2x36xf32> -> vector<2x36xf32>
    %27 = arith.addf %20, %26 : vector<2x36xf32>
    %c3 = arith.constant 3 : index
    %c0_28 = arith.constant 0 : index
    %c0_29 = arith.constant 0 : index
    %28 = vector.load %arg4[%c3, %c0_28, %c0_29] : memref<36x2x8xf32, #tpu.memory_space<vmem>>, vector<1x2x8xf32>
    %29 = vector.shape_cast %28 : vector<1x2x8xf32> to vector<2x8xf32>
    %cst_30 = arith.constant dense<0.000000e+00> : vector<2x36xf32>
    %30 = tpu.matmul %29, %5, %cst_30 {dimension_numbers = #tpu.dot_dimension_numbers<[1], [0], [0], [1], [0, 0, 1, 1], [], []>} : vector<2x8xf32>, vector<8x36xf32>, vector<2x36xf32> -> vector<2x36xf32>
    %c3_31 = arith.constant 3 : index
    %c0_32 = arith.constant 0 : index
    %c0_33 = arith.constant 0 : index
    %31 = vector.load %arg3[%c3_31, %c0_32, %c0_33] : memref<36x36x36xf32, #tpu.memory_space<vmem>>, vector<1x36x36xf32>
    %32 = vector.shape_cast %31 : vector<1x36x36xf32> to vector<36x36xf32>
    %cst_34 = arith.constant dense<0.000000e+00> : vector<2x36xf32>
    %33 = tpu.matmul %30, %32, %cst_34 {dimension_numbers = #tpu.dot_dimension_numbers<[1], [0], [0], [1], [0, 0, 1, 1], [], []>} : vector<2x36xf32>, vector<36x36xf32>, vector<2x36xf32> -> vector<2x36xf32>
    %34 = arith.addf %27, %33 : vector<2x36xf32>
    %c4 = arith.constant 4 : index
    %c0_35 = arith.constant 0 : index
    %c0_36 = arith.constant 0 : index
    %35 = vector.load %arg4[%c4, %c0_35, %c0_36] : memref<36x2x8xf32, #tpu.memory_space<vmem>>, vector<1x2x8xf32>
    %36 = vector.shape_cast %35 : vector<1x2x8xf32> to vector<2x8xf32>
    %cst_37 = arith.constant dense<0.000000e+00> : vector<2x36xf32>
    %37 = tpu.matmul %36, %5, %cst_37 {dimension_numbers = #tpu.dot_dimension_numbers<[1], [0], [0], [1], [0, 0, 1, 1], [], []>} : vector<2x8xf32>, vector<8x36xf32>, vector<2x36xf32> -> vector<2x36xf32>
    %c4_38 = arith.constant 4 : index
    %c0_39 = arith.constant 0 : index
    %c0_40 = arith.constant 0 : index
    %38 = vector.load %arg3[%c4_38, %c0_39, %c0_40] : memref<36x36x36xf32, #tpu.memory_space<vmem>>, vector<1x36x36xf32>
    %39 = vector.shape_cast %38 : vector<1x36x36xf32> to vector<36x36xf32>
    %cst_41 = arith.constant dense<0.000000e+00> : vector<2x36xf32>
    %40 = tpu.matmul %37, %39, %cst_41 {dimension_numbers = #tpu.dot_dimension_numbers<[1], [0], [0], [1], [0, 0, 1, 1], [], []>} : vector<2x36xf32>, vector<36x36xf32>, vector<2x36xf32> -> vector<2x36xf32>
    %41 = arith.addf %34, %40 : vector<2x36xf32>
    %c5 = arith.constant 5 : index
    %c0_42 = arith.constant 0 : index
    %c0_43 = arith.constant 0 : index
    %42 = vector.load %arg4[%c5, %c0_42, %c0_43] : memref<36x2x8xf32, #tpu.memory_space<vmem>>, vector<1x2x8xf32>
    %43 = vector.shape_cast %42 : vector<1x2x8xf32> to vector<2x8xf32>
    %cst_44 = arith.constant dense<0.000000e+00> : vector<2x36xf32>
    %44 = tpu.matmul %43, %5, %cst_44 {dimension_numbers = #tpu.dot_dimension_numbers<[1], [0], [0], [1], [0, 0, 1, 1], [], []>} : vector<2x8xf32>, vector<8x36xf32>, vector<2x36xf32> -> vector<2x36xf32>
    %c5_45 = arith.constant 5 : index
    %c0_46 = arith.constant 0 : index
    %c0_47 = arith.constant 0 : index
    %45 = vector.load %arg3[%c5_45, %c0_46, %c0_47] : memref<36x36x36xf32, #tpu.memory_space<vmem>>, vector<1x36x36xf32>
    %46 = vector.shape_cast %45 : vector<1x36x36xf32> to vector<36x36xf32>
    %cst_48 = arith.constant dense<0.000000e+00> : vector<2x36xf32>
    %47 = tpu.matmul %44, %46, %cst_48 {dimension_numbers = #tpu.dot_dimension_numbers<[1], [0], [0], [1], [0, 0, 1, 1], [], []>} : vector<2x36xf32>, vector<36x36xf32>, vector<2x36xf32> -> vector<2x36xf32>
    %48 = arith.addf %41, %47 : vector<2x36xf32>
    %c6 = arith.constant 6 : index
    %c0_49 = arith.constant 0 : index
    %c0_50 = arith.constant 0 : index
    %49 = vector.load %arg4[%c6, %c0_49, %c0_50] : memref<36x2x8xf32, #tpu.memory_space<vmem>>, vector<1x2x8xf32>
    %50 = vector.shape_cast %49 : vector<1x2x8xf32> to vector<2x8xf32>
    %cst_51 = arith.constant dense<0.000000e+00> : vector<2x36xf32>
    %51 = tpu.matmul %50, %5, %cst_51 {dimension_numbers = #tpu.dot_dimension_numbers<[1], [0], [0], [1], [0, 0, 1, 1], [], []>} : vector<2x8xf32>, vector<8x36xf32>, vector<2x36xf32> -> vector<2x36xf32>
    %c6_52 = arith.constant 6 : index
    %c0_53 = arith.constant 0 : index
    %c0_54 = arith.constant 0 : index
    %52 = vector.load %arg3[%c6_52, %c0_53, %c0_54] : memref<36x36x36xf32, #tpu.memory_space<vmem>>, vector<1x36x36xf32>
    %53 = vector.shape_cast %52 : vector<1x36x36xf32> to vector<36x36xf32>
    %cst_55 = arith.constant dense<0.000000e+00> : vector<2x36xf32>
    %54 = tpu.matmul %51, %53, %cst_55 {dimension_numbers = #tpu.dot_dimension_numbers<[1], [0], [0], [1], [0, 0, 1, 1], [], []>} : vector<2x36xf32>, vector<36x36xf32>, vector<2x36xf32> -> vector<2x36xf32>
    %55 = arith.addf %48, %54 : vector<2x36xf32>
    %c7 = arith.constant 7 : index
    %c0_56 = arith.constant 0 : index
    %c0_57 = arith.constant 0 : index
    %56 = vector.load %arg4[%c7, %c0_56, %c0_57] : memref<36x2x8xf32, #tpu.memory_space<vmem>>, vector<1x2x8xf32>
    %57 = vector.shape_cast %56 : vector<1x2x8xf32> to vector<2x8xf32>
    %cst_58 = arith.constant dense<0.000000e+00> : vector<2x36xf32>
    %58 = tpu.matmul %57, %5, %cst_58 {dimension_numbers = #tpu.dot_dimension_numbers<[1], [0], [0], [1], [0, 0, 1, 1], [], []>} : vector<2x8xf32>, vector<8x36xf32>, vector<2x36xf32> -> vector<2x36xf32>
    %c7_59 = arith.constant 7 : index
    %c0_60 = arith.constant 0 : index
    %c0_61 = arith.constant 0 : index
    %59 = vector.load %arg3[%c7_59, %c0_60, %c0_61] : memref<36x36x36xf32, #tpu.memory_space<vmem>>, vector<1x36x36xf32>
    %60 = vector.shape_cast %59 : vector<1x36x36xf32> to vector<36x36xf32>
    %cst_62 = arith.constant dense<0.000000e+00> : vector<2x36xf32>
    %61 = tpu.matmul %58, %60, %cst_62 {dimension_numbers = #tpu.dot_dimension_numbers<[1], [0], [0], [1], [0, 0, 1, 1], [], []>} : vector<2x36xf32>, vector<36x36xf32>, vector<2x36xf32> -> vector<2x36xf32>
    %62 = arith.addf %55, %61 : vector<2x36xf32>
    %c8 = arith.constant 8 : index
    %c0_63 = arith.constant 0 : index
    %c0_64 = arith.constant 0 : index
    %63 = vector.load %arg4[%c8, %c0_63, %c0_64] : memref<36x2x8xf32, #tpu.memory_space<vmem>>, vector<1x2x8xf32>
    %64 = vector.shape_cast %63 : vector<1x2x8xf32> to vector<2x8xf32>
    %cst_65 = arith.constant dense<0.000000e+00> : vector<2x36xf32>
    %65 = tpu.matmul %64, %5, %cst_65 {dimension_numbers = #tpu.dot_dimension_numbers<[1], [0], [0], [1], [0, 0, 1, 1], [], []>} : vector<2x8xf32>, vector<8x36xf32>, vector<2x36xf32> -> vector<2x36xf32>
    %c8_66 = arith.constant 8 : index
    %c0_67 = arith.constant 0 : index
    %c0_68 = arith.constant 0 : index
    %66 = vector.load %arg3[%c8_66, %c0_67, %c0_68] : memref<36x36x36xf32, #tpu.memory_space<vmem>>, vector<1x36x36xf32>
    %67 = vector.shape_cast %66 : vector<1x36x36xf32> to vector<36x36xf32>
    %cst_69 = arith.constant dense<0.000000e+00> : vector<2x36xf32>
    %68 = tpu.matmul %65, %67, %cst_69 {dimension_numbers = #tpu.dot_dimension_numbers<[1], [0], [0], [1], [0, 0, 1, 1], [], []>} : vector<2x36xf32>, vector<36x36xf32>, vector<2x36xf32> -> vector<2x36xf32>
    %69 = arith.addf %62, %68 : vector<2x36xf32>
    %c0_70 = arith.constant 0 : index
    %c0_71 = arith.constant 0 : index
    %c0_72 = arith.constant 0 : index
    %70 = vector.load %arg5[%c0_70, %c0_71, %c0_72] : memref<4x2x1xf32, #tpu.memory_space<vmem>>, vector<1x2x1xf32>
    %71 = vector.shape_cast %70 : vector<1x2x1xf32> to vector<2x1xf32>
    %72 = vector.broadcast %71 : vector<2x1xf32> to vector<2x36xf32>
    %73 = arith.addf %69, %72 : vector<2x36xf32>
    %cst_73 = arith.constant 0.000000e+00 : f32
    %74 = vector.broadcast %cst_73 : f32 to vector<2x36xf32>
    %75 = arith.maximumf %73, %74 : vector<2x36xf32>
    %76 = arith.truncf %75 : vector<2x36xf32> to vector<2x36xbf16>
    %c0_74 = arith.constant 0 : index
    %c0_75 = arith.constant 0 : index
    %c0_76 = arith.constant 0 : index
    %77 = vector.load %arg6[%c0_74, %c0_75, %c0_76] : memref<4x36x256xbf16, #tpu.memory_space<vmem>>, vector<1x36x256xbf16>
    %78 = vector.shape_cast %77 : vector<1x36x256xbf16> to vector<36x256xbf16>
    %cst_77 = arith.constant dense<0.000000e+00> : vector<2x256xf32>
    %79 = tpu.matmul %76, %78, %cst_77 {dimension_numbers = #tpu.dot_dimension_numbers<[1], [0], [0], [1], [0, 0, 1, 1], [], []>} : vector<2x36xbf16>, vector<36x256xbf16>, vector<2x256xf32> -> vector<2x256xf32>
    %c0_78 = arith.constant 0 : index
    %c0_79 = arith.constant 0 : index
    %c0_80 = arith.constant 0 : index
    %80 = vector.load %arg7[%c0_78, %c0_79, %c0_80] : memref<1x16x256xf32, #tpu.memory_space<vmem>>, vector<1x2x256xf32>
    %81 = vector.shape_cast %80 : vector<1x2x256xf32> to vector<2x256xf32>
    %82 = vector.shape_cast %79 : vector<2x256xf32> to vector<1x2x256xf32>
    tpu.vector_store %arg7[%c0_78, %c0_79, %c0_80], %82 {strides = array<i32>} : memref<1x16x256xf32, #tpu.memory_space<vmem>>, vector<1x2x256xf32>,
    %c1_81 = arith.constant 1 : index
    %c0_82 = arith.constant 0 : index
    %c0_83 = arith.constant 0 : index
    %83 = vector.load %arg2[%c1_81, %c0_82, %c0_83] : memref<4x256x36xbf16, #tpu.memory_space<vmem>>, vector<1x256x36xbf16>
    %84 = vector.shape_cast %83 : vector<1x256x36xbf16> to vector<256x36xbf16>
    %cst_84 = arith.constant dense<0.000000e+00> : vector<8x36xf32>
    %85 = tpu.matmul %2, %84, %cst_84 {dimension_numbers = #tpu.dot_dimension_numbers<[1], [0], [0], [1], [0, 0, 1, 1], [], []>} : vector<8x256xbf16>, vector<256x36xbf16>, vector<8x36xf32> -> vector<8x36xf32>
    %cst_85 = arith.constant 0.000000e+00 : f32
    %86 = vector.broadcast %cst_85 : f32 to vector<2x36xf32>
    %c9 = arith.constant 9 : index
    %c0_86 = arith.constant 0 : index
    %c0_87 = arith.constant 0 : index
    %87 = vector.load %arg4[%c9, %c0_86, %c0_87] : memref<36x2x8xf32, #tpu.memory_space<vmem>>, vector<1x2x8xf32>
    %88 = vector.shape_cast %87 : vector<1x2x8xf32> to vector<2x8xf32>
    %cst_88 = arith.constant dense<0.000000e+00> : vector<2x36xf32>
    %89 = tpu.matmul %88, %85, %cst_88 {dimension_numbers = #tpu.dot_dimension_numbers<[1], [0], [0], [1], [0, 0, 1, 1], [], []>} : vector<2x8xf32>, vector<8x36xf32>, vector<2x36xf32> -> vector<2x36xf32>
    %c9_89 = arith.constant 9 : index
    %c0_90 = arith.constant 0 : index
    %c0_91 = arith.constant 0 : index
    %90 = vector.load %arg3[%c9_89, %c0_90, %c0_91] : memref<36x36x36xf32, #tpu.memory_space<vmem>>, vector<1x36x36xf32>
    %91 = vector.shape_cast %90 : vector<1x36x36xf32> to vector<36x36xf32>
    %cst_92 = arith.constant dense<0.000000e+00> : vector<2x36xf32>
    %92 = tpu.matmul %89, %91, %cst_92 {dimension_numbers = #tpu.dot_dimension_numbers<[1], [0], [0], [1], [0, 0, 1, 1], [], []>} : vector<2x36xf32>, vector<36x36xf32>, vector<2x36xf32> -> vector<2x36xf32>
    %93 = arith.addf %86, %92 : vector<2x36xf32>
    %c10 = arith.constant 10 : index
    %c0_93 = arith.constant 0 : index
    %c0_94 = arith.constant 0 : index
    %94 = vector.load %arg4[%c10, %c0_93, %c0_94] : memref<36x2x8xf32, #tpu.memory_space<vmem>>, vector<1x2x8xf32>
    %95 = vector.shape_cast %94 : vector<1x2x8xf32> to vector<2x8xf32>
    %cst_95 = arith.constant dense<0.000000e+00> : vector<2x36xf32>
    %96 = tpu.matmul %95, %85, %cst_95 {dimension_numbers = #tpu.dot_dimension_numbers<[1], [0], [0], [1], [0, 0, 1, 1], [], []>} : vector<2x8xf32>, vector<8x36xf32>, vector<2x36xf32> -> vector<2x36xf32>
    %c10_96 = arith.constant 10 : index
    %c0_97 = arith.constant 0 : index
    %c0_98 = arith.constant 0 : index
    %97 = vector.load %arg3[%c10_96, %c0_97, %c0_98] : memref<36x36x36xf32, #tpu.memory_space<vmem>>, vector<1x36x36xf32>
    %98 = vector.shape_cast %97 : vector<1x36x36xf32> to vector<36x36xf32>
    %cst_99 = arith.constant dense<0.000000e+00> : vector<2x36xf32>
    %99 = tpu.matmul %96, %98, %cst_99 {dimension_numbers = #tpu.dot_dimension_numbers<[1], [0], [0], [1], [0, 0, 1, 1], [], []>} : vector<2x36xf32>, vector<36x36xf32>, vector<2x36xf32> -> vector<2x36xf32>
    %100 = arith.addf %93, %99 : vector<2x36xf32>
    %c11 = arith.constant 11 : index
    %c0_100 = arith.constant 0 : index
    %c0_101 = arith.constant 0 : index
    %101 = vector.load %arg4[%c11, %c0_100, %c0_101] : memref<36x2x8xf32, #tpu.memory_space<vmem>>, vector<1x2x8xf32>
    %102 = vector.shape_cast %101 : vector<1x2x8xf32> to vector<2x8xf32>
    %cst_102 = arith.constant dense<0.000000e+00> : vector<2x36xf32>
    %103 = tpu.matmul %102, %85, %cst_102 {dimension_numbers = #tpu.dot_dimension_numbers<[1], [0], [0], [1], [0, 0, 1, 1], [], []>} : vector<2x8xf32>, vector<8x36xf32>, vector<2x36xf32> -> vector<2x36xf32>
    %c11_103 = arith.constant 11 : index
    %c0_104 = arith.constant 0 : index
    %c0_105 = arith.constant 0 : index
    %104 = vector.load %arg3[%c11_103, %c0_104, %c0_105] : memref<36x36x36xf32, #tpu.memory_space<vmem>>, vector<1x36x36xf32>
    %105 = vector.shape_cast %104 : vector<1x36x36xf32> to vector<36x36xf32>
    %cst_106 = arith.constant dense<0.000000e+00> : vector<2x36xf32>
    %106 = tpu.matmul %103, %105, %cst_106 {dimension_numbers = #tpu.dot_dimension_numbers<[1], [0], [0], [1], [0, 0, 1, 1], [], []>} : vector<2x36xf32>, vector<36x36xf32>, vector<2x36xf32> -> vector<2x36xf32>
    %107 = arith.addf %100, %106 : vector<2x36xf32>
    %c12 = arith.constant 12 : index
    %c0_107 = arith.constant 0 : index
    %c0_108 = arith.constant 0 : index
    %108 = vector.load %arg4[%c12, %c0_107, %c0_108] : memref<36x2x8xf32, #tpu.memory_space<vmem>>, vector<1x2x8xf32>
    %109 = vector.shape_cast %108 : vector<1x2x8xf32> to vector<2x8xf32>
    %cst_109 = arith.constant dense<0.000000e+00> : vector<2x36xf32>
    %110 = tpu.matmul %109, %85, %cst_109 {dimension_numbers = #tpu.dot_dimension_numbers<[1], [0], [0], [1], [0, 0, 1, 1], [], []>} : vector<2x8xf32>, vector<8x36xf32>, vector<2x36xf32> -> vector<2x36xf32>
    %c12_110 = arith.constant 12 : index
    %c0_111 = arith.constant 0 : index
    %c0_112 = arith.constant 0 : index
    %111 = vector.load %arg3[%c12_110, %c0_111, %c0_112] : memref<36x36x36xf32, #tpu.memory_space<vmem>>, vector<1x36x36xf32>
    %112 = vector.shape_cast %111 : vector<1x36x36xf32> to vector<36x36xf32>
    %cst_113 = arith.constant dense<0.000000e+00> : vector<2x36xf32>
    %113 = tpu.matmul %110, %112, %cst_113 {dimension_numbers = #tpu.dot_dimension_numbers<[1], [0], [0], [1], [0, 0, 1, 1], [], []>} : vector<2x36xf32>, vector<36x36xf32>, vector<2x36xf32> -> vector<2x36xf32>
    %114 = arith.addf %107, %113 : vector<2x36xf32>
    %c13 = arith.constant 13 : index
    %c0_114 = arith.constant 0 : index
    %c0_115 = arith.constant 0 : index
    %115 = vector.load %arg4[%c13, %c0_114, %c0_115] : memref<36x2x8xf32, #tpu.memory_space<vmem>>, vector<1x2x8xf32>
    %116 = vector.shape_cast %115 : vector<1x2x8xf32> to vector<2x8xf32>
    %cst_116 = arith.constant dense<0.000000e+00> : vector<2x36xf32>
    %117 = tpu.matmul %116, %85, %cst_116 {dimension_numbers = #tpu.dot_dimension_numbers<[1], [0], [0], [1], [0, 0, 1, 1], [], []>} : vector<2x8xf32>, vector<8x36xf32>, vector<2x36xf32> -> vector<2x36xf32>
    %c13_117 = arith.constant 13 : index
    %c0_118 = arith.constant 0 : index
    %c0_119 = arith.constant 0 : index
    %118 = vector.load %arg3[%c13_117, %c0_118, %c0_119] : memref<36x36x36xf32, #tpu.memory_space<vmem>>, vector<1x36x36xf32>
    %119 = vector.shape_cast %118 : vector<1x36x36xf32> to vector<36x36xf32>
    %cst_120 = arith.constant dense<0.000000e+00> : vector<2x36xf32>
    %120 = tpu.matmul %117, %119, %cst_120 {dimension_numbers = #tpu.dot_dimension_numbers<[1], [0], [0], [1], [0, 0, 1, 1], [], []>} : vector<2x36xf32>, vector<36x36xf32>, vector<2x36xf32> -> vector<2x36xf32>
    %121 = arith.addf %114, %120 : vector<2x36xf32>
    %c14 = arith.constant 14 : index
    %c0_121 = arith.constant 0 : index
    %c0_122 = arith.constant 0 : index
    %122 = vector.load %arg4[%c14, %c0_121, %c0_122] : memref<36x2x8xf32, #tpu.memory_space<vmem>>, vector<1x2x8xf32>
    %123 = vector.shape_cast %122 : vector<1x2x8xf32> to vector<2x8xf32>
    %cst_123 = arith.constant dense<0.000000e+00> : vector<2x36xf32>
    %124 = tpu.matmul %123, %85, %cst_123 {dimension_numbers = #tpu.dot_dimension_numbers<[1], [0], [0], [1], [0, 0, 1, 1], [], []>} : vector<2x8xf32>, vector<8x36xf32>, vector<2x36xf32> -> vector<2x36xf32>
    %c14_124 = arith.constant 14 : index
    %c0_125 = arith.constant 0 : index
    %c0_126 = arith.constant 0 : index
    %125 = vector.load %arg3[%c14_124, %c0_125, %c0_126] : memref<36x36x36xf32, #tpu.memory_space<vmem>>, vector<1x36x36xf32>
    %126 = vector.shape_cast %125 : vector<1x36x36xf32> to vector<36x36xf32>
    %cst_127 = arith.constant dense<0.000000e+00> : vector<2x36xf32>
    %127 = tpu.matmul %124, %126, %cst_127 {dimension_numbers = #tpu.dot_dimension_numbers<[1], [0], [0], [1], [0, 0, 1, 1], [], []>} : vector<2x36xf32>, vector<36x36xf32>, vector<2x36xf32> -> vector<2x36xf32>
    %128 = arith.addf %121, %127 : vector<2x36xf32>
    %c15 = arith.constant 15 : index
    %c0_128 = arith.constant 0 : index
    %c0_129 = arith.constant 0 : index
    %129 = vector.load %arg4[%c15, %c0_128, %c0_129] : memref<36x2x8xf32, #tpu.memory_space<vmem>>, vector<1x2x8xf32>
    %130 = vector.shape_cast %129 : vector<1x2x8xf32> to vector<2x8xf32>
    %cst_130 = arith.constant dense<0.000000e+00> : vector<2x36xf32>
    %131 = tpu.matmul %130, %85, %cst_130 {dimension_numbers = #tpu.dot_dimension_numbers<[1], [0], [0], [1], [0, 0, 1, 1], [], []>} : vector<2x8xf32>, vector<8x36xf32>, vector<2x36xf32> -> vector<2x36xf32>
    %c15_131 = arith.constant 15 : index
    %c0_132 = arith.constant 0 : index
    %c0_133 = arith.constant 0 : index
    %132 = vector.load %arg3[%c15_131, %c0_132, %c0_133] : memref<36x36x36xf32, #tpu.memory_space<vmem>>, vector<1x36x36xf32>
    %133 = vector.shape_cast %132 : vector<1x36x36xf32> to vector<36x36xf32>
    %cst_134 = arith.constant dense<0.000000e+00> : vector<2x36xf32>
    %134 = tpu.matmul %131, %133, %cst_134 {dimension_numbers = #tpu.dot_dimension_numbers<[1], [0], [0], [1], [0, 0, 1, 1], [], []>} : vector<2x36xf32>, vector<36x36xf32>, vector<2x36xf32> -> vector<2x36xf32>
    %135 = arith.addf %128, %134 : vector<2x36xf32>
    %c16 = arith.constant 16 : index
    %c0_135 = arith.constant 0 : index
    %c0_136 = arith.constant 0 : index
    %136 = vector.load %arg4[%c16, %c0_135, %c0_136] : memref<36x2x8xf32, #tpu.memory_space<vmem>>, vector<1x2x8xf32>
    %137 = vector.shape_cast %136 : vector<1x2x8xf32> to vector<2x8xf32>
    %cst_137 = arith.constant dense<0.000000e+00> : vector<2x36xf32>
    %138 = tpu.matmul %137, %85, %cst_137 {dimension_numbers = #tpu.dot_dimension_numbers<[1], [0], [0], [1], [0, 0, 1, 1], [], []>} : vector<2x8xf32>, vector<8x36xf32>, vector<2x36xf32> -> vector<2x36xf32>
    %c16_138 = arith.constant 16 : index
    %c0_139 = arith.constant 0 : index
    %c0_140 = arith.constant 0 : index
    %139 = vector.load %arg3[%c16_138, %c0_139, %c0_140] : memref<36x36x36xf32, #tpu.memory_space<vmem>>, vector<1x36x36xf32>
    %140 = vector.shape_cast %139 : vector<1x36x36xf32> to vector<36x36xf32>
    %cst_141 = arith.constant dense<0.000000e+00> : vector<2x36xf32>
    %141 = tpu.matmul %138, %140, %cst_141 {dimension_numbers = #tpu.dot_dimension_numbers<[1], [0], [0], [1], [0, 0, 1, 1], [], []>} : vector<2x36xf32>, vector<36x36xf32>, vector<2x36xf32> -> vector<2x36xf32>
    %142 = arith.addf %135, %141 : vector<2x36xf32>
    %c17 = arith.constant 17 : index
    %c0_142 = arith.constant 0 : index
    %c0_143 = arith.constant 0 : index
    %143 = vector.load %arg4[%c17, %c0_142, %c0_143] : memref<36x2x8xf32, #tpu.memory_space<vmem>>, vector<1x2x8xf32>
    %144 = vector.shape_cast %143 : vector<1x2x8xf32> to vector<2x8xf32>
    %cst_144 = arith.constant dense<0.000000e+00> : vector<2x36xf32>
    %145 = tpu.matmul %144, %85, %cst_144 {dimension_numbers = #tpu.dot_dimension_numbers<[1], [0], [0], [1], [0, 0, 1, 1], [], []>} : vector<2x8xf32>, vector<8x36xf32>, vector<2x36xf32> -> vector<2x36xf32>
    %c17_145 = arith.constant 17 : index
    %c0_146 = arith.constant 0 : index
    %c0_147 = arith.constant 0 : index
    %146 = vector.load %arg3[%c17_145, %c0_146, %c0_147] : memref<36x36x36xf32, #tpu.memory_space<vmem>>, vector<1x36x36xf32>
    %147 = vector.shape_cast %146 : vector<1x36x36xf32> to vector<36x36xf32>
    %cst_148 = arith.constant dense<0.000000e+00> : vector<2x36xf32>
    %148 = tpu.matmul %145, %147, %cst_148 {dimension_numbers = #tpu.dot_dimension_numbers<[1], [0], [0], [1], [0, 0, 1, 1], [], []>} : vector<2x36xf32>, vector<36x36xf32>, vector<2x36xf32> -> vector<2x36xf32>
    %149 = arith.addf %142, %148 : vector<2x36xf32>
    %c1_149 = arith.constant 1 : index
    %c0_150 = arith.constant 0 : index
    %c0_151 = arith.constant 0 : index
    %150 = vector.load %arg5[%c1_149, %c0_150, %c0_151] : memref<4x2x1xf32, #tpu.memory_space<vmem>>, vector<1x2x1xf32>
    %151 = vector.shape_cast %150 : vector<1x2x1xf32> to vector<2x1xf32>
    %152 = vector.broadcast %151 : vector<2x1xf32> to vector<2x36xf32>
    %153 = arith.addf %149, %152 : vector<2x36xf32>
    %cst_152 = arith.constant 0.000000e+00 : f32
    %154 = vector.broadcast %cst_152 : f32 to vector<2x36xf32>
    %155 = arith.maximumf %153, %154 : vector<2x36xf32>
    %156 = arith.truncf %155 : vector<2x36xf32> to vector<2x36xbf16>
    %c1_153 = arith.constant 1 : index
    %c0_154 = arith.constant 0 : index
    %c0_155 = arith.constant 0 : index
    %157 = vector.load %arg6[%c1_153, %c0_154, %c0_155] : memref<4x36x256xbf16, #tpu.memory_space<vmem>>, vector<1x36x256xbf16>
    %158 = vector.shape_cast %157 : vector<1x36x256xbf16> to vector<36x256xbf16>
    %cst_156 = arith.constant dense<0.000000e+00> : vector<2x256xf32>
    %159 = tpu.matmul %156, %158, %cst_156 {dimension_numbers = #tpu.dot_dimension_numbers<[1], [0], [0], [1], [0, 0, 1, 1], [], []>} : vector<2x36xbf16>, vector<36x256xbf16>, vector<2x256xf32> -> vector<2x256xf32>
    %c0_157 = arith.constant 0 : index
    %c2_158 = arith.constant 2 : index
    %c0_159 = arith.constant 0 : index
    %160 = vector.load %arg7[%c0_157, %c2_158, %c0_159] : memref<1x16x256xf32, #tpu.memory_space<vmem>>, vector<1x2x256xf32>
    %161 = vector.shape_cast %160 : vector<1x2x256xf32> to vector<2x256xf32>
    %162 = vector.shape_cast %159 : vector<2x256xf32> to vector<1x2x256xf32>
    tpu.vector_store %arg7[%c0_157, %c2_158, %c0_159], %162 {strides = array<i32>} : memref<1x16x256xf32, #tpu.memory_space<vmem>>, vector<1x2x256xf32>,
    %c2_160 = arith.constant 2 : index
    %c0_161 = arith.constant 0 : index
    %c0_162 = arith.constant 0 : index
    %163 = vector.load %arg2[%c2_160, %c0_161, %c0_162] : memref<4x256x36xbf16, #tpu.memory_space<vmem>>, vector<1x256x36xbf16>
    %164 = vector.shape_cast %163 : vector<1x256x36xbf16> to vector<256x36xbf16>
    %cst_163 = arith.constant dense<0.000000e+00> : vector<8x36xf32>
    %165 = tpu.matmul %2, %164, %cst_163 {dimension_numbers = #tpu.dot_dimension_numbers<[1], [0], [0], [1], [0, 0, 1, 1], [], []>} : vector<8x256xbf16>, vector<256x36xbf16>, vector<8x36xf32> -> vector<8x36xf32>
    %cst_164 = arith.constant 0.000000e+00 : f32
    %166 = vector.broadcast %cst_164 : f32 to vector<2x36xf32>
    %c18 = arith.constant 18 : index
    %c0_165 = arith.constant 0 : index
    %c0_166 = arith.constant 0 : index
    %167 = vector.load %arg4[%c18, %c0_165, %c0_166] : memref<36x2x8xf32, #tpu.memory_space<vmem>>, vector<1x2x8xf32>
    %168 = vector.shape_cast %167 : vector<1x2x8xf32> to vector<2x8xf32>
    %cst_167 = arith.constant dense<0.000000e+00> : vector<2x36xf32>
    %169 = tpu.matmul %168, %165, %cst_167 {dimension_numbers = #tpu.dot_dimension_numbers<[1], [0], [0], [1], [0, 0, 1, 1], [], []>} : vector<2x8xf32>, vector<8x36xf32>, vector<2x36xf32> -> vector<2x36xf32>
    %c18_168 = arith.constant 18 : index
    %c0_169 = arith.constant 0 : index
    %c0_170 = arith.constant 0 : index
    %170 = vector.load %arg3[%c18_168, %c0_169, %c0_170] : memref<36x36x36xf32, #tpu.memory_space<vmem>>, vector<1x36x36xf32>
    %171 = vector.shape_cast %170 : vector<1x36x36xf32> to vector<36x36xf32>
    %cst_171 = arith.constant dense<0.000000e+00> : vector<2x36xf32>
    %172 = tpu.matmul %169, %171, %cst_171 {dimension_numbers = #tpu.dot_dimension_numbers<[1], [0], [0], [1], [0, 0, 1, 1], [], []>} : vector<2x36xf32>, vector<36x36xf32>, vector<2x36xf32> -> vector<2x36xf32>
    %173 = arith.addf %166, %172 : vector<2x36xf32>
    %c19 = arith.constant 19 : index
    %c0_172 = arith.constant 0 : index
    %c0_173 = arith.constant 0 : index
    %174 = vector.load %arg4[%c19, %c0_172, %c0_173] : memref<36x2x8xf32, #tpu.memory_space<vmem>>, vector<1x2x8xf32>
    %175 = vector.shape_cast %174 : vector<1x2x8xf32> to vector<2x8xf32>
    %cst_174 = arith.constant dense<0.000000e+00> : vector<2x36xf32>
    %176 = tpu.matmul %175, %165, %cst_174 {dimension_numbers = #tpu.dot_dimension_numbers<[1], [0], [0], [1], [0, 0, 1, 1], [], []>} : vector<2x8xf32>, vector<8x36xf32>, vector<2x36xf32> -> vector<2x36xf32>
    %c19_175 = arith.constant 19 : index
    %c0_176 = arith.constant 0 : index
    %c0_177 = arith.constant 0 : index
    %177 = vector.load %arg3[%c19_175, %c0_176, %c0_177] : memref<36x36x36xf32, #tpu.memory_space<vmem>>, vector<1x36x36xf32>
    %178 = vector.shape_cast %177 : vector<1x36x36xf32> to vector<36x36xf32>
    %cst_178 = arith.constant dense<0.000000e+00> : vector<2x36xf32>
    %179 = tpu.matmul %176, %178, %cst_178 {dimension_numbers = #tpu.dot_dimension_numbers<[1], [0], [0], [1], [0, 0, 1, 1], [], []>} : vector<2x36xf32>, vector<36x36xf32>, vector<2x36xf32> -> vector<2x36xf32>
    %180 = arith.addf %173, %179 : vector<2x36xf32>
    %c20 = arith.constant 20 : index
    %c0_179 = arith.constant 0 : index
    %c0_180 = arith.constant 0 : index
    %181 = vector.load %arg4[%c20, %c0_179, %c0_180] : memref<36x2x8xf32, #tpu.memory_space<vmem>>, vector<1x2x8xf32>
    %182 = vector.shape_cast %181 : vector<1x2x8xf32> to vector<2x8xf32>
    %cst_181 = arith.constant dense<0.000000e+00> : vector<2x36xf32>
    %183 = tpu.matmul %182, %165, %cst_181 {dimension_numbers = #tpu.dot_dimension_numbers<[1], [0], [0], [1], [0, 0, 1, 1], [], []>} : vector<2x8xf32>, vector<8x36xf32>, vector<2x36xf32> -> vector<2x36xf32>
    %c20_182 = arith.constant 20 : index
    %c0_183 = arith.constant 0 : index
    %c0_184 = arith.constant 0 : index
    %184 = vector.load %arg3[%c20_182, %c0_183, %c0_184] : memref<36x36x36xf32, #tpu.memory_space<vmem>>, vector<1x36x36xf32>
    %185 = vector.shape_cast %184 : vector<1x36x36xf32> to vector<36x36xf32>
    %cst_185 = arith.constant dense<0.000000e+00> : vector<2x36xf32>
    %186 = tpu.matmul %183, %185, %cst_185 {dimension_numbers = #tpu.dot_dimension_numbers<[1], [0], [0], [1], [0, 0, 1, 1], [], []>} : vector<2x36xf32>, vector<36x36xf32>, vector<2x36xf32> -> vector<2x36xf32>
    %187 = arith.addf %180, %186 : vector<2x36xf32>
    %c21 = arith.constant 21 : index
    %c0_186 = arith.constant 0 : index
    %c0_187 = arith.constant 0 : index
    %188 = vector.load %arg4[%c21, %c0_186, %c0_187] : memref<36x2x8xf32, #tpu.memory_space<vmem>>, vector<1x2x8xf32>
    %189 = vector.shape_cast %188 : vector<1x2x8xf32> to vector<2x8xf32>
    %cst_188 = arith.constant dense<0.000000e+00> : vector<2x36xf32>
    %190 = tpu.matmul %189, %165, %cst_188 {dimension_numbers = #tpu.dot_dimension_numbers<[1], [0], [0], [1], [0, 0, 1, 1], [], []>} : vector<2x8xf32>, vector<8x36xf32>, vector<2x36xf32> -> vector<2x36xf32>
    %c21_189 = arith.constant 21 : index
    %c0_190 = arith.constant 0 : index
    %c0_191 = arith.constant 0 : index
    %191 = vector.load %arg3[%c21_189, %c0_190, %c0_191] : memref<36x36x36xf32, #tpu.memory_space<vmem>>, vector<1x36x36xf32>
    %192 = vector.shape_cast %191 : vector<1x36x36xf32> to vector<36x36xf32>
    %cst_192 = arith.constant dense<0.000000e+00> : vector<2x36xf32>
    %193 = tpu.matmul %190, %192, %cst_192 {dimension_numbers = #tpu.dot_dimension_numbers<[1], [0], [0], [1], [0, 0, 1, 1], [], []>} : vector<2x36xf32>, vector<36x36xf32>, vector<2x36xf32> -> vector<2x36xf32>
    %194 = arith.addf %187, %193 : vector<2x36xf32>
    %c22 = arith.constant 22 : index
    %c0_193 = arith.constant 0 : index
    %c0_194 = arith.constant 0 : index
    %195 = vector.load %arg4[%c22, %c0_193, %c0_194] : memref<36x2x8xf32, #tpu.memory_space<vmem>>, vector<1x2x8xf32>
    %196 = vector.shape_cast %195 : vector<1x2x8xf32> to vector<2x8xf32>
    %cst_195 = arith.constant dense<0.000000e+00> : vector<2x36xf32>
    %197 = tpu.matmul %196, %165, %cst_195 {dimension_numbers = #tpu.dot_dimension_numbers<[1], [0], [0], [1], [0, 0, 1, 1], [], []>} : vector<2x8xf32>, vector<8x36xf32>, vector<2x36xf32> -> vector<2x36xf32>
    %c22_196 = arith.constant 22 : index
    %c0_197 = arith.constant 0 : index
    %c0_198 = arith.constant 0 : index
    %198 = vector.load %arg3[%c22_196, %c0_197, %c0_198] : memref<36x36x36xf32, #tpu.memory_space<vmem>>, vector<1x36x36xf32>
    %199 = vector.shape_cast %198 : vector<1x36x36xf32> to vector<36x36xf32>
    %cst_199 = arith.constant dense<0.000000e+00> : vector<2x36xf32>
    %200 = tpu.matmul %197, %199, %cst_199 {dimension_numbers = #tpu.dot_dimension_numbers<[1], [0], [0], [1], [0, 0, 1, 1], [], []>} : vector<2x36xf32>, vector<36x36xf32>, vector<2x36xf32> -> vector<2x36xf32>
    %201 = arith.addf %194, %200 : vector<2x36xf32>
    %c23 = arith.constant 23 : index
    %c0_200 = arith.constant 0 : index
    %c0_201 = arith.constant 0 : index
    %202 = vector.load %arg4[%c23, %c0_200, %c0_201] : memref<36x2x8xf32, #tpu.memory_space<vmem>>, vector<1x2x8xf32>
    %203 = vector.shape_cast %202 : vector<1x2x8xf32> to vector<2x8xf32>
    %cst_202 = arith.constant dense<0.000000e+00> : vector<2x36xf32>
    %204 = tpu.matmul %203, %165, %cst_202 {dimension_numbers = #tpu.dot_dimension_numbers<[1], [0], [0], [1], [0, 0, 1, 1], [], []>} : vector<2x8xf32>, vector<8x36xf32>, vector<2x36xf32> -> vector<2x36xf32>
    %c23_203 = arith.constant 23 : index
    %c0_204 = arith.constant 0 : index
    %c0_205 = arith.constant 0 : index
    %205 = vector.load %arg3[%c23_203, %c0_204, %c0_205] : memref<36x36x36xf32, #tpu.memory_space<vmem>>, vector<1x36x36xf32>
    %206 = vector.shape_cast %205 : vector<1x36x36xf32> to vector<36x36xf32>
    %cst_206 = arith.constant dense<0.000000e+00> : vector<2x36xf32>
    %207 = tpu.matmul %204, %206, %cst_206 {dimension_numbers = #tpu.dot_dimension_numbers<[1], [0], [0], [1], [0, 0, 1, 1], [], []>} : vector<2x36xf32>, vector<36x36xf32>, vector<2x36xf32> -> vector<2x36xf32>
    %208 = arith.addf %201, %207 : vector<2x36xf32>
    %c24 = arith.constant 24 : index
    %c0_207 = arith.constant 0 : index
    %c0_208 = arith.constant 0 : index
    %209 = vector.load %arg4[%c24, %c0_207, %c0_208] : memref<36x2x8xf32, #tpu.memory_space<vmem>>, vector<1x2x8xf32>
    %210 = vector.shape_cast %209 : vector<1x2x8xf32> to vector<2x8xf32>
    %cst_209 = arith.constant dense<0.000000e+00> : vector<2x36xf32>
    %211 = tpu.matmul %210, %165, %cst_209 {dimension_numbers = #tpu.dot_dimension_numbers<[1], [0], [0], [1], [0, 0, 1, 1], [], []>} : vector<2x8xf32>, vector<8x36xf32>, vector<2x36xf32> -> vector<2x36xf32>
    %c24_210 = arith.constant 24 : index
    %c0_211 = arith.constant 0 : index
    %c0_212 = arith.constant 0 : index
    %212 = vector.load %arg3[%c24_210, %c0_211, %c0_212] : memref<36x36x36xf32, #tpu.memory_space<vmem>>, vector<1x36x36xf32>
    %213 = vector.shape_cast %212 : vector<1x36x36xf32> to vector<36x36xf32>
    %cst_213 = arith.constant dense<0.000000e+00> : vector<2x36xf32>
    %214 = tpu.matmul %211, %213, %cst_213 {dimension_numbers = #tpu.dot_dimension_numbers<[1], [0], [0], [1], [0, 0, 1, 1], [], []>} : vector<2x36xf32>, vector<36x36xf32>, vector<2x36xf32> -> vector<2x36xf32>
    %215 = arith.addf %208, %214 : vector<2x36xf32>
    %c25 = arith.constant 25 : index
    %c0_214 = arith.constant 0 : index
    %c0_215 = arith.constant 0 : index
    %216 = vector.load %arg4[%c25, %c0_214, %c0_215] : memref<36x2x8xf32, #tpu.memory_space<vmem>>, vector<1x2x8xf32>
    %217 = vector.shape_cast %216 : vector<1x2x8xf32> to vector<2x8xf32>
    %cst_216 = arith.constant dense<0.000000e+00> : vector<2x36xf32>
    %218 = tpu.matmul %217, %165, %cst_216 {dimension_numbers = #tpu.dot_dimension_numbers<[1], [0], [0], [1], [0, 0, 1, 1], [], []>} : vector<2x8xf32>, vector<8x36xf32>, vector<2x36xf32> -> vector<2x36xf32>
    %c25_217 = arith.constant 25 : index
    %c0_218 = arith.constant 0 : index
    %c0_219 = arith.constant 0 : index
    %219 = vector.load %arg3[%c25_217, %c0_218, %c0_219] : memref<36x36x36xf32, #tpu.memory_space<vmem>>, vector<1x36x36xf32>
    %220 = vector.shape_cast %219 : vector<1x36x36xf32> to vector<36x36xf32>
    %cst_220 = arith.constant dense<0.000000e+00> : vector<2x36xf32>
    %221 = tpu.matmul %218, %220, %cst_220 {dimension_numbers = #tpu.dot_dimension_numbers<[1], [0], [0], [1], [0, 0, 1, 1], [], []>} : vector<2x36xf32>, vector<36x36xf32>, vector<2x36xf32> -> vector<2x36xf32>
    %222 = arith.addf %215, %221 : vector<2x36xf32>
    %c26 = arith.constant 26 : index
    %c0_221 = arith.constant 0 : index
    %c0_222 = arith.constant 0 : index
    %223 = vector.load %arg4[%c26, %c0_221, %c0_222] : memref<36x2x8xf32, #tpu.memory_space<vmem>>, vector<1x2x8xf32>
    %224 = vector.shape_cast %223 : vector<1x2x8xf32> to vector<2x8xf32>
    %cst_223 = arith.constant dense<0.000000e+00> : vector<2x36xf32>
    %225 = tpu.matmul %224, %165, %cst_223 {dimension_numbers = #tpu.dot_dimension_numbers<[1], [0], [0], [1], [0, 0, 1, 1], [], []>} : vector<2x8xf32>, vector<8x36xf32>, vector<2x36xf32> -> vector<2x36xf32>
    %c26_224 = arith.constant 26 : index
    %c0_225 = arith.constant 0 : index
    %c0_226 = arith.constant 0 : index
    %226 = vector.load %arg3[%c26_224, %c0_225, %c0_226] : memref<36x36x36xf32, #tpu.memory_space<vmem>>, vector<1x36x36xf32>
    %227 = vector.shape_cast %226 : vector<1x36x36xf32> to vector<36x36xf32>
    %cst_227 = arith.constant dense<0.000000e+00> : vector<2x36xf32>
    %228 = tpu.matmul %225, %227, %cst_227 {dimension_numbers = #tpu.dot_dimension_numbers<[1], [0], [0], [1], [0, 0, 1, 1], [], []>} : vector<2x36xf32>, vector<36x36xf32>, vector<2x36xf32> -> vector<2x36xf32>
    %229 = arith.addf %222, %228 : vector<2x36xf32>
    %c2_228 = arith.constant 2 : index
    %c0_229 = arith.constant 0 : index
    %c0_230 = arith.constant 0 : index
    %230 = vector.load %arg5[%c2_228, %c0_229, %c0_230] : memref<4x2x1xf32, #tpu.memory_space<vmem>>, vector<1x2x1xf32>
    %231 = vector.shape_cast %230 : vector<1x2x1xf32> to vector<2x1xf32>
    %232 = vector.broadcast %231 : vector<2x1xf32> to vector<2x36xf32>
    %233 = arith.addf %229, %232 : vector<2x36xf32>
    %cst_231 = arith.constant 0.000000e+00 : f32
    %234 = vector.broadcast %cst_231 : f32 to vector<2x36xf32>
    %235 = arith.maximumf %233, %234 : vector<2x36xf32>
    %236 = arith.truncf %235 : vector<2x36xf32> to vector<2x36xbf16>
    %c2_232 = arith.constant 2 : index
    %c0_233 = arith.constant 0 : index
    %c0_234 = arith.constant 0 : index
    %237 = vector.load %arg6[%c2_232, %c0_233, %c0_234] : memref<4x36x256xbf16, #tpu.memory_space<vmem>>, vector<1x36x256xbf16>
    %238 = vector.shape_cast %237 : vector<1x36x256xbf16> to vector<36x256xbf16>
    %cst_235 = arith.constant dense<0.000000e+00> : vector<2x256xf32>
    %239 = tpu.matmul %236, %238, %cst_235 {dimension_numbers = #tpu.dot_dimension_numbers<[1], [0], [0], [1], [0, 0, 1, 1], [], []>} : vector<2x36xbf16>, vector<36x256xbf16>, vector<2x256xf32> -> vector<2x256xf32>
    %c0_236 = arith.constant 0 : index
    %c4_237 = arith.constant 4 : index
    %c0_238 = arith.constant 0 : index
    %240 = vector.load %arg7[%c0_236, %c4_237, %c0_238] : memref<1x16x256xf32, #tpu.memory_space<vmem>>, vector<1x2x256xf32>
    %241 = vector.shape_cast %240 : vector<1x2x256xf32> to vector<2x256xf32>
    %242 = vector.shape_cast %239 : vector<2x256xf32> to vector<1x2x256xf32>
    tpu.vector_store %arg7[%c0_236, %c4_237, %c0_238], %242 {strides = array<i32>} : memref<1x16x256xf32, #tpu.memory_space<vmem>>, vector<1x2x256xf32>,
    %c3_239 = arith.constant 3 : index
    %c0_240 = arith.constant 0 : index
    %c0_241 = arith.constant 0 : index
    %243 = vector.load %arg2[%c3_239, %c0_240, %c0_241] : memref<4x256x36xbf16, #tpu.memory_space<vmem>>, vector<1x256x36xbf16>
    %244 = vector.shape_cast %243 : vector<1x256x36xbf16> to vector<256x36xbf16>
    %cst_242 = arith.constant dense<0.000000e+00> : vector<8x36xf32>
    %245 = tpu.matmul %2, %244, %cst_242 {dimension_numbers = #tpu.dot_dimension_numbers<[1], [0], [0], [1], [0, 0, 1, 1], [], []>} : vector<8x256xbf16>, vector<256x36xbf16>, vector<8x36xf32> -> vector<8x36xf32>
    %cst_243 = arith.constant 0.000000e+00 : f32
    %246 = vector.broadcast %cst_243 : f32 to vector<2x36xf32>
    %c27 = arith.constant 27 : index
    %c0_244 = arith.constant 0 : index
    %c0_245 = arith.constant 0 : index
    %247 = vector.load %arg4[%c27, %c0_244, %c0_245] : memref<36x2x8xf32, #tpu.memory_space<vmem>>, vector<1x2x8xf32>
    %248 = vector.shape_cast %247 : vector<1x2x8xf32> to vector<2x8xf32>
    %cst_246 = arith.constant dense<0.000000e+00> : vector<2x36xf32>
    %249 = tpu.matmul %248, %245, %cst_246 {dimension_numbers = #tpu.dot_dimension_numbers<[1], [0], [0], [1], [0, 0, 1, 1], [], []>} : vector<2x8xf32>, vector<8x36xf32>, vector<2x36xf32> -> vector<2x36xf32>
    %c27_247 = arith.constant 27 : index
    %c0_248 = arith.constant 0 : index
    %c0_249 = arith.constant 0 : index
    %250 = vector.load %arg3[%c27_247, %c0_248, %c0_249] : memref<36x36x36xf32, #tpu.memory_space<vmem>>, vector<1x36x36xf32>
    %251 = vector.shape_cast %250 : vector<1x36x36xf32> to vector<36x36xf32>
    %cst_250 = arith.constant dense<0.000000e+00> : vector<2x36xf32>
    %252 = tpu.matmul %249, %251, %cst_250 {dimension_numbers = #tpu.dot_dimension_numbers<[1], [0], [0], [1], [0, 0, 1, 1], [], []>} : vector<2x36xf32>, vector<36x36xf32>, vector<2x36xf32> -> vector<2x36xf32>
    %253 = arith.addf %246, %252 : vector<2x36xf32>
    %c28 = arith.constant 28 : index
    %c0_251 = arith.constant 0 : index
    %c0_252 = arith.constant 0 : index
    %254 = vector.load %arg4[%c28, %c0_251, %c0_252] : memref<36x2x8xf32, #tpu.memory_space<vmem>>, vector<1x2x8xf32>
    %255 = vector.shape_cast %254 : vector<1x2x8xf32> to vector<2x8xf32>
    %cst_253 = arith.constant dense<0.000000e+00> : vector<2x36xf32>
    %256 = tpu.matmul %255, %245, %cst_253 {dimension_numbers = #tpu.dot_dimension_numbers<[1], [0], [0], [1], [0, 0, 1, 1], [], []>} : vector<2x8xf32>, vector<8x36xf32>, vector<2x36xf32> -> vector<2x36xf32>
    %c28_254 = arith.constant 28 : index
    %c0_255 = arith.constant 0 : index
    %c0_256 = arith.constant 0 : index
    %257 = vector.load %arg3[%c28_254, %c0_255, %c0_256] : memref<36x36x36xf32, #tpu.memory_space<vmem>>, vector<1x36x36xf32>
    %258 = vector.shape_cast %257 : vector<1x36x36xf32> to vector<36x36xf32>
    %cst_257 = arith.constant dense<0.000000e+00> : vector<2x36xf32>
    %259 = tpu.matmul %256, %258, %cst_257 {dimension_numbers = #tpu.dot_dimension_numbers<[1], [0], [0], [1], [0, 0, 1, 1], [], []>} : vector<2x36xf32>, vector<36x36xf32>, vector<2x36xf32> -> vector<2x36xf32>
    %260 = arith.addf %253, %259 : vector<2x36xf32>
    %c29 = arith.constant 29 : index
    %c0_258 = arith.constant 0 : index
    %c0_259 = arith.constant 0 : index
    %261 = vector.load %arg4[%c29, %c0_258, %c0_259] : memref<36x2x8xf32, #tpu.memory_space<vmem>>, vector<1x2x8xf32>
    %262 = vector.shape_cast %261 : vector<1x2x8xf32> to vector<2x8xf32>
    %cst_260 = arith.constant dense<0.000000e+00> : vector<2x36xf32>
    %263 = tpu.matmul %262, %245, %cst_260 {dimension_numbers = #tpu.dot_dimension_numbers<[1], [0], [0], [1], [0, 0, 1, 1], [], []>} : vector<2x8xf32>, vector<8x36xf32>, vector<2x36xf32> -> vector<2x36xf32>
    %c29_261 = arith.constant 29 : index
    %c0_262 = arith.constant 0 : index
    %c0_263 = arith.constant 0 : index
    %264 = vector.load %arg3[%c29_261, %c0_262, %c0_263] : memref<36x36x36xf32, #tpu.memory_space<vmem>>, vector<1x36x36xf32>
    %265 = vector.shape_cast %264 : vector<1x36x36xf32> to vector<36x36xf32>
    %cst_264 = arith.constant dense<0.000000e+00> : vector<2x36xf32>
    %266 = tpu.matmul %263, %265, %cst_264 {dimension_numbers = #tpu.dot_dimension_numbers<[1], [0], [0], [1], [0, 0, 1, 1], [], []>} : vector<2x36xf32>, vector<36x36xf32>, vector<2x36xf32> -> vector<2x36xf32>
    %267 = arith.addf %260, %266 : vector<2x36xf32>
    %c30 = arith.constant 30 : index
    %c0_265 = arith.constant 0 : index
    %c0_266 = arith.constant 0 : index
    %268 = vector.load %arg4[%c30, %c0_265, %c0_266] : memref<36x2x8xf32, #tpu.memory_space<vmem>>, vector<1x2x8xf32>
    %269 = vector.shape_cast %268 : vector<1x2x8xf32> to vector<2x8xf32>
    %cst_267 = arith.constant dense<0.000000e+00> : vector<2x36xf32>
    %270 = tpu.matmul %269, %245, %cst_267 {dimension_numbers = #tpu.dot_dimension_numbers<[1], [0], [0], [1], [0, 0, 1, 1], [], []>} : vector<2x8xf32>, vector<8x36xf32>, vector<2x36xf32> -> vector<2x36xf32>
    %c30_268 = arith.constant 30 : index
    %c0_269 = arith.constant 0 : index
    %c0_270 = arith.constant 0 : index
    %271 = vector.load %arg3[%c30_268, %c0_269, %c0_270] : memref<36x36x36xf32, #tpu.memory_space<vmem>>, vector<1x36x36xf32>
    %272 = vector.shape_cast %271 : vector<1x36x36xf32> to vector<36x36xf32>
    %cst_271 = arith.constant dense<0.000000e+00> : vector<2x36xf32>
    %273 = tpu.matmul %270, %272, %cst_271 {dimension_numbers = #tpu.dot_dimension_numbers<[1], [0], [0], [1], [0, 0, 1, 1], [], []>} : vector<2x36xf32>, vector<36x36xf32>, vector<2x36xf32> -> vector<2x36xf32>
    %274 = arith.addf %267, %273 : vector<2x36xf32>
    %c31 = arith.constant 31 : index
    %c0_272 = arith.constant 0 : index
    %c0_273 = arith.constant 0 : index
    %275 = vector.load %arg4[%c31, %c0_272, %c0_273] : memref<36x2x8xf32, #tpu.memory_space<vmem>>, vector<1x2x8xf32>
    %276 = vector.shape_cast %275 : vector<1x2x8xf32> to vector<2x8xf32>
    %cst_274 = arith.constant dense<0.000000e+00> : vector<2x36xf32>
    %277 = tpu.matmul %276, %245, %cst_274 {dimension_numbers = #tpu.dot_dimension_numbers<[1], [0], [0], [1], [0, 0, 1, 1], [], []>} : vector<2x8xf32>, vector<8x36xf32>, vector<2x36xf32> -> vector<2x36xf32>
    %c31_275 = arith.constant 31 : index
    %c0_276 = arith.constant 0 : index
    %c0_277 = arith.constant 0 : index
    %278 = vector.load %arg3[%c31_275, %c0_276, %c0_277] : memref<36x36x36xf32, #tpu.memory_space<vmem>>, vector<1x36x36xf32>
    %279 = vector.shape_cast %278 : vector<1x36x36xf32> to vector<36x36xf32>
    %cst_278 = arith.constant dense<0.000000e+00> : vector<2x36xf32>
    %280 = tpu.matmul %277, %279, %cst_278 {dimension_numbers = #tpu.dot_dimension_numbers<[1], [0], [0], [1], [0, 0, 1, 1], [], []>} : vector<2x36xf32>, vector<36x36xf32>, vector<2x36xf32> -> vector<2x36xf32>
    %281 = arith.addf %274, %280 : vector<2x36xf32>
    %c32 = arith.constant 32 : index
    %c0_279 = arith.constant 0 : index
    %c0_280 = arith.constant 0 : index
    %282 = vector.load %arg4[%c32, %c0_279, %c0_280] : memref<36x2x8xf32, #tpu.memory_space<vmem>>, vector<1x2x8xf32>
    %283 = vector.shape_cast %282 : vector<1x2x8xf32> to vector<2x8xf32>
    %cst_281 = arith.constant dense<0.000000e+00> : vector<2x36xf32>
    %284 = tpu.matmul %283, %245, %cst_281 {dimension_numbers = #tpu.dot_dimension_numbers<[1], [0], [0], [1], [0, 0, 1, 1], [], []>} : vector<2x8xf32>, vector<8x36xf32>, vector<2x36xf32> -> vector<2x36xf32>
    %c32_282 = arith.constant 32 : index
    %c0_283 = arith.constant 0 : index
    %c0_284 = arith.constant 0 : index
    %285 = vector.load %arg3[%c32_282, %c0_283, %c0_284] : memref<36x36x36xf32, #tpu.memory_space<vmem>>, vector<1x36x36xf32>
    %286 = vector.shape_cast %285 : vector<1x36x36xf32> to vector<36x36xf32>
    %cst_285 = arith.constant dense<0.000000e+00> : vector<2x36xf32>
    %287 = tpu.matmul %284, %286, %cst_285 {dimension_numbers = #tpu.dot_dimension_numbers<[1], [0], [0], [1], [0, 0, 1, 1], [], []>} : vector<2x36xf32>, vector<36x36xf32>, vector<2x36xf32> -> vector<2x36xf32>
    %288 = arith.addf %281, %287 : vector<2x36xf32>
    %c33 = arith.constant 33 : index
    %c0_286 = arith.constant 0 : index
    %c0_287 = arith.constant 0 : index
    %289 = vector.load %arg4[%c33, %c0_286, %c0_287] : memref<36x2x8xf32, #tpu.memory_space<vmem>>, vector<1x2x8xf32>
    %290 = vector.shape_cast %289 : vector<1x2x8xf32> to vector<2x8xf32>
    %cst_288 = arith.constant dense<0.000000e+00> : vector<2x36xf32>
    %291 = tpu.matmul %290, %245, %cst_288 {dimension_numbers = #tpu.dot_dimension_numbers<[1], [0], [0], [1], [0, 0, 1, 1], [], []>} : vector<2x8xf32>, vector<8x36xf32>, vector<2x36xf32> -> vector<2x36xf32>
    %c33_289 = arith.constant 33 : index
    %c0_290 = arith.constant 0 : index
    %c0_291 = arith.constant 0 : index
    %292 = vector.load %arg3[%c33_289, %c0_290, %c0_291] : memref<36x36x36xf32, #tpu.memory_space<vmem>>, vector<1x36x36xf32>
    %293 = vector.shape_cast %292 : vector<1x36x36xf32> to vector<36x36xf32>
    %cst_292 = arith.constant dense<0.000000e+00> : vector<2x36xf32>
    %294 = tpu.matmul %291, %293, %cst_292 {dimension_numbers = #tpu.dot_dimension_numbers<[1], [0], [0], [1], [0, 0, 1, 1], [], []>} : vector<2x36xf32>, vector<36x36xf32>, vector<2x36xf32> -> vector<2x36xf32>
    %295 = arith.addf %288, %294 : vector<2x36xf32>
    %c34 = arith.constant 34 : index
    %c0_293 = arith.constant 0 : index
    %c0_294 = arith.constant 0 : index
    %296 = vector.load %arg4[%c34, %c0_293, %c0_294] : memref<36x2x8xf32, #tpu.memory_space<vmem>>, vector<1x2x8xf32>
    %297 = vector.shape_cast %296 : vector<1x2x8xf32> to vector<2x8xf32>
    %cst_295 = arith.constant dense<0.000000e+00> : vector<2x36xf32>
    %298 = tpu.matmul %297, %245, %cst_295 {dimension_numbers = #tpu.dot_dimension_numbers<[1], [0], [0], [1], [0, 0, 1, 1], [], []>} : vector<2x8xf32>, vector<8x36xf32>, vector<2x36xf32> -> vector<2x36xf32>
    %c34_296 = arith.constant 34 : index
    %c0_297 = arith.constant 0 : index
    %c0_298 = arith.constant 0 : index
    %299 = vector.load %arg3[%c34_296, %c0_297, %c0_298] : memref<36x36x36xf32, #tpu.memory_space<vmem>>, vector<1x36x36xf32>
    %300 = vector.shape_cast %299 : vector<1x36x36xf32> to vector<36x36xf32>
    %cst_299 = arith.constant dense<0.000000e+00> : vector<2x36xf32>
    %301 = tpu.matmul %298, %300, %cst_299 {dimension_numbers = #tpu.dot_dimension_numbers<[1], [0], [0], [1], [0, 0, 1, 1], [], []>} : vector<2x36xf32>, vector<36x36xf32>, vector<2x36xf32> -> vector<2x36xf32>
    %302 = arith.addf %295, %301 : vector<2x36xf32>
    %c35 = arith.constant 35 : index
    %c0_300 = arith.constant 0 : index
    %c0_301 = arith.constant 0 : index
    %303 = vector.load %arg4[%c35, %c0_300, %c0_301] : memref<36x2x8xf32, #tpu.memory_space<vmem>>, vector<1x2x8xf32>
    %304 = vector.shape_cast %303 : vector<1x2x8xf32> to vector<2x8xf32>
    %cst_302 = arith.constant dense<0.000000e+00> : vector<2x36xf32>
    %305 = tpu.matmul %304, %245, %cst_302 {dimension_numbers = #tpu.dot_dimension_numbers<[1], [0], [0], [1], [0, 0, 1, 1], [], []>} : vector<2x8xf32>, vector<8x36xf32>, vector<2x36xf32> -> vector<2x36xf32>
    %c35_303 = arith.constant 35 : index
    %c0_304 = arith.constant 0 : index
    %c0_305 = arith.constant 0 : index
    %306 = vector.load %arg3[%c35_303, %c0_304, %c0_305] : memref<36x36x36xf32, #tpu.memory_space<vmem>>, vector<1x36x36xf32>
    %307 = vector.shape_cast %306 : vector<1x36x36xf32> to vector<36x36xf32>
    %cst_306 = arith.constant dense<0.000000e+00> : vector<2x36xf32>
    %308 = tpu.matmul %305, %307, %cst_306 {dimension_numbers = #tpu.dot_dimension_numbers<[1], [0], [0], [1], [0, 0, 1, 1], [], []>} : vector<2x36xf32>, vector<36x36xf32>, vector<2x36xf32> -> vector<2x36xf32>
    %309 = arith.addf %302, %308 : vector<2x36xf32>
    %c3_307 = arith.constant 3 : index
    %c0_308 = arith.constant 0 : index
    %c0_309 = arith.constant 0 : index
    %310 = vector.load %arg5[%c3_307, %c0_308, %c0_309] : memref<4x2x1xf32, #tpu.memory_space<vmem>>, vector<1x2x1xf32>
    %311 = vector.shape_cast %310 : vector<1x2x1xf32> to vector<2x1xf32>
    %312 = vector.broadcast %311 : vector<2x1xf32> to vector<2x36xf32>
    %313 = arith.addf %309, %312 : vector<2x36xf32>
    %cst_310 = arith.constant 0.000000e+00 : f32
    %314 = vector.broadcast %cst_310 : f32 to vector<2x36xf32>
    %315 = arith.maximumf %313, %314 : vector<2x36xf32>
    %316 = arith.truncf %315 : vector<2x36xf32> to vector<2x36xbf16>
    %c3_311 = arith.constant 3 : index
    %c0_312 = arith.constant 0 : index
    %c0_313 = arith.constant 0 : index
    %317 = vector.load %arg6[%c3_311, %c0_312, %c0_313] : memref<4x36x256xbf16, #tpu.memory_space<vmem>>, vector<1x36x256xbf16>
    %318 = vector.shape_cast %317 : vector<1x36x256xbf16> to vector<36x256xbf16>
    %cst_314 = arith.constant dense<0.000000e+00> : vector<2x256xf32>
    %319 = tpu.matmul %316, %318, %cst_314 {dimension_numbers = #tpu.dot_dimension_numbers<[1], [0], [0], [1], [0, 0, 1, 1], [], []>} : vector<2x36xbf16>, vector<36x256xbf16>, vector<2x256xf32> -> vector<2x256xf32>
    %c0_315 = arith.constant 0 : index
    %c6_316 = arith.constant 6 : index
    %c0_317 = arith.constant 0 : index
    %320 = vector.load %arg7[%c0_315, %c6_316, %c0_317] : memref<1x16x256xf32, #tpu.memory_space<vmem>>, vector<1x2x256xf32>
    %321 = vector.shape_cast %320 : vector<1x2x256xf32> to vector<2x256xf32>
    %322 = vector.shape_cast %319 : vector<2x256xf32> to vector<1x2x256xf32>
    tpu.vector_store %arg7[%c0_315, %c6_316, %c0_317], %322 {strides = array<i32>} : memref<1x16x256xf32, #tpu.memory_space<vmem>>, vector<1x2x256xf32>,
    %c0_318 = arith.constant 0 : index
    %c8_319 = arith.constant 8 : index
    %c0_320 = arith.constant 0 : index
    %323 = vector.load %arg7[%c0_318, %c8_319, %c0_320] : memref<1x16x256xf32, #tpu.memory_space<vmem>>, vector<1x8x256xf32>
    %324 = vector.shape_cast %323 : vector<1x8x256xf32> to vector<8x256xf32>
    %325 = vector.shape_cast %1 : vector<8x256xf32> to vector<1x8x256xf32>
    tpu.vector_store %arg7[%c0_318, %c8_319, %c0_320], %325 {strides = array<i32>} : memref<1x16x256xf32, #tpu.memory_space<vmem>>, vector<1x8x256xf32>,
    return
  }
  func.func @transform_0(%arg0: i32) -> (i32, i32, i32) {
    %c0_i32 = arith.constant 0 : i32
    %c0_i32_0 = arith.constant 0 : i32
    %c0_i32_1 = arith.constant 0 : i32
    return %arg0, %c0_i32, %c0_i32_0 : i32, i32, i32
  }
  func.func @transform_1(%arg0: i32) -> (i32, i32, i32) {
    %c0_i32 = arith.constant 0 : i32
    %c0_i32_0 = arith.constant 0 : i32
    %c0_i32_1 = arith.constant 0 : i32
    %c0_i32_2 = arith.constant 0 : i32
    return %c0_i32, %c0_i32_0, %c0_i32_1 : i32, i32, i32
  }
  func.func @transform_2(%arg0: i32) -> (i32, i32, i32) {
    %c0_i32 = arith.constant 0 : i32
    %c0_i32_0 = arith.constant 0 : i32
    %c0_i32_1 = arith.constant 0 : i32
    %c0_i32_2 = arith.constant 0 : i32
    return %c0_i32, %c0_i32_0, %c0_i32_1 : i32, i32, i32
  }
  func.func @transform_3(%arg0: i32) -> (i32, i32, i32) {
    %c0_i32 = arith.constant 0 : i32
    %c0_i32_0 = arith.constant 0 : i32
    %c0_i32_1 = arith.constant 0 : i32
    %c0_i32_2 = arith.constant 0 : i32
    return %c0_i32, %c0_i32_0, %c0_i32_1 : i32, i32, i32
  }
  func.func @transform_4(%arg0: i32) -> (i32, i32, i32) {
    %c0_i32 = arith.constant 0 : i32
    %c0_i32_0 = arith.constant 0 : i32
    %c0_i32_1 = arith.constant 0 : i32
    %c0_i32_2 = arith.constant 0 : i32
    return %c0_i32, %c0_i32_0, %c0_i32_1 : i32, i32, i32
  }
  func.func @transform_5(%arg0: i32) -> (i32, i32, i32) {
    %c0_i32 = arith.constant 0 : i32
    %c0_i32_0 = arith.constant 0 : i32
    %c0_i32_1 = arith.constant 0 : i32
    %c0_i32_2 = arith.constant 0 : i32
    return %c0_i32, %c0_i32_0, %c0_i32_1 : i32, i32, i32
  }
  func.func @transform_6(%arg0: i32) -> (i32, i32, i32) {
    %c0_i32 = arith.constant 0 : i32
    %c0_i32_0 = arith.constant 0 : i32
    %c0_i32_1 = arith.constant 0 : i32
    return %arg0, %c0_i32, %c0_i32_0 : i32, i32, i32
  }
}

</mosaic_0001>

<bundles_post_ra>
// kernel: tpu_custom_call.1
= control target key start
LH: loop header
LB: loop body
LE: loop exit
PB: predicated region body
PF: predicated region fallthrough
CT: control target
= control target key end

     0   :  { %11 = vsyncpa [#allocation3], 0  ;;  %s10008_s0 = inlined_call_operand.vmem [shape: f32[2,8,256], index: 0, kind: input, shape index: {}]   ;;  %s10009_s1 = inlined_call_operand.vmem [shape: bf16[4,256,36], index: 1, kind: input, shape index: {}]   ;;  %s10010_s2 = inlined_call_operand.hbm [shape: f32[36,36,36], index: 2, kind: input, shape index: {}]   ;;  %s10011_s3 = inlined_call_operand.vmem [shape: f32[36,2,8], index: 3, kind: input, shape index: {}]   ;;  %s10012_s4 = inlined_call_operand.vmem [shape: f32[4,2,1], index: 4, kind: input, shape index: {}]   ;;  %s10013_s5 = inlined_call_operand.vmem [shape: bf16[4,36,256], index: 5, kind: input, shape index: {}]   ;;  %s10014_s6 = inlined_call_operand.hbm [shape: f32[2,16,256], index: 6, kind: output, shape index: {}]  }
   0x1   :  { %12 = vsyncpa [#allocation4], 0 }
   0x2   :  { %14 = vsyncpa [#allocation4 + $0x1], 0  ;;  %s9011_s21 = smov 0   ;;  %s9013_s22 = smov 0  }
   0x3   :  { %s9015_s23 = smov 0   ;;  %s9017_s24 = smov 0  }
   0x4 LB: > { %s9032_s25 = sadd.s32 4294967295, %s8964_s24   ;;  %s7105_s26 = sadd.s32 4294967294, %s8964_s24   ;;  %s8964_s24 = sphi %s9017_s24, %s10030_s24   ;;  %s8960_s23 = sphi %s9015_s23, %s10029_s23   ;;  %s8956_s22 = sphi %s9013_s22, %s10028_s22   ;;  %s8952_s21 = sphi %s9011_s21, %s10027_s21  }
   0x5   : > { %s9036_s27 = sadd.s32 1, %s8964_s24   ;;  %s158_s28 = sadd.s32 1, %s8960_s23 }
   0x6   : > { %s155_s29 = ssub.s32 %s8964_s24, %s9036_s27  ;;  %p168_p0 = scmp.ne.s32.totalorder %s8960_s23, %s8956_s22 }
   0x7   : > { %p156_p1 = scmp.eq.s32.totalorder %s155_s29, 0  ;;  %p169_p2 = scmp.eq.s32.totalorder %s9032_s25, 1 }
   0x8   : > { %p174_p3 = scmp.ne.s32.totalorder %s8956_s22, %s8952_s21  ;;  %p175_p4 = scmp.eq.s32.totalorder %s7105_s26, 1 }
   0x9   : > { %s9047_s30 = scalar_select %p156_p1, %s8960_s23, %s158_s28  }
   0xa   : > { %p9049_p5 = por %p169_p2, %p168_p0  ;;  %p9053_p6 = por %p175_p4, %p174_p3 }
   0xb   : > { %p7106_p7 = scmp.ge.s32.totalorder %s8964_s24, 1  ;;  %p182_p8 = scmp.lt.s32.totalorder %s8964_s24, 3 }
   0xc   : > { %s10018_s7 = scalar_select %p9049_p5, 1, 0 }
   0xd   : > { %s10019_s8 = scalar_select %p9053_p6, 1, 0 }
   0xe   : > { %p10015_p9 = scmp.eq.s32.totalorder %s9032_s25, 0  ;;  %p9060_p10 = pnand %p7106_p7, %p182_p8 }
   0xf   : > { %s8966_s10 = smov [#allocation2]   ;;  %s8870_s15 = scalar_lea.hbm %s10010_s2, 23040 }
  0x10   : > { %s10020_s9 = scalar_select %p9060_p10, 1, 0 }
  0x11   : > { %s197_s11 = sshll.u32 %s8966_s10, 4  ;;  %p8720_p11 = pneg %p9060_p10  ;;  %s198_s11 = int_to_ptr.vmem [resolvable:$true] %s197_s11 }
  0x12   : > { %p8871_p13 = scmp.ne.s32.totalorder %s10010_s2, %s8870_s15  ;;  %p8877_p3 = scmp.lt.u32.totalorder %s8870_s15, %s10010_s2 }
  0x13   : > { %p9068_p12 = pnand %p10015_p9, %p8720_p11 }
  0x15   : > { %p8872_p0 = pneg %p9068_p12 }
  0x17   : > { %p8873_p1 = pnand %p8872_p0, %p8871_p13 }
  0x19   : > { %p8874_p2 = pneg %p8873_p1 }
  0x1b   : > { %p8879_p4 = pnand %p8877_p3, %p8874_p2 }
  0x1d   : > { %8882 = shalt.err (!%p8879_p4)
}
  0x1e   : > { %s8883_s20 = scalar_lea.vmem %s198_s11, 23040  ;;  %p8891_p9 = scmp.lt.s32.totalorder %s198_s11, %s198_s11 }
  0x1f   : > { %p8884_p7 = scmp.ne.s32.totalorder %s198_s11, %s8883_s20  ;;  %p8892_p6 = scmp.lt.s32.totalorder %s8883_s20, %s8883_s20 }
  0x21   : > { %p8886_p8 = pnand %p8884_p7, %p8872_p0  ;;  %p8893_p5 = por %p8892_p6, %p8891_p9 }
  0x23   : > { %p8887_p11 = pneg %p8886_p8 }
  0x25   : > { %p8894_p10 = pnand %p8893_p5, %p8887_p11 }
  0x27   : > { %8897 = shalt.err (!%p8894_p10)
}
  0x28   : > { %s8967_s26 = smov 128   ;;  %s8968_s28 = smov 8  }
  0x29   : > { %8723 = dma.hbm_to_vmem [thread:$0]  (!%p9068_p12), %s10010_s2, 23040, %s198_s11, [#allocation3], %s8967_s26, %s8967_s26, %s8968_s28  }
  0x2a   : > { %p10022_p13 = scmp.ne.s32.totalorder %s10020_s9, 0 }
  0x2b   : > { %p10023_p1 = scmp.eq.s32.totalorder (!%p10022_p13), %s9032_s25, 0 }
  0x2c   : > { %230 = sbr.rel (%p10022_p13) target bundleno = 5231 (0x146f), region = 44 }
  0x33   : > { %8943 = dma.done.wait (%p10023_p1), [#allocation3], 23040   ;;  %p10024_p0 = pmov %p10023_p1 }
  0x34   : > { %v8774_v0 = vld [vmem:[%s10009_s1 + $0x40] sm:$0xff]   ;;  %v8776_v2 = vld [vmem:[%s10009_s1 + $0x48] sm:$0xff]   ;;  %p260_p5 = scmp.lt.s32.totalorder %s9032_s25, 1  ;;  %v8778_v4 = vld [vmem:[%s10009_s1 + $0x50] sm:$0xff]   ;;  %s257_s13 = sand.u32 1, %s8956_s22   ;;  %v8969_v20 = vmov 0.0  }
  0x35   : > { %8945 = vsyncadd (%p10024_p0), [#allocation3], 4294944256  ;;  %v8775_v1 = vld [vmem:[%s10009_s1] sm:$0xff]   ;;  %7474 = vmatprep.subr.bf16.mxu0 %v8774_v0  ;;  %v8777_v3 = vld [vmem:[%s10009_s1 + $0x8] sm:$0xff]   ;;  %s7111_s16 = sshll.u32 %s257_s13, 5  ;;  %7855 = vmatprep.subr.mxu1 %v8969_v20  ;;  %vm8970_vm0 = vmmov 0  }
  0x36   : > { %7475 = vmatpush3.bf16.msra.mxu0 %v8775_v1  ;;  %s261_s20 = scalar_select %p260_p5, %s9032_s25, 1  ;;  %v8779_v5 = vld [vmem:[%s10009_s1 + $0x10] sm:$0xff]   ;;  %v8780_v6 = vld [vmem:[%s10009_s1 + $0x58] sm:$0xff]   ;;  %v8782_v8 = vld [vmem:[%s10009_s1 + $0x60] sm:$0xff]   ;;  %7857 = vmatprep.mubr.msk.f32.mxu1 %vm8970_vm0, %v8969_v20  ;;  %vm439_vm1 = vcmask 64512   ;;  %v8971_v37 = vmov 0.0|0.0  }
  0x37   : > { %7476 = vmatprep.subr.bf16.mxu0 %v8776_v2  ;;  %v8781_v7 = vld [vmem:[%s10009_s1 + $0x18] sm:$0xff]   ;;  %v8783_v9 = vld [vmem:[%s10009_s1 + $0x20] sm:$0xff]   ;;  %v8784_v10 = vld [vmem:[%s10009_s1 + $0x68] sm:$0xff]   ;;  %s9140_s15 = scalar_lea.vmem [#allocation5], %s7111_s16  ;;  %vm603_vm2 = vcmask 1043456   ;;  %vm599_vm3 = vcmask 293888  }
  0x38   : > { %s7472_s14 = sshll.u32 %s261_s20, 4  ;;  %v8785_v13 = vld [vmem:[%s10009_s1 + $0x28] sm:$0xff]   ;;  %v8786_v15 = vld [vmem:[%s10009_s1 + $0x70] sm:$0xff]   ;;  %v8788_v17 = vld [vmem:[%s10009_s1 + $0x78] sm:$0xff]   ;;  %vm1901_vm4 = vcmask 1041408   ;;  %s7473_s17 = sshll.u32 %s9032_s25, 9 }
  0x39   : > { %s264_s19 = scalar_lea.vmem %s10008_s0, %s7472_s14  ;;  %v8787_v16 = vld [vmem:[%s10009_s1 + $0x30] sm:$0xff]   ;;  %v8789_v18 = vld [vmem:[%s10009_s1 + $0x38] sm:$0xff]   ;;  %v594_v23 = vld [vmem:[#allocation2 + $0x28] sm:$0xff]  ;;  %s7031_s18 = sshll.u32 %s9140_s15, 4  ;;  %s9961_s18 = int_to_ptr.vmem [resolvable:$true] %s7031_s18 }
  0x3a   : > { %7477 = vmatpush3.bf16.msra.mxu0 %v8777_v3  ;;  %v267_v11 = vld [vmem:[%s264_s19 + $0x8] sm:$0xff]  ;;  %v266_v12 = vld [vmem:[%s264_s19] sm:$0xff]  ;;  %v595_v24 = vld [vmem:[#allocation2 + $0x30] sm:$0xff]  ;;  %s9959_s26 = scalar_lea.hbm %s10014_s6, %s7473_s17  ;;  %s9967_s25 = scalar_lea.sflag [#allocation4], %s257_s13 }
  0x3b   : > { %7478 = vmatprep.subr.bf16.mxu0 %v8778_v4  ;;  %v9138_v14 = vpack.c.bf16 %v267_v11, %v267_v11  ;;  %7016 = vst [vmem:[%s9140_s15 + $0x18] sm:$0xff] %v267_v11  ;;  %7015 = vst [vmem:[%s9140_s15 + $0x10] sm:$0xff] %v266_v12  ;;  %v9157_v19 = vpack.c.bf16 %v266_v12, %v266_v12  ;;  %v438_v27 = vld [vmem:[%s10011_s3] sm:$0x3]  ;;  %v7131_v28 = vld [vmem:[%s10011_s3 + $0x2] sm:$0x3]  ;;  %v8499_v32 = vpack.c.bf16 %v595_v24, %v594_v23 }
  0x3c   : > { %v987_v30 = vld [vmem:[#allocation2 + $0x78] sm:$0xff]  ;;  %v988_v31 = vld [vmem:[#allocation2 + $0x80] sm:$0xff]  ;;  %v989_v38 = vld [vmem:[#allocation2 + $0x88] sm:$0xff]  ;;  %s8898_s28 = scalar_lea.vmem %s9961_s18, 512  ;;  %p10025_p9 = scmp.ne.s32.totalorder %s10018_s7, 0 }
  0x3d   : > { %430 = vmatprep.mubr.bf16.mxu0 %v9138_v14  ;;  %v596_v33 = vld [vmem:[#allocation2 + $0x38] sm:$0xff]  ;;  %v597_v34 = vld [vmem:[#allocation2 + $0x40] sm:$0xff]  ;;  %v8517_v36 = vpack.c.bf16 %v988_v31, %v987_v30  ;;  %v990_v39 = vld [vmem:[#allocation2 + $0x90] sm:$0xff]  ;;  %p8899_p6 = scmp.ne.s32.totalorder %s9961_s18, %s8898_s28  ;;  %s8973_s20 = smov [#allocation5]  }
  0x3e   : > { %7479 = vmatpush3.bf16.msra.mxu0 %v8779_v5  ;;  %v7141_v35 = vld [vmem:[%s10011_s3 + $0x6] sm:$0x3]  ;;  %v8502_v40 = vpack.c.bf16 %v597_v34, %v596_v33  ;;  %v8520_v41 = vpack.c.bf16 %v990_v39, %v989_v38  ;;  %v598_v42 = vld [vmem:[#allocation2 + $0x48] sm:$0xf]  ;;  %v991_v43 = vld [vmem:[#allocation2 + $0x98] sm:$0xf] }
  0x3f   : > { %7480 = vmatprep.subr.bf16.mxu0 %v8780_v6  ;;  %v513_v44 = vld [vmem:[#allocation2] sm:$0xff]  ;;  %v514_v45 = vld [vmem:[#allocation2 + $0x8] sm:$0xff]  ;;  %v515_v47 = vld [vmem:[#allocation2 + $0x10] sm:$0xff]  ;;  %p8900_p10 = pnand %p8899_p6, %p10025_p9  ;;  %s8902_s29 = sshll.u32 %s8973_s20, 4  ;;  %s8903_s29 = int_to_ptr.vmem [resolvable:$false] %s8902_s29 }
  0x40   : > { %v8505_v46 = vpack.c.bf16 %v514_v45, %v513_v44  ;;  %v516_v48 = vld [vmem:[#allocation2 + $0x18] sm:$0xff]  ;;  %v1303_v54 = vld [vmem:[#allocation2 + $0xc8] sm:$0xff]  ;;  %v1304_v55 = vld [vmem:[#allocation2 + $0xd0] sm:$0xff]  ;;  %s8904_s10 = scalar_lea.vmem %s8903_s29, 1024  ;;  %p8905_p2 = scmp.lt.s32.totalorder %s9961_s18, %s8903_s29 }
  0x41   : > { %v8508_v53 = vpack.c.bf16 %v516_v48, %v515_v47  ;;  %v7149_v58 = vld [vmem:[%s10011_s3 + $0xa] sm:$0x3]  ;;  %v8529_v59 = vpack.c.bf16 %v1304_v55, %v1303_v54  ;;  %v517_v60 = vld [vmem:[#allocation2 + $0x20] sm:$0xf]  ;;  %v7137_v61 = vld [vmem:[%s10011_s3 + $0x4] sm:$0x3]  ;;  %p8901_p12 = pneg %p8900_p10  ;;  %p8906_p3 = scmp.lt.s32.totalorder %s8904_s10, %s8898_s28 }
  0x42   : > { %7481 = vmatpush3.bf16.msra.mxu0 %v8781_v7  ;;  %v1305_v62 = vld [vmem:[#allocation2 + $0xd8] sm:$0xff]  ;;  %v1306_v63 = vld [vmem:[#allocation2 + $0xe0] sm:$0xff]  ;;  %v829_v0 = vld [vmem:[#allocation2 + $0x50] sm:$0xff] }
  0x43   : > { %7482 = vmatprep.subr.bf16.mxu0 %v8782_v8  ;;  %v8532_v1 = vpack.c.bf16 %v1306_v63, %v1305_v62  ;;  %v830_v2 = vld [vmem:[#allocation2 + $0x58] sm:$0xff]  ;;  %v1307_v4 = vld [vmem:[#allocation2 + $0xe8] sm:$0xf]  ;;  %v831_v5 = vld [vmem:[#allocation2 + $0x60] sm:$0xff]  ;;  %p8907_p4 = por %p8906_p3, %p8905_p2 }
  0x44   : > { %v8511_v3 = vpack.c.bf16 %v830_v2, %v829_v0  ;;  %v832_v6 = vld [vmem:[#allocation2 + $0x68] sm:$0xff]  ;;  %v833_v8 = vld [vmem:[#allocation2 + $0x70] sm:$0xf]  ;;  %v1149_v31 = vld [vmem:[#allocation2 + $0xc0] sm:$0xf] }
  0x45   : > { %v8514_v7 = vpack.c.bf16 %v832_v6, %v831_v5  ;;  %v1619_v33 = vld [vmem:[#allocation2 + $0x118] sm:$0xff]  ;;  %v1620_v34 = vld [vmem:[#allocation2 + $0x120] sm:$0xff]  ;;  %v7153_v45 = vld [vmem:[%s10011_s3 + $0xc] sm:$0x3]  ;;  %p8908_p7 = pnand %p8907_p4, %p8901_p12 }
  0x46   : > { %7483 = vmatpush3.bf16.msra.mxu0 %v8783_v9  ;;  %v1463_v47 = vld [vmem:[#allocation2 + $0x100] sm:$0xff]  ;;  %v1464_v48 = vld [vmem:[#allocation2 + $0x108] sm:$0xff]  ;;  %v1465_v55 = vld [vmem:[#allocation2 + $0x110] sm:$0xf] }
  0x47   : > { %7484 = vmatprep.subr.bf16.mxu0 %v8784_v10  ;;  %v1777_v63 = vld [vmem:[#allocation2 + $0x140] sm:$0xff]  ;;  %v1778_v0 = vld [vmem:[#allocation2 + $0x148] sm:$0xff]  ;;  %v1779_v5 = vld [vmem:[#allocation2 + $0x150] sm:$0xff] }
  0x48   : > { %v1780_v6 = vld [vmem:[#allocation2 + $0x158] sm:$0xff] }
  0x4a   : > { %7485 = vmatpush3.bf16.msra.mxu0 %v8785_v13 }
  0x4b   : > { %7486 = vmatprep.subr.bf16.mxu0 %v8786_v15 }
  0x4e   : > { %7487 = vmatpush3.bf16.msra.mxu0 %v8787_v16 }
  0x4f   : > { %7488 = vmatprep.subr.bf16.mxu0 %v8788_v17 }
  0x52   : > { %7489 = vmatpush3.bf16.msra.mxu0 %v8789_v18 }
  0x53   : > { %7850 = vmatprep.subr.mxu0 %v8969_v20 }
  0x55   : > { %431 = vmatmul.mubr.bf16.vlgmr.msra.gmra.mrb[0].mxu0 %v9157_v19 }
  0x56   : > { %7852 = vmatprep.mubr.msk.f32.mxu0 %vm8970_vm0, %v8969_v20 }
 0x128   : > { %v7490_v21 = vpop.f32.mrb[0].mxu0 }
 0x129   : > { %v7491_v22 = vpop.f32.mrb[1].mxu0 }
 0x12a   : > { %v9166_v25 = vadd.f32 %v7491_v22, %v7490_v21  ;;  %v7493_v26 = vpop.f32.mrb[2].mxu0  ;;  %v1145_v21 = vld [vmem:[#allocation2 + $0xa0] sm:$0xff]  ;;  %v1146_v22 = vld [vmem:[#allocation2 + $0xa8] sm:$0xff] }
 0x12b   : > { %v7494_v29 = vpop.f32.mrb[3].mxu0  ;;  %v7145_v26 = vld [vmem:[%s10011_s3 + $0x8] sm:$0x3] }
 0x12c   : > { %7851 = vmatpush3.msra.mxu0 %v9166_v25  ;;  %7856 = vmatpush3.msra.mxu1 %v9166_v25  ;;  %v1148_v29 = vld [vmem:[#allocation2 + $0xb8] sm:$0xff] }
 0x12d   : > { %7853 = vmatmul.mubr.msk.f32.vlgmr.msra.gmra.mrb[4].mxu0 %vm439_vm1, %v438_v27  ;;  %7858 = vmatmul.mubr.msk.f32.vlgmr.msra.gmra.mrb[0].mxu1 %vm439_vm1, %v7131_v28  ;;  %v8523_v27 = vpack.c.bf16 %v1146_v22, %v1145_v21  ;;  %v1147_v28 = vld [vmem:[#allocation2 + $0xb0] sm:$0xff]  ;;  %v8791_v22 = vld [vmem:[%s10009_s1 + $0x80] sm:$0xff]  }
 0x12e   : > { %7904 = vmatprep.subr.mxu0 %v8969_v20  ;;  %7906 = vmatprep.mubr.msk.f32.mxu0 %vm8970_vm0, %v8969_v20  ;;  %v8526_v30 = vpack.c.bf16 %v1148_v29, %v1147_v28  ;;  %v8793_v28 = vld [vmem:[%s10009_s1 + $0x88] sm:$0xff]   ;;  %v8794_v29 = vld [vmem:[%s10009_s1 + $0xd0] sm:$0xff]  }
 0x12f   : > { %7905 = vmatpush3.msra.mxu0 %v9166_v25  ;;  %8498 = vmatprep.subr.bf16.mxu1 %v8971_v37 }
 0x130   : > { %8500 = vmatpush3.bf16.msra.mxu1 %v8499_v32  ;;  %8516 = vmatprep.subr.bf16.mxu0 %v8971_v37  ;;  %v7157_v32 = vld [vmem:[%s10011_s3 + $0xe] sm:$0x3] }
 0x131   : > { %7907 = vmatmul.mubr.msk.f32.vlgmr.msra.gmra.mrb[6].mxu0 %vm439_vm1, %v7141_v35  ;;  %8501 = vmatprep.subr.bf16.mxu1 %v8971_v37  ;;  %v8541_v35 = vpack.c.bf16 %v1620_v34, %v1619_v33  ;;  %v8798_v33 = vld [vmem:[%s10009_s1 + $0xe0] sm:$0xff]  }
 0x132   : > { %8518 = vmatpush3.bf16.msra.mxu0 %v8517_v36  ;;  %7870 = vmatprep.mubr.msk.f32.mxu1 %vm8970_vm0, %v8969_v20  ;;  %v8799_v34 = vld [vmem:[%s10009_s1 + $0xa0] sm:$0xff]  }
 0x133   : > { %8519 = vmatprep.subr.bf16.mxu0 %v8971_v37  ;;  %7919 = vmatprep.mubr.msk.f32.mxu0 %vm8970_vm0, %v8969_v20 }
 0x134   : > { %8503 = vmatpush3.bf16.msra.mxu1 %v8502_v40  ;;  %v1461_v40 = vld [vmem:[#allocation2 + $0xf0] sm:$0xff] }
 0x135   : > { %7868 = vmatprep.subr.mxu1 %v8969_v20 }
 0x136   : > { %8521 = vmatpush3.bf16.msra.mxu0 %v8520_v41  ;;  %v1462_v41 = vld [vmem:[#allocation2 + $0xf8] sm:$0xff] }
 0x137   : > { %7917 = vmatprep.subr.mxu0 %v8969_v20 }
 0x138   : > { %7869 = vmatpush3.msk.msra.mxu1 %vm603_vm2, %v598_v42 }
 0x139   : > { %8504 = vmatprep.subr.bf16.mxu1 %v8971_v37 }
 0x13a   : > { %7918 = vmatpush3.msk.msra.mxu0 %vm603_vm2, %v991_v43 }
 0x13b   : > { %7940 = vmatprep.subr.mxu0 %v8969_v20 }
 0x200   : > { %v589_v49 = vpop.f32.mrb[0].mxu1  ;;  %v509_v50 = vpop.f32.mrb[4].mxu0 }
 0x201   : > { %v7859_v51 = vpop.f32.mrb[1].mxu1  ;;  %7871 = vmatmul.mubr.msk.f32.vlgmr.msra.gmra.mrb[2].mxu1 %vm599_vm3, %v589_v49  ;;  %v7854_v52 = vpop.f32.mrb[5].mxu0  ;;  %v8538_v49 = vpack.c.bf16 %v1464_v48, %v1463_v47 }
 0x202   : > { %8506 = vmatpush3.bf16.msra.mxu1 %v8505_v46  ;;  %7883 = vmatprep.mubr.msk.f32.mxu1 %vm8970_vm0, %v8969_v20  ;;  %v8535_v46 = vpack.c.bf16 %v1462_v41, %v1461_v40  ;;  %v1622_v51 = vld [vmem:[#allocation2 + $0x130] sm:$0xff]  ;;  %v8804_v40 = vld [vmem:[%s10009_s1 + $0xf8] sm:$0xff]  }
 0x203   : > { %8507 = vmatprep.subr.bf16.mxu1 %v8971_v37  ;;  %v8805_v41 = vld [vmem:[%s10009_s1 + $0xb8] sm:$0xff]  }
 0x204   : > { %v982_v56 = vpop.f32.mrb[6].mxu0 }
 0x205   : > { %7920 = vmatmul.mubr.msk.f32.vlgmr.msra.gmra.mrb[8].mxu0 %vm599_vm3, %v982_v56  ;;  %v7908_v57 = vpop.f32.mrb[7].mxu0 }
 0x206   : > { %8509 = vmatpush3.bf16.msra.mxu1 %v8508_v53  ;;  %7941 = vmatpush3.msra.mxu0 %v9166_v25  ;;  %v1623_v57 = vld [vmem:[#allocation2 + $0x138] sm:$0xf] }
 0x207   : > { %7881 = vmatprep.subr.mxu1 %v8969_v20  ;;  %7942 = vmatprep.mubr.msk.f32.mxu0 %vm8970_vm0, %v8969_v20 }
 0x208   : > { %8528 = vmatprep.subr.bf16.mxu0 %v8971_v37 }
 0x209   : > { %7943 = vmatmul.mubr.msk.f32.vlgmr.msra.gmra.mrb[10].mxu0 %vm439_vm1, %v7149_v58 }
 0x20a   : > { %7882 = vmatpush3.msk.msra.mxu1 %vm603_vm2, %v517_v60  ;;  %8530 = vmatpush3.bf16.msra.mxu0 %v8529_v59 }
 0x20b   : > { %7884 = vmatmul.mubr.msk.f32.vlgmr.msra.gmra.mrb[4].mxu1 %vm599_vm3, %v509_v50  ;;  %7886 = vmatprep.subr.mxu1 %v8969_v20  ;;  %v1621_v50 = vld [vmem:[#allocation2 + $0x128] sm:$0xff] }
 0x20c   : > { %7887 = vmatpush3.msra.mxu1 %v9166_v25  ;;  %7888 = vmatprep.mubr.msk.f32.mxu1 %vm8970_vm0, %v8969_v20  ;;  %v8544_v53 = vpack.c.bf16 %v1622_v51, %v1621_v50 }
 0x20d   : > { %8531 = vmatprep.subr.bf16.mxu0 %v8971_v37  ;;  %8510 = vmatprep.subr.bf16.mxu1 %v8971_v37 }
 0x20e   : > { %7955 = vmatprep.mubr.msk.f32.mxu0 %vm8970_vm0, %v8969_v20  ;;  %8533 = vmatpush3.bf16.msra.mxu0 %v8532_v1 }
 0x20f   : > { %7889 = vmatmul.mubr.msk.f32.vlgmr.msra.gmra.mrb[6].mxu1 %vm439_vm1, %v7137_v61  ;;  %7953 = vmatprep.subr.mxu0 %v8969_v20 }
 0x210   : > { %7901 = vmatprep.mubr.msk.f32.mxu1 %vm8970_vm0, %v8969_v20  ;;  %8512 = vmatpush3.bf16.msra.mxu1 %v8511_v3  ;;  %v7161_v3 = vld [vmem:[%s10011_s3 + $0x10] sm:$0x3] }
 0x211   : > { %8513 = vmatprep.subr.bf16.mxu1 %v8971_v37 }
 0x212   : > { %7954 = vmatpush3.msk.msra.mxu0 %vm603_vm2, %v1307_v4  ;;  %v8547_v4 = vpack.c.bf16 %v1778_v0, %v1777_v63  ;;  %v7233_v63 = vld [vmem:[%s10011_s3 + $0x18] sm:$0x3]  ;;  %v2277_v0 = vld [vmem:[#allocation2 + $0x190] sm:$0xff] }
 0x213   : > { %7976 = vmatprep.subr.mxu0 %v8969_v20 }
 0x214   : > { %8515 = vmatpush3.bf16.msra.mxu1 %v8514_v7  ;;  %v8550_v7 = vpack.c.bf16 %v1780_v6, %v1779_v5  ;;  %v2279_v5 = vld [vmem:[#allocation2 + $0x1a0] sm:$0xff]  ;;  %v2280_v6 = vld [vmem:[#allocation2 + $0x1a8] sm:$0xff] }
 0x215   : > { %7899 = vmatprep.subr.mxu1 %v8969_v20 }
 0x218   : > { %7900 = vmatpush3.msk.msra.mxu1 %vm603_vm2, %v833_v8  ;;  %v1781_v8 = vld [vmem:[#allocation2 + $0x160] sm:$0xf] }
 0x219   : > { %7922 = vmatprep.subr.mxu1 %v8969_v20 }
 0x2d4   : > { %v673_v9 = vpop.f32.mrb[2].mxu1 }
 0x2d5   : > { %v7872_v10 = vpop.f32.mrb[3].mxu1 }
 0x2d8   : > { %v1064_v11 = vpop.f32.mrb[8].mxu0 }
 0x2d9   : > { %v7921_v12 = vpop.f32.mrb[9].mxu0 }
 0x2da   : > { %v8972_v12 = vmov 0  }
 0x2db   : > { %8772 = vset.pattern.permute.xlu0 %v8972_v12  ;;  %8773 = vset.pattern.permute.xlu1 %v8972_v12 }
 0x2dc   : > { %v1298_v13 = vpop.f32.mrb[10].mxu0 }
 0x2dd   : > { %7956 = vmatmul.mubr.msk.f32.vlgmr.msra.gmra.mrb[12].mxu0 %vm599_vm3, %v1298_v13  ;;  %v7944_v15 = vpop.f32.mrb[11].mxu0  ;;  %v8806_v13 = vld [vmem:[%s10013_s5] ss:$8 sps:$4 sm:$0xff]  }
 0x2de   : > { %v749_v16 = vpop.f32.mrb[4].mxu1  ;;  %7977 = vmatpush3.msra.mxu0 %v9166_v25  ;;  %7978 = vmatprep.mubr.msk.f32.mxu0 %vm8970_vm0, %v8969_v20  ;;  %v8808_v15 = vld [vmem:[%s10013_s5 + $0x4] ss:$8 sps:$4 sm:$0xff]  }
 0x2df   : > { %v750_v17 = vadd.f32 %v749_v16, %v673_v9  ;;  %v7885_v18 = vpop.f32.mrb[5].mxu1  ;;  %8540 = vmatprep.subr.bf16.mxu0 %v8971_v37  ;;  %v8790_v9 = vld [vmem:[%s10009_s1 + $0xc0] sm:$0xff]  }
 0x2e0   : > { %v7257_v16 = vld [vmem:[%s10012_s4 + $0x2] sm:$0x3] }
 0x2e1   : > { %7979 = vmatmul.mubr.msk.f32.vlgmr.msra.gmra.mrb[14].mxu0 %vm439_vm1, %v7157_v32  ;;  %v8797_v32 = vld [vmem:[%s10009_s1 + $0x98] sm:$0xff]  }
 0x2e2   : > { %v824_v23 = vpop.f32.mrb[6].mxu1  ;;  %7991 = vmatprep.mubr.msk.f32.mxu0 %vm8970_vm0, %v8969_v20  ;;  %8542 = vmatpush3.bf16.msra.mxu0 %v8541_v35  ;;  %v8800_v35 = vld [vmem:[%s10009_s1 + $0xe8] sm:$0xff]  }
 0x2e3   : > { %v7890_v24 = vpop.f32.mrb[7].mxu1  ;;  %7902 = vmatmul.mubr.msk.f32.vlgmr.msra.gmra.mrb[8].mxu1 %vm599_vm3, %v824_v23  ;;  %8543 = vmatprep.subr.bf16.mxu0 %v8971_v37 }
 0x2e4   : > { %7923 = vmatpush3.msra.mxu1 %v9166_v25  ;;  %7924 = vmatprep.mubr.msk.f32.mxu1 %vm8970_vm0, %v8969_v20  ;;  %v8792_v24 = vld [vmem:[%s10009_s1 + $0xc8] sm:$0xff]  }
 0x2e5   : > { %8522 = vmatprep.subr.bf16.mxu1 %v8971_v37 }
 0x2e6   : > { %8545 = vmatpush3.bf16.msra.mxu0 %v8544_v53 }
 0x2e7   : > { %7925 = vmatmul.mubr.msk.f32.vlgmr.msra.gmra.mrb[10].mxu1 %vm439_vm1, %v7145_v26  ;;  %7989 = vmatprep.subr.mxu0 %v8969_v20 }
 0x2e8   : > { %8524 = vmatpush3.bf16.msra.mxu1 %v8523_v27  ;;  %7937 = vmatprep.mubr.msk.f32.mxu1 %vm8970_vm0, %v8969_v20 }
 0x2e9   : > { %8525 = vmatprep.subr.bf16.mxu1 %v8971_v37 }
 0x2ea   : > { %7990 = vmatpush3.msk.msra.mxu0 %vm603_vm2, %v1623_v57 }
 0x2eb   : > { %1908 = vmatprep.subr.bf16.mxu0 %v8808_v15 }
 0x2ec   : > { %8527 = vmatpush3.bf16.msra.mxu1 %v8526_v30  ;;  %v8795_v30 = vld [vmem:[%s10009_s1 + $0x90] sm:$0xff]  }
 0x2ed   : > { %7935 = vmatprep.subr.mxu1 %v8969_v20 }
 0x2f0   : > { %7936 = vmatpush3.msk.msra.mxu1 %vm603_vm2, %v1149_v31  ;;  %v8796_v31 = vld [vmem:[%s10009_s1 + $0xd8] sm:$0xff]  }
 0x2f1   : > { %7958 = vmatprep.subr.mxu1 %v8969_v20 }
 0x3b0   : > { %v1380_v52 = vpop.f32.mrb[12].mxu0 }
 0x3b1   : > { %v7957_v54 = vpop.f32.mrb[13].mxu0 }
 0x3b4   : > { %v1614_v56 = vpop.f32.mrb[14].mxu0 }
 0x3b5   : > { %v7980_v58 = vpop.f32.mrb[15].mxu0  ;;  %7992 = vmatmul.mubr.msk.f32.vlgmr.msra.gmra.mrb[16].mxu0 %vm599_vm3, %v1614_v56 }
 0x3b6   : > { %v906_v36 = vpop.f32.mrb[8].mxu1  ;;  %1940 = vmatprep.mubr.bf16.mxu0 %v8972_v12  ;;  %1909 = vmatpush1.bf16.msra.mxu0 %v8806_v13  ;;  %v2672_v13 = vld [vmem:[#allocation2 + $0x200] sm:$0xf] }
 0x3b7   : > { %v910_v38 = vadd.f32 %v906_v36, %v750_v17  ;;  %v7903_v39 = vpop.f32.mrb[9].mxu1  ;;  %v8801_v36 = vld [vmem:[%s10009_s1 + $0xa8] sm:$0xff]  }
 0x3b8   : > { %v8803_v39 = vld [vmem:[%s10009_s1 + $0xb0] sm:$0xff]  }
 0x3b9   : > { %v1068_v42 = vadd.f32 %v1064_v11, %v910_v38  ;;  %v1859_v11 = vld [vmem:[%s10012_s4] sm:$0x3]  ;;  %v8802_v38 = vld [vmem:[%s10009_s1 + $0xf0] sm:$0xff]  }
 0x3ba   : > { %v1140_v43 = vpop.f32.mrb[10].mxu1  ;;  %1862 = vperm.xlu0 %8772, %v1859_v11   ;;  %v2281_v11 = vld [vmem:[#allocation2 + $0x1b0] sm:$0xf] }
 0x3bb   : > { %v7926_v44 = vpop.f32.mrb[11].mxu1  ;;  %7938 = vmatmul.mubr.msk.f32.vlgmr.msra.gmra.mrb[12].mxu1 %vm599_vm3, %v1140_v43  ;;  %v8809_v43 = vld [vmem:[%s10013_s5 + $0x10] ss:$8 sps:$4 sm:$0xff]  }
 0x3bc   : > { %7959 = vmatpush3.msra.mxu1 %v9166_v25  ;;  %7960 = vmatprep.mubr.msk.f32.mxu1 %vm8970_vm0, %v8969_v20  ;;  %v1872_v44 = vld [vmem:[%s10013_s5 + $0x20] sm:$0x33] }
 0x3bd   : > { %8534 = vmatprep.subr.bf16.mxu1 %v8971_v37 }
 0x3be   : > { %3544 = vperm.xlu0 %8772, %v7257_v16  }
 0x3bf   : > { %7961 = vmatmul.mubr.msk.f32.vlgmr.msra.gmra.mrb[14].mxu1 %vm439_vm1, %v7153_v45  ;;  %v7170_v45 = vcombine.high %v1872_v44, %v1872_v44 }
 0x3c0   : > { %8536 = vmatpush3.bf16.msra.mxu1 %v8535_v46  ;;  %7973 = vmatprep.mubr.msk.f32.mxu1 %vm8970_vm0, %v8969_v20  ;;  %v7169_v46 = vcombine.low %v1872_v44, %v1872_v44  ;;  %v2987_v44 = vld [vmem:[#allocation2 + $0x248] sm:$0xff] }
 0x3c1   : > { %8537 = vmatprep.subr.bf16.mxu1 %v8971_v37 }
 0x3c2   : > { %v1903_v47 = vsel %vm1901_vm4, %v7169_v46, 0 }
 0x3c4   : > { %8539 = vmatpush3.bf16.msra.mxu1 %v8538_v49 }
 0x3c5   : > { %7971 = vmatprep.subr.mxu1 %v8969_v20 }
 0x3c8   : > { %7972 = vmatpush3.msk.msra.mxu1 %vm603_vm2, %v1465_v55 }
 0x3c9   : > { %7994 = vmatprep.subr.mxu1 %v8969_v20 }
 0x439   : > { %v1863_v49 = vpop.permute.xlu0 %1862 }
 0x48e   : > { %v1222_v59 = vpop.f32.mrb[12].mxu1 }
 0x48f   : > { %v1226_v60 = vadd.f32 %v1222_v59, %v1068_v42  ;;  %v7939_v61 = vpop.f32.mrb[13].mxu1  ;;  %v8811_v42 = vld [vmem:[%s10013_s5 + $0x14] ss:$8 sps:$4 sm:$0xff]   ;;  %v7221_v59 = vld [vmem:[%s10011_s3 + $0x12] sm:$0x3] }
 0x490   : > { %1910 = vmatprep.subr.bf16.mxu0 %v8811_v42  ;;  %v7229_v61 = vld [vmem:[%s10011_s3 + $0x16] sm:$0x3]  ;;  %v2511_v42 = vld [vmem:[#allocation2 + $0x1c0] sm:$0xff] }
 0x491   : > { %v1384_v62 = vadd.f32 %v1380_v52, %v1226_v60  ;;  %1911 = vmatpush1.bf16.msra.mxu0 %v8809_v43  ;;  %v2986_v43 = vld [vmem:[#allocation2 + $0x240] sm:$0xff] }
 0x492   : > { %v1456_v1 = vpop.f32.mrb[14].mxu1  ;;  %7171 = vmatprep.subr.msk.bf16.mxu0 %vm1901_vm4, %v7170_v45  ;;  %v2200_v45 = vld [vmem:[#allocation2 + $0x188] sm:$0xf] }
 0x493   : > { %v7962_v2 = vpop.f32.mrb[15].mxu1  ;;  %7974 = vmatmul.mubr.msk.f32.vlgmr.msra.gmra.mrb[16].mxu1 %vm599_vm3, %v1456_v1  ;;  %v2278_v1 = vld [vmem:[#allocation2 + $0x198] sm:$0xff] }
 0x494   : > { %7995 = vmatpush3.msra.mxu1 %v9166_v25  ;;  %7996 = vmatprep.mubr.msk.f32.mxu1 %vm8970_vm0, %v8969_v20  ;;  %v1696_v25 = vpop.f32.mrb[16].mxu0  ;;  %v2668_v2 = vld [vmem:[#allocation2 + $0x1e0] sm:$0xff] }
 0x495   : > { %8546 = vmatprep.subr.bf16.mxu1 %v8971_v37  ;;  %v7993_v10 = vpop.f32.mrb[17].mxu0  ;;  %1913 = vmatpush1.bf16.msra.mxu0 %v1903_v47  ;;  %v2512_v47 = vld [vmem:[#allocation2 + $0x1c8] sm:$0xff] }
 0x496   : > { %8012 = vmatprep.subr.mxu0 %v8969_v20 }
 0x497   : > { %7997 = vmatmul.mubr.msk.f32.vlgmr.msra.gmra.mrb[18].mxu1 %vm439_vm1, %v7161_v3  ;;  %v8553_v3 = vpack.c.bf16 %v2278_v1, %v2277_v0 }
 0x498   : > { %8548 = vmatpush3.bf16.msra.mxu1 %v8547_v4  ;;  %8009 = vmatprep.mubr.msk.f32.mxu1 %vm8970_vm0, %v8969_v20  ;;  %v2669_v4 = vld [vmem:[#allocation2 + $0x1e8] sm:$0xff] }
 0x499   : > { %8549 = vmatprep.subr.bf16.mxu1 %v8971_v37 }
 0x49c   : > { %8551 = vmatpush3.bf16.msra.mxu1 %v8550_v7  ;;  %v8571_v7 = vpack.c.bf16 %v2669_v4, %v2668_v2  ;;  %v3300_v2 = vld [vmem:[#allocation2 + $0x280] sm:$0xff] }
 0x49d   : > { %8007 = vmatprep.subr.mxu1 %v8969_v20 }
 0x4a0   : > { %8008 = vmatpush3.msk.msra.mxu1 %vm603_vm2, %v1781_v8  ;;  %v2671_v8 = vld [vmem:[#allocation2 + $0x1f8] sm:$0xff] }
 0x4a1   : > { %7568 = vmatprep.subr.bf16.mxu1 %v8790_v9  ;;  %v8556_v9 = vpack.c.bf16 %v2280_v6, %v2279_v5  ;;  %v7249_v6 = vld [vmem:[%s10011_s3 + $0x20] sm:$0x3] }
 0x566   : > { %v1538_v17 = vpop.f32.mrb[16].mxu1 }
 0x567   : > { %v1542_v18 = vadd.f32 %v1538_v17, %v1384_v62  ;;  %v7975_v21 = vpop.f32.mrb[17].mxu1  ;;  %v7223_v62 = vld [vmem:[%s10011_s3 + $0x14] sm:$0x3] }
 0x568   : > { %v2196_v21 = vld [vmem:[#allocation2 + $0x168] sm:$0xff] }
 0x569   : > { %v1700_v23 = vadd.f32 %v1696_v25, %v1542_v18  ;;  %v2670_v25 = vld [vmem:[#allocation2 + $0x1f0] sm:$0xff] }
 0x56a   : > { %v1772_v26 = vpop.f32.mrb[18].mxu1  ;;  %v8574_v10 = vpack.c.bf16 %v2671_v8, %v2670_v25 }
 0x56b   : > { %v7998_v27 = vpop.f32.mrb[19].mxu1  ;;  %8010 = vmatmul.mubr.msk.f32.vlgmr.msra.gmra.mrb[20].mxu1 %vm599_vm3, %v1772_v26 }
 0x56c   : > { %7569 = vmatpush3.bf16.msra.mxu1 %v8791_v22  ;;  %2112 = vmatprep.mubr.bf16.mxu1 %v9138_v14  ;;  %v2197_v22 = vld [vmem:[#allocation2 + $0x170] sm:$0xff] }
 0x56d   : > { %7570 = vmatprep.subr.bf16.mxu1 %v8792_v24 }
 0x570   : > { %7571 = vmatpush3.bf16.msra.mxu1 %v8793_v28  ;;  %v8559_v28 = vpack.c.bf16 %v2197_v22, %v2196_v21  ;;  %v7245_v22 = vld [vmem:[%s10011_s3 + $0x1e] sm:$0x3] }
 0x571   : > { %7572 = vmatprep.subr.bf16.mxu1 %v8794_v29  ;;  %v2198_v29 = vld [vmem:[#allocation2 + $0x178] sm:$0xff] }
 0x574   : > { %7573 = vmatpush3.bf16.msra.mxu1 %v8795_v30  ;;  %v2199_v30 = vld [vmem:[#allocation2 + $0x180] sm:$0xff] }
 0x575   : > { %7574 = vmatprep.subr.bf16.mxu1 %v8796_v31 }
 0x578   : > { %7575 = vmatpush3.bf16.msra.mxu1 %v8797_v32  ;;  %v2984_v32 = vld [vmem:[#allocation2 + $0x230] sm:$0xff] }
 0x579   : > { %7576 = vmatprep.subr.bf16.mxu1 %v8798_v33  ;;  %v2985_v33 = vld [vmem:[#allocation2 + $0x238] sm:$0xff] }
 0x57c   : > { %7577 = vmatpush3.bf16.msra.mxu1 %v8799_v34 }
 0x57d   : > { %7578 = vmatprep.subr.bf16.mxu1 %v8800_v35 }
 0x580   : > { %7579 = vmatpush3.bf16.msra.mxu1 %v8801_v36  ;;  %v8562_v36 = vpack.c.bf16 %v2199_v30, %v2198_v29  ;;  %v3303_v29 = vld [vmem:[#allocation2 + $0x298] sm:$0xff] }
 0x581   : > { %7580 = vmatprep.subr.bf16.mxu1 %v8802_v38 }
 0x584   : > { %7581 = vmatpush3.bf16.msra.mxu1 %v8803_v39  ;;  %v7241_v39 = vld [vmem:[%s10011_s3 + $0x1c] sm:$0x3] }
 0x585   : > { %7582 = vmatprep.subr.bf16.mxu1 %v8804_v40  ;;  %v8583_v40 = vpack.c.bf16 %v2985_v33, %v2984_v32  ;;  %v3304_v32 = vld [vmem:[#allocation2 + $0x2a0] sm:$0xf] }
 0x588   : > { %7583 = vmatpush3.bf16.msra.mxu1 %v8805_v41  ;;  %v2510_v41 = vld [vmem:[#allocation2 + $0x1b8] sm:$0xff] }
 0x589   : > { %8048 = vmatprep.subr.mxu1 %v8969_v20  ;;  %v8565_v46 = vpack.c.bf16 %v2511_v42, %v2510_v41  ;;  %v3458_v42 = vld [vmem:[#allocation2 + $0x2a8] sm:$0xff] }
 0x58b   : > { %2113 = vmatmul.mubr.bf16.vlgmr.msra.gmra.mrb[24].mxu1 %v9157_v19 }
 0x58c   : > { %8050 = vmatprep.mubr.msk.f32.mxu1 %vm8970_vm0, %v8969_v20 }
 0x63e   : > { %v1854_v48 = vpop.f32.mrb[20].mxu1 }
 0x63f   : > { %v1858_v50 = vadd.f32 %v1854_v48, %v1700_v23  ;;  %v8011_v51 = vpop.f32.mrb[21].mxu1  ;;  %v2513_v48 = vld [vmem:[#allocation2 + $0x1d0] sm:$0xff] }
 0x640   : > { %v2514_v51 = vld [vmem:[#allocation2 + $0x1d8] sm:$0xf] }
 0x641   : > { %v1865_v52 = vadd.f32 %v1863_v49, %v1858_v50  ;;  %v8586_v49 = vpack.c.bf16 %v2987_v44, %v2986_v43  ;;  %v8568_v50 = vpack.c.bf16 %v2513_v48, %v2512_v47  ;;  %v3459_v43 = vld [vmem:[#allocation2 + $0x2b0] sm:$0xff]  ;;  %v3460_v48 = vld [vmem:[#allocation2 + $0x2b8] sm:$0xff] }
 0x642   : > { %v8601_v47 = vpack.c.bf16 %v3459_v43, %v3458_v42  ;;  %v3968_v43 = vld [vmem:[#allocation2 + $0x310] sm:$0xff] }
 0x643   : > { %v1866_v53 = vmax.f32 %v1865_v52, 0.0  ;;  %v7237_v52 = vld [vmem:[%s10011_s3 + $0x1a] sm:$0x3] }
 0x645   : > { %v1867_v54 = vpack.c.bf16 %v1866_v53, %v1866_v53  ;;  %v2988_v53 = vld [vmem:[#allocation2 + $0x250] sm:$0xf] }
 0x647   : > { %7172 = vmatmul.mubr.msk.bf16.vlgmr.msra.gmra.mrb[20].mxu0 %vm599_vm3, %v1867_v54  ;;  %v2826_v54 = vld [vmem:[#allocation2 + $0x208] sm:$0xff] }
 0x648   : > { %8014 = vmatprep.mubr.msk.f32.mxu0 %vm8970_vm0, %v8969_v20 }
 0x65e   : > { %v7584_v55 = vpop.f32.mrb[24].mxu1 }
 0x65f   : > { %v7585_v56 = vpop.f32.mrb[25].mxu1 }
 0x660   : > { %v9380_v57 = vadd.f32 %v7585_v56, %v7584_v55  ;;  %v7587_v58 = vpop.f32.mrb[26].mxu1  ;;  %v2827_v55 = vld [vmem:[#allocation2 + $0x210] sm:$0xff]  ;;  %v2828_v56 = vld [vmem:[#allocation2 + $0x218] sm:$0xff] }
 0x661   : > { %v7588_v60 = vpop.f32.mrb[27].mxu1  ;;  %v8577_v58 = vpack.c.bf16 %v2827_v55, %v2826_v54 }
 0x662   : > { %8013 = vmatpush3.msra.mxu0 %v9380_v57  ;;  %8049 = vmatpush3.msra.mxu1 %v9380_v57 }
 0x663   : > { %8015 = vmatmul.mubr.msk.f32.vlgmr.msra.gmra.mrb[18].mxu0 %vm439_vm1, %v7221_v59  ;;  %8017 = vmatprep.subr.mxu0 %v8969_v20  ;;  %v2829_v59 = vld [vmem:[#allocation2 + $0x220] sm:$0xff] }
 0x664   : > { %8051 = vmatmul.mubr.msk.f32.vlgmr.msra.gmra.mrb[22].mxu1 %vm439_vm1, %v7229_v61  ;;  %8066 = vmatprep.subr.mxu1 %v8969_v20  ;;  %v8580_v60 = vpack.c.bf16 %v2829_v59, %v2828_v56  ;;  %v2830_v61 = vld [vmem:[#allocation2 + $0x228] sm:$0xf] }
 0x665   : > { %8018 = vmatpush3.msra.mxu0 %v9380_v57  ;;  %8067 = vmatpush3.msra.mxu1 %v9380_v57 }
 0x666   : > { %8019 = vmatprep.mubr.msk.f32.mxu0 %vm8970_vm0, %v8969_v20  ;;  %8068 = vmatprep.mubr.msk.f32.mxu1 %vm8970_vm0, %v8969_v20 }
 0x667   : > { %8020 = vmatmul.mubr.msk.f32.vlgmr.msra.gmra.mrb[24].mxu0 %vm439_vm1, %v7223_v62  ;;  %8552 = vmatprep.subr.bf16.mxu0 %v8971_v37 }
 0x668   : > { %8069 = vmatmul.mubr.msk.f32.vlgmr.msra.gmra.mrb[28].mxu1 %vm439_vm1, %v7233_v63  ;;  %8570 = vmatprep.subr.bf16.mxu1 %v8971_v37 }
 0x669   : > { %8032 = vmatprep.mubr.msk.f32.mxu0 %vm8970_vm0, %v8969_v20  ;;  %8081 = vmatprep.mubr.msk.f32.mxu1 %vm8970_vm0, %v8969_v20 }
 0x66a   : > { %8554 = vmatpush3.bf16.msra.mxu0 %v8553_v3  ;;  %8572 = vmatpush3.bf16.msra.mxu1 %v8571_v7  ;;  %v3301_v3 = vld [vmem:[#allocation2 + $0x288] sm:$0xff] }
 0x66b   : > { %8555 = vmatprep.subr.bf16.mxu0 %v8971_v37  ;;  %8573 = vmatprep.subr.bf16.mxu1 %v8971_v37  ;;  %v8595_v7 = vpack.c.bf16 %v3301_v3, %v3300_v2  ;;  %v8818_v2 = vld [vmem:[%s10009_s1 + $0x150] sm:$0xff]  }
 0x66c   : > { %v8819_v3 = vld [vmem:[%s10009_s1 + $0x110] sm:$0xff]  }
 0x66e   : > { %8557 = vmatpush3.bf16.msra.mxu0 %v8556_v9  ;;  %8575 = vmatpush3.bf16.msra.mxu1 %v8574_v10 }
 0x66f   : > { %8030 = vmatprep.subr.mxu0 %v8969_v20  ;;  %8079 = vmatprep.subr.mxu1 %v8969_v20 }
 0x672   : > { %8031 = vmatpush3.msk.msra.mxu0 %vm603_vm2, %v2281_v11  ;;  %8080 = vmatpush3.msk.msra.mxu1 %vm603_vm2, %v2672_v13 }
 0x673   : > { %8558 = vmatprep.subr.bf16.mxu0 %v8971_v37  ;;  %8102 = vmatprep.subr.mxu1 %v8969_v20 }
 0x71a   : > { %v1942_v15 = vpop.f32.mrb[20].mxu0 }
 0x71b   : > { %1949 = vst [vmem:[%s9140_s15] sm:$0x3] %v1942_v15  ;;  %v1944_v16 = vpop.f32.mrb[21].mxu0  ;;  %v3142_v15 = vld [vmem:[#allocation2 + $0x258] sm:$0xff] }
 0x71c   : > { %1950 = vst [vmem:[%s9140_s15 + $0x8] sm:$0x3] %v1944_v16  ;;  %v1946_v17 = vpop.f32.mrb[22].mxu0  ;;  %v3143_v16 = vld [vmem:[#allocation2 + $0x260] sm:$0xff] }
 0x71d   : > { %v1947_v18 = vpop.f32.mrb[23].mxu0 }
 0x736   : > { %v2191_v23 = vpop.f32.mrb[18].mxu0 }
 0x737   : > { %v8016_v24 = vpop.f32.mrb[19].mxu0  ;;  %v2505_v26 = vpop.f32.mrb[22].mxu1 }
 0x738   : > { %v8052_v27 = vpop.f32.mrb[23].mxu1  ;;  %v3144_v24 = vld [vmem:[#allocation2 + $0x268] sm:$0xff] }
 0x73a   : > { %v2272_v31 = vpop.f32.mrb[24].mxu0 }
 0x73b   : > { %v2663_v34 = vpop.f32.mrb[28].mxu1  ;;  %v8021_v35 = vpop.f32.mrb[25].mxu0  ;;  %8033 = vmatmul.mubr.msk.f32.vlgmr.msra.gmra.mrb[26].mxu0 %vm599_vm3, %v2272_v31  ;;  %v3146_v31 = vld [vmem:[#allocation2 + $0x278] sm:$0xf] }
 0x73c   : > { %8560 = vmatpush3.bf16.msra.mxu0 %v8559_v28  ;;  %8082 = vmatmul.mubr.msk.f32.vlgmr.msra.gmra.mrb[30].mxu1 %vm599_vm3, %v2663_v34  ;;  %v8070_v38 = vpop.f32.mrb[29].mxu1  ;;  %v3302_v28 = vld [vmem:[#allocation2 + $0x290] sm:$0xff] }
 0x73d   : > { %8103 = vmatpush3.msra.mxu1 %v9380_v57  ;;  %8561 = vmatprep.subr.bf16.mxu0 %v8971_v37  ;;  %v8598_v30 = vpack.c.bf16 %v3303_v29, %v3302_v28 }
 0x73e   : > { %8104 = vmatprep.mubr.msk.f32.mxu1 %vm8970_vm0, %v8969_v20  ;;  %8045 = vmatprep.mubr.msk.f32.mxu0 %vm8970_vm0, %v8969_v20 }
 0x73f   : > { %8582 = vmatprep.subr.bf16.mxu1 %v8971_v37 }
 0x740   : > { %8563 = vmatpush3.bf16.msra.mxu0 %v8562_v36  ;;  %8105 = vmatmul.mubr.msk.f32.vlgmr.msra.gmra.mrb[32].mxu1 %vm439_vm1, %v7241_v39 }
 0x741   : > { %8043 = vmatprep.subr.mxu0 %v8969_v20  ;;  %8584 = vmatpush3.bf16.msra.mxu1 %v8583_v40 }
 0x742   : > { %8585 = vmatprep.subr.bf16.mxu1 %v8971_v37  ;;  %8117 = vmatprep.mubr.msk.f32.mxu1 %vm8970_vm0, %v8969_v20 }
 0x744   : > { %8044 = vmatpush3.msk.msra.mxu0 %vm603_vm2, %v2200_v45 }
 0x745   : > { %8046 = vmatmul.mubr.msk.f32.vlgmr.msra.gmra.mrb[28].mxu0 %vm599_vm3, %v2191_v23  ;;  %8564 = vmatprep.subr.bf16.mxu0 %v8971_v37  ;;  %v8589_v23 = vpack.c.bf16 %v3143_v16, %v3142_v15  ;;  %v8835_v15 = vld [vmem:[%s10013_s5 + $0x3c] ss:$8 sps:$4 sm:$0xff]   ;;  %v8833_v16 = vld [vmem:[%s10013_s5 + $0x38] ss:$8 sps:$4 sm:$0xff]  }
 0x746   : > { %8566 = vmatpush3.bf16.msra.mxu0 %v8565_v46  ;;  %8063 = vmatprep.mubr.msk.f32.mxu0 %vm8970_vm0, %v8969_v20  ;;  %v7253_v46 = vld [vmem:[%s10011_s3 + $0x22] sm:$0x3] }
 0x747   : > { %8567 = vmatprep.subr.bf16.mxu0 %v8971_v37  ;;  %8587 = vmatpush3.bf16.msra.mxu1 %v8586_v49  ;;  %v3461_v49 = vld [vmem:[#allocation2 + $0x2c0] sm:$0xff] }
 0x748   : > { %8115 = vmatprep.subr.mxu1 %v8969_v20 }
 0x74a   : > { %8569 = vmatpush3.bf16.msra.mxu0 %v8568_v50  ;;  %v8604_v50 = vpack.c.bf16 %v3461_v49, %v3460_v48 }
 0x74b   : > { %8061 = vmatprep.subr.mxu0 %v8969_v20  ;;  %8116 = vmatpush3.msk.msra.mxu1 %vm603_vm2, %v2988_v53  ;;  %v8832_v53 = vld [vmem:[%s10013_s5 + $0x2c] ss:$8 sps:$4 sm:$0xff]  }
 0x74c   : > { %8138 = vmatprep.subr.mxu1 %v8969_v20 }
 0x74e   : > { %8062 = vmatpush3.msk.msra.mxu0 %vm603_vm2, %v2514_v51  ;;  %v8814_v51 = vld [vmem:[%s10009_s1 + $0x140] sm:$0xff]  }
 0x74f   : > { %8064 = vmatmul.mubr.msk.f32.vlgmr.msra.gmra.mrb[30].mxu0 %vm599_vm3, %v2505_v26  ;;  %8084 = vmatprep.subr.mxu0 %v8969_v20  ;;  %v3145_v26 = vld [vmem:[#allocation2 + $0x270] sm:$0xff] }
 0x750   : > { %8085 = vmatpush3.msra.mxu0 %v9380_v57  ;;  %8086 = vmatprep.mubr.msk.f32.mxu0 %vm8970_vm0, %v8969_v20  ;;  %v8592_v27 = vpack.c.bf16 %v3145_v26, %v3144_v24 }
 0x751   : > { %8576 = vmatprep.subr.bf16.mxu0 %v8971_v37 }
 0x753   : > { %8087 = vmatmul.mubr.msk.f32.vlgmr.msra.gmra.mrb[32].mxu0 %vm439_vm1, %v7237_v52  ;;  %v8830_v52 = vld [vmem:[%s10013_s5 + $0x28] ss:$8 sps:$4 sm:$0xff]  }
 0x754   : > { %8099 = vmatprep.mubr.msk.f32.mxu0 %vm8970_vm0, %v8969_v20  ;;  %8578 = vmatpush3.bf16.msra.mxu0 %v8577_v58 }
 0x755   : > { %8579 = vmatprep.subr.bf16.mxu0 %v8971_v37 }
 0x758   : > { %8581 = vmatpush3.bf16.msra.mxu0 %v8580_v60  ;;  %v8815_v60 = vld [vmem:[%s10009_s1 + $0x100] sm:$0xff]  }
 0x759   : > { %8097 = vmatprep.subr.mxu0 %v8969_v20 }
 0x75c   : > { %8098 = vmatpush3.msk.msra.mxu0 %vm603_vm2, %v2830_v61 }
 0x75d   : > { %8120 = vmatprep.subr.mxu0 %v8969_v20 }
 0x80e   : > { %v2354_v62 = vpop.f32.mrb[26].mxu0 }
 0x80f   : > { %v8034_v63 = vpop.f32.mrb[27].mxu0  ;;  %v2745_v0 = vpop.f32.mrb[30].mxu1 }
 0x810   : > { %v8083_v1 = vpop.f32.mrb[31].mxu1 }
 0x811   : > { %v8817_v1 = vld [vmem:[%s10009_s1 + $0x108] sm:$0xff]  }
 0x813   : > { %v2979_v4 = vpop.f32.mrb[32].mxu1 }
 0x814   : > { %8118 = vmatmul.mubr.msk.f32.vlgmr.msra.gmra.mrb[34].mxu1 %vm599_vm3, %v2979_v4  ;;  %v8106_v5 = vpop.f32.mrb[33].mxu1  ;;  %v8820_v4 = vld [vmem:[%s10009_s1 + $0x158] sm:$0xff]  }
 0x815   : > { %8139 = vmatpush3.msra.mxu1 %v9380_v57  ;;  %8140 = vmatprep.mubr.msk.f32.mxu1 %vm8970_vm0, %v8969_v20  ;;  %v8821_v5 = vld [vmem:[%s10009_s1 + $0x118] sm:$0xff]  }
 0x816   : > { %8594 = vmatprep.subr.bf16.mxu1 %v8971_v37 }
 0x818   : > { %v2430_v25 = vpop.f32.mrb[28].mxu0  ;;  %8141 = vmatmul.mubr.msk.f32.vlgmr.msra.gmra.mrb[36].mxu1 %vm439_vm1, %v7249_v6  ;;  %v8822_v6 = vld [vmem:[%s10009_s1 + $0x160] sm:$0xff]  }
 0x819   : > { %v2431_v8 = vadd.f32 %v2430_v25, %v2354_v62  ;;  %v8047_v9 = vpop.f32.mrb[29].mxu0  ;;  %8596 = vmatpush3.bf16.msra.mxu1 %v8595_v7  ;;  %8153 = vmatprep.mubr.msk.f32.mxu1 %vm8970_vm0, %v8969_v20  ;;  %v8816_v62 = vld [vmem:[%s10009_s1 + $0x148] sm:$0xff]   ;;  %v8823_v7 = vld [vmem:[%s10009_s1 + $0x120] sm:$0xff]  }
 0x81a   : > { %8597 = vmatprep.subr.bf16.mxu1 %v8971_v37  ;;  %v8824_v25 = vld [vmem:[%s10009_s1 + $0x168] sm:$0xff]   ;;  %v8826_v9 = vld [vmem:[%s10009_s1 + $0x170] sm:$0xff]  }
 0x81d   : > { %8599 = vmatpush3.bf16.msra.mxu1 %v8598_v30 }
 0x81e   : > { %8151 = vmatprep.subr.mxu1 %v8969_v20 }
 0x821   : > { %8152 = vmatpush3.msk.msra.mxu1 %vm603_vm2, %v3304_v32 }
 0x822   : > { %v2587_v10 = vpop.f32.mrb[30].mxu0  ;;  %3590 = vmatprep.subr.bf16.mxu1 %v8832_v53 }
 0x823   : > { %v2591_v11 = vadd.f32 %v2587_v10, %v2431_v8  ;;  %v8065_v13 = vpop.f32.mrb[31].mxu0  ;;  %v8825_v8 = vld [vmem:[%s10009_s1 + $0x128] sm:$0xff]   ;;  %v8827_v10 = vld [vmem:[%s10009_s1 + $0x130] sm:$0xff]  }
 0x824   : > { %v8829_v13 = vld [vmem:[%s10009_s1 + $0x138] sm:$0xff]  }
 0x825   : > { %v2749_v17 = vadd.f32 %v2745_v0, %v2591_v11  ;;  %v8828_v11 = vld [vmem:[%s10009_s1 + $0x178] sm:$0xff]  }
 0x826   : > { %v2821_v18 = vpop.f32.mrb[32].mxu0 }
 0x827   : > { %v8088_v21 = vpop.f32.mrb[33].mxu0  ;;  %8100 = vmatmul.mubr.msk.f32.vlgmr.msra.gmra.mrb[34].mxu0 %vm599_vm3, %v2821_v18 }
 0x828   : > { %8121 = vmatpush3.msra.mxu0 %v9380_v57  ;;  %8122 = vmatprep.mubr.msk.f32.mxu0 %vm8970_vm0, %v8969_v20 }
 0x829   : > { %8588 = vmatprep.subr.bf16.mxu0 %v8971_v37 }
 0x82b   : > { %8123 = vmatmul.mubr.msk.f32.vlgmr.msra.gmra.mrb[36].mxu0 %vm439_vm1, %v7245_v22 }
 0x82c   : > { %8590 = vmatpush3.bf16.msra.mxu0 %v8589_v23  ;;  %8135 = vmatprep.mubr.msk.f32.mxu0 %vm8970_vm0, %v8969_v20 }
 0x82d   : > { %8591 = vmatprep.subr.bf16.mxu0 %v8971_v37 }
 0x830   : > { %8593 = vmatpush3.bf16.msra.mxu0 %v8592_v27  ;;  %v3545_v27 = vpop.permute.xlu0 %3544 }
 0x831   : > { %8133 = vmatprep.subr.mxu0 %v8969_v20 }
 0x834   : > { %8134 = vmatpush3.msk.msra.mxu0 %vm603_vm2, %v3146_v31 }
 0x835   : > { %8156 = vmatprep.subr.mxu0 %v8969_v20 }
 0x8e7   : > { %v3061_v33 = vpop.f32.mrb[34].mxu1 }
 0x8e8   : > { %v8119_v34 = vpop.f32.mrb[35].mxu1 }
 0x8eb   : > { %v3295_v35 = vpop.f32.mrb[36].mxu1 }
 0x8ec   : > { %8154 = vmatmul.mubr.msk.f32.vlgmr.msra.gmra.mrb[38].mxu1 %vm599_vm3, %v3295_v35  ;;  %v8142_v36 = vpop.f32.mrb[37].mxu1  ;;  %v7319_v35 = vld [vmem:[%s10011_s3 + $0x24] sm:$0x3] }
 0x8ed   : > { %3622 = vmatprep.mubr.bf16.mxu1 %v8972_v12  ;;  %3591 = vmatpush1.bf16.msra.mxu1 %v8830_v52  ;;  %v3885_v52 = vld [vmem:[#allocation2 + $0x2d8] sm:$0xff] }
 0x8ee   : > { %3592 = vmatprep.subr.bf16.mxu1 %v8835_v15 }
 0x8f1   : > { %3593 = vmatpush1.bf16.msra.mxu1 %v8833_v16  ;;  %v4518_v16 = vld [vmem:[#allocation2 + $0x390] sm:$0xf] }
 0x8fa   : > { %v2903_v38 = vpop.f32.mrb[34].mxu0 }
 0x8fb   : > { %v2907_v39 = vadd.f32 %v2903_v38, %v2749_v17  ;;  %v8101_v40 = vpop.f32.mrb[35].mxu0  ;;  %v7262_v17 = vld [vmem:[%s10013_s5 + $0x48] sm:$0x33]  ;;  %v7321_v38 = vld [vmem:[%s10011_s3 + $0x26] sm:$0x3] }
 0x8fc   : > { %v7268_v18 = vcombine.high %v7262_v17, %v7262_v17  ;;  %v7267_v21 = vcombine.low %v7262_v17, %v7262_v17  ;;  %v3966_v40 = vld [vmem:[#allocation2 + $0x300] sm:$0xff] }
 0x8fd   : > { %v3065_v41 = vadd.f32 %v3061_v33, %v2907_v39  ;;  %v3965_v39 = vld [vmem:[#allocation2 + $0x2f8] sm:$0xff] }
 0x8fe   : > { %v3137_v44 = vpop.f32.mrb[36].mxu0  ;;  %7269 = vmatprep.subr.msk.bf16.mxu1 %vm1901_vm4, %v7268_v18  ;;  %v3585_v22 = vsel %vm1901_vm4, %v7267_v21, 0  ;;  %v8607_v42 = vpack.c.bf16 %v3966_v40, %v3965_v39  ;;  %v4356_v21 = vld [vmem:[#allocation2 + $0x348] sm:$0xff]  ;;  %v7343_v40 = vld [vmem:[%s10011_s3 + $0x30] sm:$0x3] }
 0x8ff   : > { %v8124_v45 = vpop.f32.mrb[37].mxu0  ;;  %8136 = vmatmul.mubr.msk.f32.vlgmr.msra.gmra.mrb[38].mxu0 %vm599_vm3, %v3137_v44  ;;  %3595 = vmatpush1.bf16.msra.mxu1 %v3585_v22  ;;  %v4357_v22 = vld [vmem:[#allocation2 + $0x350] sm:$0xff] }
 0x900   : > { %8157 = vmatpush3.msra.mxu0 %v9380_v57  ;;  %8158 = vmatprep.mubr.msk.f32.mxu0 %vm8970_vm0, %v8969_v20  ;;  %v3462_v57 = vld [vmem:[#allocation2 + $0x2c8] sm:$0xf]  ;;  %v3969_v45 = vld [vmem:[#allocation2 + $0x318] sm:$0xf] }
 0x901   : > { %8600 = vmatprep.subr.bf16.mxu0 %v8971_v37  ;;  %8174 = vmatprep.subr.mxu1 %v8969_v20 }
 0x903   : > { %8159 = vmatmul.mubr.msk.f32.vlgmr.msra.gmra.mrb[40].mxu0 %vm439_vm1, %v7253_v46 }
 0x904   : > { %8602 = vmatpush3.bf16.msra.mxu0 %v8601_v47  ;;  %8171 = vmatprep.mubr.msk.f32.mxu0 %vm8970_vm0, %v8969_v20 }
 0x905   : > { %8603 = vmatprep.subr.bf16.mxu0 %v8971_v37 }
 0x908   : > { %8605 = vmatpush3.bf16.msra.mxu0 %v8604_v50 }
 0x909   : > { %8169 = vmatprep.subr.mxu0 %v8969_v20 }
 0x90c   : > { %8170 = vmatpush3.msk.msra.mxu0 %vm603_vm2, %v3462_v57 }
 0x90d   : > { %7662 = vmatprep.subr.bf16.mxu0 %v8814_v51  ;;  %v3884_v51 = vld [vmem:[#allocation2 + $0x2d0] sm:$0xff] }
 0x9bf   : > { %v3377_v54 = vpop.f32.mrb[38].mxu1 }
 0x9c0   : > { %v8155_v55 = vpop.f32.mrb[39].mxu1 }
 0x9c1   : > { %v8613_v55 = vpack.c.bf16 %v3885_v52, %v3884_v51  ;;  %v4675_v51 = vld [vmem:[#allocation2 + $0x3b0] sm:$0xff] }
 0x9d2   : > { %v3219_v56 = vpop.f32.mrb[38].mxu0 }
 0x9d3   : > { %v3223_v58 = vadd.f32 %v3219_v56, %v3065_v41  ;;  %v8137_v59 = vpop.f32.mrb[39].mxu0  ;;  %v3967_v41 = vld [vmem:[#allocation2 + $0x308] sm:$0xff]  ;;  %v3886_v56 = vld [vmem:[#allocation2 + $0x2e0] sm:$0xff] }
 0x9d4   : > { %v8610_v44 = vpack.c.bf16 %v3968_v43, %v3967_v41  ;;  %v7339_v41 = vld [vmem:[%s10011_s3 + $0x2e] sm:$0x3] }
 0x9d5   : > { %v3381_v61 = vadd.f32 %v3377_v54, %v3223_v58  ;;  %v3887_v58 = vld [vmem:[#allocation2 + $0x2e8] sm:$0xff] }
 0x9d6   : > { %v3453_v63 = vpop.f32.mrb[40].mxu0  ;;  %v4831_v43 = vld [vmem:[#allocation2 + $0x3c8] sm:$0xff] }
 0x9d7   : > { %v8160_v0 = vpop.f32.mrb[41].mxu0  ;;  %8172 = vmatmul.mubr.msk.f32.vlgmr.msra.gmra.mrb[42].mxu0 %vm599_vm3, %v3453_v63  ;;  %v7327_v63 = vld [vmem:[%s10011_s3 + $0x28] sm:$0x3] }
 0x9d8   : > { %7663 = vmatpush3.bf16.msra.mxu0 %v8815_v60  ;;  %3800 = vmatprep.mubr.bf16.mxu0 %v9138_v14  ;;  %v7331_v0 = vld [vmem:[%s10011_s3 + $0x2a] sm:$0x3] }
 0x9d9   : > { %7664 = vmatprep.subr.bf16.mxu0 %v8816_v62  ;;  %v3888_v62 = vld [vmem:[#allocation2 + $0x2f0] sm:$0xf] }
 0x9dc   : > { %7665 = vmatpush3.bf16.msra.mxu0 %v8817_v1  ;;  %v7335_v1 = vld [vmem:[%s10011_s3 + $0x2c] sm:$0x3] }
 0x9dd   : > { %7666 = vmatprep.subr.bf16.mxu0 %v8818_v2  ;;  %v4198_v2 = vld [vmem:[#allocation2 + $0x320] sm:$0xff] }
 0x9e0   : > { %7667 = vmatpush3.bf16.msra.mxu0 %v8819_v3  ;;  %v4199_v3 = vld [vmem:[#allocation2 + $0x328] sm:$0xff] }
 0x9e1   : > { %7668 = vmatprep.subr.bf16.mxu0 %v8820_v4  ;;  %v4200_v4 = vld [vmem:[#allocation2 + $0x330] sm:$0xff] }
 0x9e4   : > { %7669 = vmatpush3.bf16.msra.mxu0 %v8821_v5  ;;  %v8619_v5 = vpack.c.bf16 %v4199_v3, %v4198_v2 }
 0x9e5   : > { %7670 = vmatprep.subr.bf16.mxu0 %v8822_v6  ;;  %v4201_v6 = vld [vmem:[#allocation2 + $0x338] sm:$0xff] }
 0x9e8   : > { %7671 = vmatpush3.bf16.msra.mxu0 %v8823_v7  ;;  %v8622_v7 = vpack.c.bf16 %v4201_v6, %v4200_v4  ;;  %v4988_v4 = vld [vmem:[#allocation2 + $0x3e8] sm:$0xff] }
 0x9e9   : > { %7672 = vmatprep.subr.bf16.mxu0 %v8824_v25  ;;  %v4202_v25 = vld [vmem:[#allocation2 + $0x340] sm:$0xf] }
 0x9ec   : > { %7673 = vmatpush3.bf16.msra.mxu0 %v8825_v8  ;;  %v4514_v8 = vld [vmem:[#allocation2 + $0x370] sm:$0xff] }
 0x9ed   : > { %7674 = vmatprep.subr.bf16.mxu0 %v8826_v9  ;;  %v4515_v9 = vld [vmem:[#allocation2 + $0x378] sm:$0xff] }
 0x9f0   : > { %7675 = vmatpush3.bf16.msra.mxu0 %v8827_v10  ;;  %v8631_v10 = vpack.c.bf16 %v4515_v9, %v4514_v8 }
 0x9f1   : > { %7676 = vmatprep.subr.bf16.mxu0 %v8828_v11  ;;  %v4516_v11 = vld [vmem:[#allocation2 + $0x380] sm:$0xff] }
 0x9f4   : > { %7677 = vmatpush3.bf16.msra.mxu0 %v8829_v13  ;;  %v4517_v13 = vld [vmem:[#allocation2 + $0x388] sm:$0xff] }
 0x9f5   : > { %8618 = vmatprep.subr.bf16.mxu0 %v8971_v37  ;;  %v8634_v15 = vpack.c.bf16 %v4517_v13, %v4516_v11  ;;  %v5149_v11 = vld [vmem:[#allocation2 + $0x428] sm:$0xff]  ;;  %v7347_v13 = vld [vmem:[%s10011_s3 + $0x32] sm:$0x3] }
 0x9f7   : > { %3801 = vmatmul.mubr.bf16.vlgmr.msra.gmra.mrb[44].mxu0 %v9157_v19 }
 0x9f8   : > { %8225 = vmatprep.mubr.msk.f32.mxu0 %vm8970_vm0, %v8969_v20  ;;  %8620 = vmatpush3.bf16.msra.mxu0 %v8619_v5  ;;  %v4989_v5 = vld [vmem:[#allocation2 + $0x3f0] sm:$0xff] }
 0x9f9   : > { %8621 = vmatprep.subr.bf16.mxu0 %v8971_v37 }
 0x9fc   : > { %8623 = vmatpush3.bf16.msra.mxu0 %v8622_v7 }
 0x9fd   : > { %8223 = vmatprep.subr.mxu0 %v8969_v20 }
 0xa00   : > { %8224 = vmatpush3.msk.msra.mxu0 %vm603_vm2, %v4202_v25  ;;  %v7351_v25 = vld [vmem:[%s10011_s3 + $0x34] sm:$0x3] }
 0xa01   : > { %8624 = vmatprep.subr.bf16.mxu0 %v8971_v37 }
 0xaaa   : > { %v3535_v23 = vpop.f32.mrb[42].mxu0 }
 0xaab   : > { %v3539_v24 = vadd.f32 %v3535_v23, %v3381_v61  ;;  %v8173_v26 = vpop.f32.mrb[43].mxu0  ;;  %v8616_v61 = vpack.c.bf16 %v3887_v58, %v3886_v56 }
 0xaad   : > { %v3547_v28 = vadd.f32 %v3545_v27, %v3539_v24  ;;  %v8625_v27 = vpack.c.bf16 %v4357_v22, %v4356_v21  ;;  %v5150_v21 = vld [vmem:[#allocation2 + $0x430] sm:$0xf]  ;;  %v8838_v22 = vld [vmem:[%s10009_s1 + $0x1c0] sm:$0xff]  }
 0xaaf   : > { %v3548_v29 = vmax.f32 %v3547_v28, 0.0  ;;  %v4358_v28 = vld [vmem:[#allocation2 + $0x358] sm:$0xff] }
 0xab1   : > { %v3549_v30 = vpack.c.bf16 %v3548_v29, %v3548_v29  ;;  %v4359_v29 = vld [vmem:[#allocation2 + $0x360] sm:$0xff] }
 0xab3   : > { %7270 = vmatmul.mubr.msk.bf16.vlgmr.msra.gmra.mrb[40].mxu1 %vm599_vm3, %v3549_v30 }
 0xab4   : > { %8176 = vmatprep.mubr.msk.f32.mxu1 %vm8970_vm0, %v8969_v20 }
 0xaca   : > { %v7678_v31 = vpop.f32.mrb[44].mxu0 }
 0xacb   : > { %v7679_v32 = vpop.f32.mrb[45].mxu0 }
 0xacc   : > { %v9588_v33 = vadd.f32 %v7679_v32, %v7678_v31  ;;  %v7681_v34 = vpop.f32.mrb[46].mxu0  ;;  %v8628_v32 = vpack.c.bf16 %v4359_v29, %v4358_v28 }
 0xacd   : > { %v7682_v36 = vpop.f32.mrb[47].mxu0 }
 0xace   : > { %8175 = vmatpush3.msra.mxu1 %v9588_v33  ;;  %v4360_v36 = vld [vmem:[#allocation2 + $0x368] sm:$0xf] }
 0xacf   : > { %8177 = vmatmul.mubr.msk.f32.vlgmr.msra.gmra.mrb[44].mxu1 %vm439_vm1, %v7319_v35  ;;  %8179 = vmatprep.subr.mxu1 %v8969_v20 }
 0xad0   : > { %8180 = vmatpush3.msra.mxu1 %v9588_v33  ;;  %8181 = vmatprep.mubr.msk.f32.mxu1 %vm8970_vm0, %v8969_v20 }
 0xad1   : > { %8606 = vmatprep.subr.bf16.mxu1 %v8971_v37 }
 0xad3   : > { %8182 = vmatmul.mubr.msk.f32.vlgmr.msra.gmra.mrb[46].mxu1 %vm439_vm1, %v7321_v38 }
 0xad4   : > { %8194 = vmatprep.mubr.msk.f32.mxu1 %vm8970_vm0, %v8969_v20  ;;  %8608 = vmatpush3.bf16.msra.mxu1 %v8607_v42  ;;  %v4830_v42 = vld [vmem:[#allocation2 + $0x3c0] sm:$0xff] }
 0xad5   : > { %8609 = vmatprep.subr.bf16.mxu1 %v8971_v37 }
 0xad8   : > { %8611 = vmatpush3.bf16.msra.mxu1 %v8610_v44  ;;  %v4672_v44 = vld [vmem:[#allocation2 + $0x398] sm:$0xff] }
 0xad9   : > { %8192 = vmatprep.subr.mxu1 %v8969_v20 }
 0xadc   : > { %8193 = vmatpush3.msk.msra.mxu1 %vm603_vm2, %v3969_v45  ;;  %v8643_v45 = vpack.c.bf16 %v4831_v43, %v4830_v42  ;;  %v8843_v43 = vld [vmem:[%s10009_s1 + $0x190] sm:$0xff]  }
 0xadd   : > { %8612 = vmatprep.subr.bf16.mxu1 %v8971_v37 }
 0xb86   : > { %v3624_v46 = vpop.f32.mrb[40].mxu1 }
 0xb87   : > { %v3633_v47 = vrot.slane %v3624_v46, 6  ;;  %v3626_v48 = vpop.f32.mrb[41].mxu1  ;;  %v4673_v46 = vld [vmem:[#allocation2 + $0x3a0] sm:$0xff] }
 0xb88   : > { %v3634_v49 = vrot.slane %v3626_v48, 6  ;;  %v3628_v50 = vpop.f32.mrb[42].mxu1  ;;  %v4833_v48 = vld [vmem:[#allocation2 + $0x3d8] sm:$0xff] }
 0xb89   : > { %3637 = vst [vmem:[%s9140_s15] sm:$0xc] %v3633_v47  ;;  %v3629_v57 = vpop.f32.mrb[43].mxu1  ;;  %v4832_v47 = vld [vmem:[#allocation2 + $0x3d0] sm:$0xff] }
 0xb8a   : > { %3638 = vst [vmem:[%s9140_s15 + $0x8] sm:$0xc] %v3634_v49  ;;  %v8637_v49 = vpack.c.bf16 %v4673_v46, %v4672_v44  ;;  %v8646_v50 = vpack.c.bf16 %v4833_v48, %v4832_v47  ;;  %v4674_v57 = vld [vmem:[#allocation2 + $0x3a8] sm:$0xff]  ;;  %v8845_v44 = vld [vmem:[%s10009_s1 + $0x198] sm:$0xff]   ;;  %v8847_v46 = vld [vmem:[%s10009_s1 + $0x1a0] sm:$0xff]  }
 0xb8b   : > { %v8640_v52 = vpack.c.bf16 %v4675_v51, %v4674_v57  ;;  %v8848_v47 = vld [vmem:[%s10009_s1 + $0x1e8] sm:$0xff]   ;;  %v8852_v57 = vld [vmem:[%s10009_s1 + $0x1f8] sm:$0xff]  }
 0xb8c   : > { %v8849_v48 = vld [vmem:[%s10009_s1 + $0x1a8] sm:$0xff]   ;;  %v8853_v51 = vld [vmem:[%s10009_s1 + $0x1b8] sm:$0xff]  }
 0xba2   : > { %v3879_v53 = vpop.f32.mrb[44].mxu1 }
 0xba3   : > { %v8178_v54 = vpop.f32.mrb[45].mxu1 }
 0xba4   : > { %v4676_v54 = vld [vmem:[#allocation2 + $0x3b8] sm:$0xf] }
 0xba6   : > { %v3960_v59 = vpop.f32.mrb[46].mxu1 }
 0xba7   : > { %v8183_v60 = vpop.f32.mrb[47].mxu1  ;;  %8195 = vmatmul.mubr.msk.f32.vlgmr.msra.gmra.mrb[48].mxu1 %vm599_vm3, %v3960_v59 }
 0xba8   : > { %8614 = vmatpush3.bf16.msra.mxu1 %v8613_v55  ;;  %8207 = vmatprep.mubr.msk.f32.mxu1 %vm8970_vm0, %v8969_v20 }
 0xba9   : > { %8615 = vmatprep.subr.bf16.mxu1 %v8971_v37 }
 0xbac   : > { %8617 = vmatpush3.bf16.msra.mxu1 %v8616_v61 }
 0xbad   : > { %8205 = vmatprep.subr.mxu1 %v8969_v20 }
 0xbb0   : > { %8206 = vmatpush3.msk.msra.mxu1 %vm603_vm2, %v3888_v62 }
 0xbb1   : > { %8208 = vmatmul.mubr.msk.f32.vlgmr.msra.gmra.mrb[50].mxu1 %vm599_vm3, %v3879_v53  ;;  %8210 = vmatprep.subr.mxu1 %v8969_v20  ;;  %v4834_v53 = vld [vmem:[#allocation2 + $0x3e0] sm:$0xf] }
 0xbb2   : > { %8211 = vmatpush3.msra.mxu1 %v9588_v33  ;;  %8212 = vmatprep.mubr.msk.f32.mxu1 %vm8970_vm0, %v8969_v20 }
 0xbb3   : > { %8228 = vmatprep.subr.mxu1 %v8969_v20 }
 0xbb5   : > { %8213 = vmatmul.mubr.msk.f32.vlgmr.msra.gmra.mrb[52].mxu1 %vm439_vm1, %v7327_v63 }
 0xbb6   : > { %8229 = vmatpush3.msra.mxu1 %v9588_v33  ;;  %8230 = vmatprep.mubr.msk.f32.mxu1 %vm8970_vm0, %v8969_v20 }
 0xbb7   : > { %8246 = vmatprep.subr.mxu1 %v8969_v20 }
 0xbb9   : > { %8231 = vmatmul.mubr.msk.f32.vlgmr.msra.gmra.mrb[54].mxu1 %vm439_vm1, %v7331_v0  ;;  %v5146_v0 = vld [vmem:[#allocation2 + $0x410] sm:$0xff] }
 0xbba   : > { %8247 = vmatpush3.msra.mxu1 %v9588_v33  ;;  %8248 = vmatprep.mubr.msk.f32.mxu1 %vm8970_vm0, %v8969_v20 }
 0xbbb   : > { %8630 = vmatprep.subr.bf16.mxu1 %v8971_v37 }
 0xbbd   : > { %8249 = vmatmul.mubr.msk.f32.vlgmr.msra.gmra.mrb[56].mxu1 %vm439_vm1, %v7335_v1  ;;  %v5147_v1 = vld [vmem:[#allocation2 + $0x418] sm:$0xff] }
 0xbbe   : > { %8261 = vmatprep.mubr.msk.f32.mxu1 %vm8970_vm0, %v8969_v20  ;;  %8632 = vmatpush3.bf16.msra.mxu1 %v8631_v10  ;;  %v8655_v8 = vpack.c.bf16 %v5147_v1, %v5146_v0  ;;  %v5148_v10 = vld [vmem:[#allocation2 + $0x420] sm:$0xff] }
 0xbbf   : > { %8633 = vmatprep.subr.bf16.mxu1 %v8971_v37 }
 0xbc2   : > { %8635 = vmatpush3.bf16.msra.mxu1 %v8634_v15  ;;  %v8649_v15 = vpack.c.bf16 %v4989_v5, %v4988_v4 }
 0xbc3   : > { %8259 = vmatprep.subr.mxu1 %v8969_v20 }
 0xbc6   : > { %8260 = vmatpush3.msk.msra.mxu1 %vm603_vm2, %v4518_v16  ;;  %v8658_v16 = vpack.c.bf16 %v5149_v11, %v5148_v10  ;;  %v7425_v11 = vld [vmem:[%s10011_s3 + $0x3a] sm:$0x3] }
 0xbc7   : > { %8282 = vmatprep.subr.mxu1 %v8969_v20 }
 0xc7a   : > { %v4042_v17 = vpop.f32.mrb[48].mxu1 }
 0xc7b   : > { %v8196_v18 = vpop.f32.mrb[49].mxu1 }
 0xc84   : > { %v4118_v23 = vpop.f32.mrb[50].mxu1 }
 0xc85   : > { %v4119_v24 = vadd.f32 %v4118_v23, %v4042_v17  ;;  %v8209_v26 = vpop.f32.mrb[51].mxu1  ;;  %v4991_v17 = vld [vmem:[#allocation2 + $0x400] sm:$0xff]  ;;  %v4992_v23 = vld [vmem:[#allocation2 + $0x408] sm:$0xf] }
 0xc86   : > { %v7453_v26 = vld [vmem:[%s10012_s4 + $0x6] sm:$0x3] }
 0xc88   : > { %v4193_v30 = vpop.f32.mrb[52].mxu1 }
 0xc89   : > { %v8214_v31 = vpop.f32.mrb[53].mxu1  ;;  %8226 = vmatmul.mubr.msk.f32.vlgmr.msra.gmra.mrb[48].mxu0 %vm599_vm3, %v4193_v30  ;;  %v8839_v30 = vld [vmem:[%s10009_s1 + $0x180] sm:$0xff]  }
 0xc8a   : > { %8626 = vmatpush3.bf16.msra.mxu0 %v8625_v27  ;;  %8243 = vmatprep.mubr.msk.f32.mxu0 %vm8970_vm0, %v8969_v20 }
 0xc8b   : > { %8627 = vmatprep.subr.bf16.mxu0 %v8971_v37 }
 0xc8c   : > { %v4351_v34 = vpop.f32.mrb[54].mxu1 }
 0xc8d   : > { %v8232_v35 = vpop.f32.mrb[55].mxu1 }
 0xc8e   : > { %8629 = vmatpush3.bf16.msra.mxu0 %v8628_v32 }
 0xc8f   : > { %8241 = vmatprep.subr.mxu0 %v8969_v20 }
 0xc90   : > { %v4509_v38 = vpop.f32.mrb[56].mxu1 }
 0xc91   : > { %v8250_v39 = vpop.f32.mrb[57].mxu1  ;;  %8262 = vmatmul.mubr.msk.f32.vlgmr.msra.gmra.mrb[58].mxu1 %vm599_vm3, %v4509_v38 }
 0xc92   : > { %8242 = vmatpush3.msk.msra.mxu0 %vm603_vm2, %v4360_v36  ;;  %8283 = vmatpush3.msra.mxu1 %v9588_v33 }
 0xc93   : > { %8244 = vmatmul.mubr.msk.f32.vlgmr.msra.gmra.mrb[50].mxu0 %vm599_vm3, %v4351_v34  ;;  %8264 = vmatprep.subr.mxu0 %v8969_v20  ;;  %v8840_v34 = vld [vmem:[%s10009_s1 + $0x1c8] sm:$0xff]  }
 0xc94   : > { %8265 = vmatpush3.msra.mxu0 %v9588_v33  ;;  %8284 = vmatprep.mubr.msk.f32.mxu1 %vm8970_vm0, %v8969_v20 }
 0xc95   : > { %8266 = vmatprep.mubr.msk.f32.mxu0 %vm8970_vm0, %v8969_v20  ;;  %8285 = vmatmul.mubr.msk.f32.vlgmr.msra.gmra.mrb[60].mxu1 %vm439_vm1, %v7343_v40  ;;  %v8841_v40 = vld [vmem:[%s10009_s1 + $0x188] sm:$0xff]  }
 0xc96   : > { %8642 = vmatprep.subr.bf16.mxu1 %v8971_v37  ;;  %8636 = vmatprep.subr.bf16.mxu0 %v8971_v37 }
 0xc97   : > { %8267 = vmatmul.mubr.msk.f32.vlgmr.msra.gmra.mrb[52].mxu0 %vm439_vm1, %v7339_v41  ;;  %8297 = vmatprep.mubr.msk.f32.mxu1 %vm8970_vm0, %v8969_v20  ;;  %v8842_v41 = vld [vmem:[%s10009_s1 + $0x1d0] sm:$0xff]  }
 0xc98   : > { %8279 = vmatprep.mubr.msk.f32.mxu0 %vm8970_vm0, %v8969_v20  ;;  %8644 = vmatpush3.bf16.msra.mxu1 %v8643_v45  ;;  %v8846_v45 = vld [vmem:[%s10009_s1 + $0x1e0] sm:$0xff]  }
 0xc99   : > { %8638 = vmatpush3.bf16.msra.mxu0 %v8637_v49  ;;  %8645 = vmatprep.subr.bf16.mxu1 %v8971_v37  ;;  %v8850_v49 = vld [vmem:[%s10009_s1 + $0x1f0] sm:$0xff]  }
 0xc9a   : > { %8639 = vmatprep.subr.bf16.mxu0 %v8971_v37 }
 0xc9c   : > { %8647 = vmatpush3.bf16.msra.mxu1 %v8646_v50  ;;  %v8851_v50 = vld [vmem:[%s10009_s1 + $0x1b0] sm:$0xff]  }
 0xc9d   : > { %8641 = vmatpush3.bf16.msra.mxu0 %v8640_v52  ;;  %8295 = vmatprep.subr.mxu1 %v8969_v20  ;;  %v8854_v52 = vld [vmem:[%s10013_s5 + $0x50] ss:$8 sps:$4 sm:$0xff]  }
 0xc9e   : > { %8277 = vmatprep.subr.mxu0 %v8969_v20 }
 0xca0   : > { %8296 = vmatpush3.msk.msra.mxu1 %vm603_vm2, %v4834_v53  ;;  %v8856_v53 = vld [vmem:[%s10013_s5 + $0x54] ss:$8 sps:$4 sm:$0xff]  }
 0xca1   : > { %8278 = vmatpush3.msk.msra.mxu0 %vm603_vm2, %v4676_v54  ;;  %8318 = vmatprep.subr.mxu1 %v8969_v20  ;;  %v8857_v54 = vld [vmem:[%s10013_s5 + $0x60] ss:$8 sps:$4 sm:$0xff]  }
 0xca2   : > { %8300 = vmatprep.subr.mxu0 %v8969_v20 }
 0xd5c   : > { %v4275_v55 = vpop.f32.mrb[48].mxu0 }
 0xd5d   : > { %v4279_v56 = vadd.f32 %v4275_v55, %v4119_v24  ;;  %v8227_v58 = vpop.f32.mrb[49].mxu0  ;;  %v7355_v24 = vld [vmem:[%s10012_s4 + $0x4] sm:$0x3]  ;;  %v7360_v55 = vld [vmem:[%s10013_s5 + $0x70] sm:$0x33] }
 0xd5e   : > { %5232 = vperm.xlu1 %8773, %v7355_v24   ;;  %v7365_v58 = vcombine.low %v7360_v55, %v7360_v55 }
 0xd62   : > { %6920 = vperm.xlu1 %8773, %v7453_v26   ;;  %v6046_v26 = vld [vmem:[#allocation2 + $0x4c0] sm:$0xff] }
 0xd64   : > { %v4591_v59 = vpop.f32.mrb[58].mxu1 }
 0xd65   : > { %v8263_v60 = vpop.f32.mrb[59].mxu1 }
 0xd66   : > { %v4433_v61 = vpop.f32.mrb[50].mxu0 }
 0xd67   : > { %v4437_v62 = vadd.f32 %v4433_v61, %v4279_v56  ;;  %v8245_v63 = vpop.f32.mrb[51].mxu0  ;;  %v7366_v56 = vcombine.high %v7360_v55, %v7360_v55  ;;  %v5886_v55 = vld [vmem:[#allocation2 + $0x488] sm:$0xff] }
 0xd68   : > { %v4825_v2 = vpop.f32.mrb[60].mxu1 }
 0xd69   : > { %v8286_v3 = vpop.f32.mrb[61].mxu1  ;;  %8298 = vmatmul.mubr.msk.f32.vlgmr.msra.gmra.mrb[62].mxu1 %vm599_vm3, %v4825_v2  ;;  %v4595_v6 = vadd.f32 %v4591_v59, %v4437_v62  ;;  %v5273_v59 = vsel %vm1901_vm4, %v7365_v58, 0  ;;  %v6362_v58 = vld [vmem:[#allocation2 + $0x510] sm:$0xff] }
 0xd6a   : > { %v4667_v7 = vpop.f32.mrb[52].mxu0  ;;  %8319 = vmatpush3.msra.mxu1 %v9588_v33  ;;  %8320 = vmatprep.mubr.msk.f32.mxu1 %vm8970_vm0, %v8969_v20 }
 0xd6b   : > { %8280 = vmatmul.mubr.msk.f32.vlgmr.msra.gmra.mrb[54].mxu0 %vm599_vm3, %v4667_v7  ;;  %v8268_v9 = vpop.f32.mrb[53].mxu0  ;;  %8654 = vmatprep.subr.bf16.mxu1 %v8971_v37 }
 0xd6c   : > { %8301 = vmatpush3.msra.mxu0 %v9588_v33  ;;  %8302 = vmatprep.mubr.msk.f32.mxu0 %vm8970_vm0, %v8969_v20  ;;  %v4990_v33 = vld [vmem:[#allocation2 + $0x3f8] sm:$0xff]  ;;  %v7417_v9 = vld [vmem:[%s10011_s3 + $0x36] sm:$0x3] }
 0xd6d   : > { %8321 = vmatmul.mubr.msk.f32.vlgmr.msra.gmra.mrb[64].mxu1 %vm439_vm1, %v7351_v25  ;;  %8648 = vmatprep.subr.bf16.mxu0 %v8971_v37  ;;  %v8652_v18 = vpack.c.bf16 %v4991_v17, %v4990_v33  ;;  %v5654_v33 = vld [vmem:[#allocation2 + $0x468] sm:$0xff]  ;;  %v6044_v17 = vld [vmem:[#allocation2 + $0x4b0] sm:$0xff] }
 0xd6e   : > { %8656 = vmatpush3.bf16.msra.mxu1 %v8655_v8  ;;  %8333 = vmatprep.mubr.msk.f32.mxu1 %vm8970_vm0, %v8969_v20 }
 0xd6f   : > { %8303 = vmatmul.mubr.msk.f32.vlgmr.msra.gmra.mrb[56].mxu0 %vm439_vm1, %v7347_v13  ;;  %8657 = vmatprep.subr.bf16.mxu1 %v8971_v37  ;;  %v7419_v13 = vld [vmem:[%s10011_s3 + $0x38] sm:$0x3] }
 0xd70   : > { %8650 = vmatpush3.bf16.msra.mxu0 %v8649_v15  ;;  %8315 = vmatprep.mubr.msk.f32.mxu0 %vm8970_vm0, %v8969_v20  ;;  %v7429_v15 = vld [vmem:[%s10011_s3 + $0x3c] sm:$0x3] }
 0xd71   : > { %8651 = vmatprep.subr.bf16.mxu0 %v8971_v37 }
 0xd72   : > { %8659 = vmatpush3.bf16.msra.mxu1 %v8658_v16  ;;  %v5653_v16 = vld [vmem:[#allocation2 + $0x460] sm:$0xff] }
 0xd73   : > { %8331 = vmatprep.subr.mxu1 %v8969_v20 }
 0xd74   : > { %8653 = vmatpush3.bf16.msra.mxu0 %v8652_v18  ;;  %v8661_v18 = vpack.c.bf16 %v5654_v33, %v5653_v16 }
 0xd75   : > { %8313 = vmatprep.subr.mxu0 %v8969_v20 }
 0xd76   : > { %8332 = vmatpush3.msk.msra.mxu1 %vm603_vm2, %v5150_v21  ;;  %v6045_v21 = vld [vmem:[#allocation2 + $0x4b8] sm:$0xff] }
 0xd77   : > { %7756 = vmatprep.subr.bf16.mxu1 %v8838_v22  ;;  %v5655_v22 = vld [vmem:[#allocation2 + $0x470] sm:$0xff]  ;;  %v8679_v24 = vpack.c.bf16 %v6045_v21, %v6044_v17 }
 0xd78   : > { %8314 = vmatpush3.msk.msra.mxu0 %vm603_vm2, %v4992_v23  ;;  %v5656_v23 = vld [vmem:[#allocation2 + $0x478] sm:$0xff]  ;;  %v6676_v17 = vld [vmem:[#allocation2 + $0x550] sm:$0xff] }
 0xd79   : > { %5278 = vmatprep.subr.bf16.mxu0 %v8856_v53 }
 0xddd   : > { %v5233_v1 = vpop.permute.xlu1 %5232 }
 0xe3c   : > { %v4907_v27 = vpop.f32.mrb[62].mxu1 }
 0xe3d   : > { %v8299_v28 = vpop.f32.mrb[63].mxu1 }
 0xe3e   : > { %v4749_v29 = vpop.f32.mrb[54].mxu0  ;;  %v8664_v28 = vpack.c.bf16 %v5656_v23, %v5655_v22  ;;  %v7445_v23 = vld [vmem:[%s10011_s3 + $0x44] sm:$0x3] }
 0xe3f   : > { %v4753_v31 = vadd.f32 %v4749_v29, %v4595_v6  ;;  %v8281_v32 = vpop.f32.mrb[55].mxu0 }
 0xe40   : > { %v5141_v35 = vpop.f32.mrb[64].mxu1 }
 0xe41   : > { %v8322_v36 = vpop.f32.mrb[65].mxu1  ;;  %8334 = vmatmul.mubr.msk.f32.vlgmr.msra.gmra.mrb[66].mxu1 %vm599_vm3, %v5141_v35  ;;  %v4911_v38 = vadd.f32 %v4907_v27, %v4753_v31  ;;  %v6047_v27 = vld [vmem:[#allocation2 + $0x4c8] sm:$0xff]  ;;  %v6048_v31 = vld [vmem:[#allocation2 + $0x4d0] sm:$0xf] }
 0xe42   : > { %v4983_v39 = vpop.f32.mrb[56].mxu0  ;;  %7757 = vmatpush3.bf16.msra.mxu1 %v8839_v30  ;;  %5488 = vmatprep.mubr.bf16.mxu1 %v9138_v14  ;;  %v8844_v14 = vld [vmem:[%s10009_s1 + $0x1d8] sm:$0xff]   ;;  %v8682_v29 = vpack.c.bf16 %v6047_v27, %v6046_v26  ;;  %v5657_v30 = vld [vmem:[#allocation2 + $0x480] sm:$0xf] }
 0xe43   : > { %8316 = vmatmul.mubr.msk.f32.vlgmr.msra.gmra.mrb[58].mxu0 %vm599_vm3, %v4983_v39  ;;  %7758 = vmatprep.subr.bf16.mxu1 %v8840_v34  ;;  %v8304_v42 = vpop.f32.mrb[57].mxu0 }
 0xe44   : > { %5310 = vmatprep.mubr.bf16.mxu0 %v8972_v12  ;;  %5279 = vmatpush1.bf16.msra.mxu0 %v8854_v52 }
 0xe46   : > { %7759 = vmatpush3.bf16.msra.mxu1 %v8841_v40  ;;  %v5572_v40 = vld [vmem:[#allocation2 + $0x438] sm:$0xff] }
 0xe47   : > { %7760 = vmatprep.subr.bf16.mxu1 %v8842_v41  ;;  %v5573_v41 = vld [vmem:[#allocation2 + $0x440] sm:$0xff] }
 0xe4a   : > { %7761 = vmatpush3.bf16.msra.mxu1 %v8843_v43 }
 0xe4b   : > { %7762 = vmatprep.subr.bf16.mxu1 %v8844_v14 }
 0xe4e   : > { %7763 = vmatpush3.bf16.msra.mxu1 %v8845_v44 }
 0xe4f   : > { %7764 = vmatprep.subr.bf16.mxu1 %v8846_v45  ;;  %v8667_v45 = vpack.c.bf16 %v5573_v41, %v5572_v40  ;;  %v6520_v41 = vld [vmem:[#allocation2 + $0x538] sm:$0xff] }
 0xe52   : > { %7765 = vmatpush3.bf16.msra.mxu1 %v8847_v46  ;;  %v5574_v46 = vld [vmem:[#allocation2 + $0x448] sm:$0xff] }
 0xe53   : > { %7766 = vmatprep.subr.bf16.mxu1 %v8848_v47  ;;  %v5575_v47 = vld [vmem:[#allocation2 + $0x450] sm:$0xff] }
 0xe54   : > { %v8670_v52 = vpack.c.bf16 %v5575_v47, %v5574_v46  ;;  %v6522_v46 = vld [vmem:[#allocation2 + $0x548] sm:$0xf]  ;;  %v6680_v47 = vld [vmem:[#allocation2 + $0x570] sm:$0xf] }
 0xe56   : > { %7767 = vmatpush3.bf16.msra.mxu1 %v8849_v48 }
 0xe57   : > { %7768 = vmatprep.subr.bf16.mxu1 %v8850_v49  ;;  %v6360_v49 = vld [vmem:[#allocation2 + $0x500] sm:$0xff] }
 0xe5a   : > { %7769 = vmatpush3.bf16.msra.mxu1 %v8851_v50  ;;  %v6361_v50 = vld [vmem:[#allocation2 + $0x508] sm:$0xff] }
 0xe5b   : > { %7770 = vmatprep.subr.bf16.mxu1 %v8852_v57 }
 0xe5e   : > { %7771 = vmatpush3.bf16.msra.mxu1 %v8853_v51 }
 0xe5f   : > { %8372 = vmatprep.subr.mxu1 %v8969_v20 }
 0xe61   : > { %5489 = vmatmul.mubr.bf16.vlgmr.msra.gmra.mrb[68].mxu1 %v9157_v19  ;;  %v8859_v19 = vld [vmem:[%s10013_s5 + $0x64] ss:$8 sps:$4 sm:$0xff]  }
 0xe62   : > { %8374 = vmatprep.mubr.msk.f32.mxu1 %vm8970_vm0, %v8969_v20  ;;  %5280 = vmatprep.subr.bf16.mxu0 %v8859_v19  ;;  %v8691_v19 = vpack.c.bf16 %v6361_v50, %v6360_v49 }
 0xe63   : > { %5281 = vmatpush1.bf16.msra.mxu0 %v8857_v54  ;;  %v7437_v54 = vld [vmem:[%s10011_s3 + $0x40] sm:$0x3] }
 0xe64   : > { %7367 = vmatprep.subr.msk.bf16.mxu0 %vm1901_vm4, %v7366_v56  ;;  %v5887_v56 = vld [vmem:[#allocation2 + $0x490] sm:$0xff] }
 0xe67   : > { %5283 = vmatpush1.bf16.msra.mxu0 %v5273_v59  ;;  %v6363_v59 = vld [vmem:[#allocation2 + $0x518] sm:$0xff] }
 0xe68   : > { %8336 = vmatprep.subr.mxu0 %v8969_v20 }
 0xf14   : > { %v5223_v60 = vpop.f32.mrb[66].mxu1 }
 0xf15   : > { %v8335_v61 = vpop.f32.mrb[67].mxu1 }
 0xf16   : > { %v5065_v62 = vpop.f32.mrb[58].mxu0  ;;  %v8673_v61 = vpack.c.bf16 %v5887_v56, %v5886_v55  ;;  %v6835_v55 = vld [vmem:[#allocation2 + $0x580] sm:$0xff] }
 0xf17   : > { %v5069_v63 = vadd.f32 %v5065_v62, %v4911_v38  ;;  %v8317_v0 = vpop.f32.mrb[59].mxu0  ;;  %v5888_v62 = vld [vmem:[#allocation2 + $0x498] sm:$0xff] }
 0xf18   : > { %v8694_v0 = vpack.c.bf16 %v6363_v59, %v6362_v58  ;;  %v7449_v59 = vld [vmem:[%s10011_s3 + $0x46] sm:$0x3] }
 0xf19   : > { %v5227_v2 = vadd.f32 %v5223_v60, %v5069_v63  ;;  %v5576_v60 = vld [vmem:[#allocation2 + $0x458] sm:$0xf]  ;;  %v5889_v63 = vld [vmem:[#allocation2 + $0x4a0] sm:$0xff] }
 0xf1b   : > { %v5235_v3 = vadd.f32 %v5233_v1, %v5227_v2  ;;  %v8676_v1 = vpack.c.bf16 %v5889_v63, %v5888_v62  ;;  %v5890_v2 = vld [vmem:[#allocation2 + $0x4a8] sm:$0xf]  ;;  %v6838_v62 = vld [vmem:[#allocation2 + $0x598] sm:$0xf] }
 0xf1c   : > { %v8862_v63 = vld [vmem:[%s10013_s5 + $0x78] ss:$8 sps:$4 sm:$0xff]  }
 0xf1d   : > { %v5236_v4 = vmax.f32 %v5235_v3, 0.0  ;;  %v7433_v3 = vld [vmem:[%s10011_s3 + $0x3e] sm:$0x3] }
 0xf1f   : > { %v5237_v5 = vpack.c.bf16 %v5236_v4, %v5236_v4  ;;  %v6364_v4 = vld [vmem:[#allocation2 + $0x520] sm:$0xf] }
 0xf21   : > { %7368 = vmatmul.mubr.msk.bf16.vlgmr.msra.gmra.mrb[60].mxu0 %vm599_vm3, %v5237_v5  ;;  %v6202_v5 = vld [vmem:[#allocation2 + $0x4d8] sm:$0xff] }
 0xf22   : > { %8338 = vmatprep.mubr.msk.f32.mxu0 %vm8970_vm0, %v8969_v20 }
 0xf34   : > { %v7772_v6 = vpop.f32.mrb[68].mxu1 }
 0xf35   : > { %v7773_v7 = vpop.f32.mrb[69].mxu1 }
 0xf36   : > { %v9802_v25 = vadd.f32 %v7773_v7, %v7772_v6  ;;  %v7775_v8 = vpop.f32.mrb[70].mxu1  ;;  %v6203_v6 = vld [vmem:[#allocation2 + $0x4e0] sm:$0xff]  ;;  %v6204_v7 = vld [vmem:[#allocation2 + $0x4e8] sm:$0xff] }
 0xf37   : > { %v7776_v10 = vpop.f32.mrb[71].mxu1  ;;  %v8685_v8 = vpack.c.bf16 %v6203_v6, %v6202_v5 }
 0xf38   : > { %8337 = vmatpush3.msra.mxu0 %v9802_v25  ;;  %8373 = vmatpush3.msra.mxu1 %v9802_v25 }
 0xf39   : > { %8339 = vmatmul.mubr.msk.f32.vlgmr.msra.gmra.mrb[64].mxu0 %vm439_vm1, %v7417_v9  ;;  %8341 = vmatprep.subr.mxu0 %v8969_v20  ;;  %v6205_v9 = vld [vmem:[#allocation2 + $0x4f0] sm:$0xff] }
 0xf3a   : > { %8375 = vmatmul.mubr.msk.f32.vlgmr.msra.gmra.mrb[72].mxu1 %vm439_vm1, %v7425_v11  ;;  %8390 = vmatprep.subr.mxu1 %v8969_v20  ;;  %v8688_v10 = vpack.c.bf16 %v6205_v9, %v6204_v7  ;;  %v6206_v11 = vld [vmem:[#allocation2 + $0x4f8] sm:$0xf]  ;;  %v8867_v7 = vld [vmem:[%s10013_s5 + $0x8c] ss:$8 sps:$4 sm:$0xff]  }
 0xf3b   : > { %8342 = vmatpush3.msra.mxu0 %v9802_v25  ;;  %8391 = vmatpush3.msra.mxu1 %v9802_v25  ;;  %v7458_v9 = vld [vmem:[%s10013_s5 + $0x98] sm:$0x33] }
 0xf3c   : > { %8343 = vmatprep.mubr.msk.f32.mxu0 %vm8970_vm0, %v8969_v20  ;;  %8392 = vmatprep.mubr.msk.f32.mxu1 %vm8970_vm0, %v8969_v20 }
 0xf3d   : > { %8344 = vmatmul.mubr.msk.f32.vlgmr.msra.gmra.mrb[66].mxu0 %vm439_vm1, %v7419_v13  ;;  %8660 = vmatprep.subr.bf16.mxu0 %v8971_v37 }
 0xf3e   : > { %8393 = vmatmul.mubr.msk.f32.vlgmr.msra.gmra.mrb[74].mxu1 %vm439_vm1, %v7429_v15  ;;  %8678 = vmatprep.subr.bf16.mxu1 %v8971_v37 }
 0xf3f   : > { %8356 = vmatprep.mubr.msk.f32.mxu0 %vm8970_vm0, %v8969_v20  ;;  %8405 = vmatprep.mubr.msk.f32.mxu1 %vm8970_vm0, %v8969_v20 }
 0xf40   : > { %8662 = vmatpush3.bf16.msra.mxu0 %v8661_v18  ;;  %8680 = vmatpush3.bf16.msra.mxu1 %v8679_v24  ;;  %v6677_v18 = vld [vmem:[#allocation2 + $0x558] sm:$0xff] }
 0xf41   : > { %8663 = vmatprep.subr.bf16.mxu0 %v8971_v37  ;;  %8681 = vmatprep.subr.bf16.mxu1 %v8971_v37  ;;  %v8703_v24 = vpack.c.bf16 %v6677_v18, %v6676_v17  ;;  %v6921_v17 = vpop.permute.xlu1 %6920 }
 0xf44   : > { %8665 = vmatpush3.bf16.msra.mxu0 %v8664_v28  ;;  %8683 = vmatpush3.bf16.msra.mxu1 %v8682_v29 }
 0xf45   : > { %8354 = vmatprep.subr.mxu0 %v8969_v20  ;;  %8403 = vmatprep.subr.mxu1 %v8969_v20 }
 0xf48   : > { %8355 = vmatpush3.msk.msra.mxu0 %vm603_vm2, %v5657_v30  ;;  %8404 = vmatpush3.msk.msra.mxu1 %vm603_vm2, %v6048_v31 }
 0xf49   : > { %8666 = vmatprep.subr.bf16.mxu0 %v8971_v37  ;;  %8426 = vmatprep.subr.mxu1 %v8969_v20 }
 0xff4   : > { %v5312_v32 = vpop.f32.mrb[60].mxu0 }
 0xff5   : > { %v5321_v34 = vrot.slane %v5312_v32, 4  ;;  %v5314_v35 = vpop.f32.mrb[61].mxu0  ;;  %v6518_v32 = vld [vmem:[#allocation2 + $0x528] sm:$0xff] }
 0xff6   : > { %v5322_v36 = vrot.slane %v5314_v35, 4  ;;  %v5316_v38 = vpop.f32.mrb[62].mxu0 }
 0xff7   : > { %5325 = vst [vmem:[%s9140_s15] sm:$0x30] %v5321_v34  ;;  %v5317_v39 = vpop.f32.mrb[63].mxu0  ;;  %v6519_v34 = vld [vmem:[#allocation2 + $0x530] sm:$0xff] }
 0xff8   : > { %5326 = vst [vmem:[%s9140_s15 + $0x8] sm:$0x30] %v5322_v36  ;;  %v7441_v39 = vld [vmem:[%s10011_s3 + $0x42] sm:$0x3]  ;;  %v8697_v40 = vpack.c.bf16 %v6519_v34, %v6518_v32 }
0x100c   : > { %v5567_v42 = vpop.f32.mrb[64].mxu0 }
0x100d   : > { %v5881_v43 = vpop.f32.mrb[72].mxu1  ;;  %v8340_v14 = vpop.f32.mrb[65].mxu0 }
0x100e   : > { %v8376_v44 = vpop.f32.mrb[73].mxu1  ;;  %v6678_v14 = vld [vmem:[#allocation2 + $0x560] sm:$0xff] }
0x100f   : > { %v6679_v44 = vld [vmem:[#allocation2 + $0x568] sm:$0xff] }
0x1010   : > { %v5648_v48 = vpop.f32.mrb[66].mxu0 }
0x1011   : > { %v6039_v57 = vpop.f32.mrb[74].mxu1  ;;  %8357 = vmatmul.mubr.msk.f32.vlgmr.msra.gmra.mrb[68].mxu0 %vm599_vm3, %v5648_v48  ;;  %v8345_v51 = vpop.f32.mrb[67].mxu0 }
0x1012   : > { %8668 = vmatpush3.bf16.msra.mxu0 %v8667_v45  ;;  %8406 = vmatmul.mubr.msk.f32.vlgmr.msra.gmra.mrb[76].mxu1 %vm599_vm3, %v6039_v57  ;;  %v8394_v53 = vpop.f32.mrb[75].mxu1  ;;  %v8706_v45 = vpack.c.bf16 %v6679_v44, %v6678_v14 }
0x1013   : > { %8427 = vmatpush3.msra.mxu1 %v9802_v25  ;;  %8669 = vmatprep.subr.bf16.mxu0 %v8971_v37 }
0x1014   : > { %8428 = vmatprep.mubr.msk.f32.mxu1 %vm8970_vm0, %v8969_v20  ;;  %8369 = vmatprep.mubr.msk.f32.mxu0 %vm8970_vm0, %v8969_v20 }
0x1015   : > { %8690 = vmatprep.subr.bf16.mxu1 %v8971_v37 }
0x1016   : > { %8671 = vmatpush3.bf16.msra.mxu0 %v8670_v52  ;;  %8429 = vmatmul.mubr.msk.f32.vlgmr.msra.gmra.mrb[78].mxu1 %vm439_vm1, %v7437_v54 }
0x1017   : > { %8367 = vmatprep.subr.mxu0 %v8969_v20  ;;  %8692 = vmatpush3.bf16.msra.mxu1 %v8691_v19  ;;  %v6834_v19 = vld [vmem:[#allocation2 + $0x578] sm:$0xff] }
0x1018   : > { %8693 = vmatprep.subr.bf16.mxu1 %v8971_v37  ;;  %8441 = vmatprep.mubr.msk.f32.mxu1 %vm8970_vm0, %v8969_v20 }
0x101a   : > { %8368 = vmatpush3.msk.msra.mxu0 %vm603_vm2, %v5576_v60  ;;  %v6836_v60 = vld [vmem:[#allocation2 + $0x588] sm:$0xff] }
0x101b   : > { %8370 = vmatmul.mubr.msk.f32.vlgmr.msra.gmra.mrb[70].mxu0 %vm599_vm3, %v5567_v42  ;;  %8672 = vmatprep.subr.bf16.mxu0 %v8971_v37  ;;  %v6521_v42 = vld [vmem:[#allocation2 + $0x540] sm:$0xff] }
0x101c   : > { %8674 = vmatpush3.bf16.msra.mxu0 %v8673_v61  ;;  %8387 = vmatprep.mubr.msk.f32.mxu0 %vm8970_vm0, %v8969_v20 }
0x101d   : > { %8675 = vmatprep.subr.bf16.mxu0 %v8971_v37  ;;  %8695 = vmatpush3.bf16.msra.mxu1 %v8694_v0  ;;  %v8864_v0 = vld [vmem:[%s10013_s5 + $0x7c] ss:$8 sps:$4 sm:$0xff]  }
0x101e   : > { %8439 = vmatprep.subr.mxu1 %v8969_v20 }
0x1020   : > { %8677 = vmatpush3.bf16.msra.mxu0 %v8676_v1 }
0x1021   : > { %8385 = vmatprep.subr.mxu0 %v8969_v20  ;;  %8440 = vmatpush3.msk.msra.mxu1 %vm603_vm2, %v6364_v4 }
0x1022   : > { %8462 = vmatprep.subr.mxu1 %v8969_v20 }
0x1024   : > { %8386 = vmatpush3.msk.msra.mxu0 %vm603_vm2, %v5890_v2 }
0x1025   : > { %8388 = vmatmul.mubr.msk.f32.vlgmr.msra.gmra.mrb[72].mxu0 %vm599_vm3, %v5881_v43  ;;  %8408 = vmatprep.subr.mxu0 %v8969_v20  ;;  %v8700_v43 = vpack.c.bf16 %v6521_v42, %v6520_v41 }
0x1026   : > { %8409 = vmatpush3.msra.mxu0 %v9802_v25  ;;  %8410 = vmatprep.mubr.msk.f32.mxu0 %vm8970_vm0, %v8969_v20 }
0x1027   : > { %8684 = vmatprep.subr.bf16.mxu0 %v8971_v37 }
0x1029   : > { %8411 = vmatmul.mubr.msk.f32.vlgmr.msra.gmra.mrb[74].mxu0 %vm439_vm1, %v7433_v3 }
0x102a   : > { %8423 = vmatprep.mubr.msk.f32.mxu0 %vm8970_vm0, %v8969_v20  ;;  %8686 = vmatpush3.bf16.msra.mxu0 %v8685_v8  ;;  %v8865_v8 = vld [vmem:[%s10013_s5 + $0x88] ss:$8 sps:$4 sm:$0xff]  }
0x102b   : > { %8687 = vmatprep.subr.bf16.mxu0 %v8971_v37 }
0x102e   : > { %8689 = vmatpush3.bf16.msra.mxu0 %v8688_v10  ;;  %v7464_v10 = vcombine.high %v7458_v9, %v7458_v9 }
0x102f   : > { %8421 = vmatprep.subr.mxu0 %v8969_v20 }
0x1032   : > { %8422 = vmatpush3.msk.msra.mxu0 %vm603_vm2, %v6206_v11  ;;  %v7463_v11 = vcombine.low %v7458_v9, %v7458_v9 }
0x1033   : > { %8444 = vmatprep.subr.mxu0 %v8969_v20 }
0x10e4   : > { %v5730_v13 = vpop.f32.mrb[68].mxu0 }
0x10e5   : > { %v6121_v15 = vpop.f32.mrb[76].mxu1  ;;  %v8358_v16 = vpop.f32.mrb[69].mxu0 }
0x10e6   : > { %v8407_v33 = vpop.f32.mrb[77].mxu1 }
0x10e9   : > { %v6355_v21 = vpop.f32.mrb[78].mxu1 }
0x10ea   : > { %8442 = vmatmul.mubr.msk.f32.vlgmr.msra.gmra.mrb[80].mxu1 %vm599_vm3, %v6355_v21  ;;  %v8430_v22 = vpop.f32.mrb[79].mxu1 }
0x10eb   : > { %8463 = vmatpush3.msra.mxu1 %v9802_v25  ;;  %8464 = vmatprep.mubr.msk.f32.mxu1 %vm8970_vm0, %v8969_v20 }
0x10ec   : > { %8702 = vmatprep.subr.bf16.mxu1 %v8971_v37 }
0x10ee   : > { %v5806_v26 = vpop.f32.mrb[70].mxu0  ;;  %8465 = vmatmul.mubr.msk.f32.vlgmr.msra.gmra.mrb[82].mxu1 %vm439_vm1, %v7445_v23 }
0x10ef   : > { %v5807_v27 = vadd.f32 %v5806_v26, %v5730_v13  ;;  %v8371_v28 = vpop.f32.mrb[71].mxu0  ;;  %8704 = vmatpush3.bf16.msra.mxu1 %v8703_v24  ;;  %8477 = vmatprep.mubr.msk.f32.mxu1 %vm8970_vm0, %v8969_v20  ;;  %v6961_v13 = vsel %vm1901_vm4, %v7463_v11, 0 }
0x10f0   : > { %8705 = vmatprep.subr.bf16.mxu1 %v8971_v37 }
0x10f3   : > { %8707 = vmatpush3.bf16.msra.mxu1 %v8706_v45 }
0x10f4   : > { %8475 = vmatprep.subr.mxu1 %v8969_v20 }
0x10f7   : > { %8476 = vmatpush3.msk.msra.mxu1 %vm603_vm2, %v6680_v47 }
0x10f8   : > { %v5963_v29 = vpop.f32.mrb[72].mxu0  ;;  %6966 = vmatprep.subr.bf16.mxu1 %v8864_v0 }
0x10f9   : > { %v5967_v30 = vadd.f32 %v5963_v29, %v5807_v27  ;;  %v8389_v31 = vpop.f32.mrb[73].mxu0 }
0x10fb   : > { %v6125_v35 = vadd.f32 %v6121_v15, %v5967_v30 }
0x10fc   : > { %v6197_v36 = vpop.f32.mrb[74].mxu0 }
0x10fd   : > { %8424 = vmatmul.mubr.msk.f32.vlgmr.msra.gmra.mrb[76].mxu0 %vm599_vm3, %v6197_v36  ;;  %v8412_v38 = vpop.f32.mrb[75].mxu0 }
0x10fe   : > { %8445 = vmatpush3.msra.mxu0 %v9802_v25  ;;  %8446 = vmatprep.mubr.msk.f32.mxu0 %vm8970_vm0, %v8969_v20 }
0x10ff   : > { %8696 = vmatprep.subr.bf16.mxu0 %v8971_v37 }
0x1101   : > { %8447 = vmatmul.mubr.msk.f32.vlgmr.msra.gmra.mrb[78].mxu0 %vm439_vm1, %v7441_v39 }
0x1102   : > { %8698 = vmatpush3.bf16.msra.mxu0 %v8697_v40  ;;  %8459 = vmatprep.mubr.msk.f32.mxu0 %vm8970_vm0, %v8969_v20 }
0x1103   : > { %8699 = vmatprep.subr.bf16.mxu0 %v8971_v37 }
0x1106   : > { %8701 = vmatpush3.bf16.msra.mxu0 %v8700_v43 }
0x1107   : > { %8457 = vmatprep.subr.mxu0 %v8969_v20 }
0x110a   : > { %8458 = vmatpush3.msk.msra.mxu0 %vm603_vm2, %v6522_v46 }
0x110b   : > { %8480 = vmatprep.subr.mxu0 %v8969_v20 }
0x11bd   : > { %v6437_v48 = vpop.f32.mrb[80].mxu1 }
0x11be   : > { %v8443_v49 = vpop.f32.mrb[81].mxu1 }
0x11c1   : > { %v6671_v50 = vpop.f32.mrb[82].mxu1 }
0x11c2   : > { %8478 = vmatmul.mubr.msk.f32.vlgmr.msra.gmra.mrb[84].mxu1 %vm599_vm3, %v6671_v50  ;;  %v8466_v57 = vpop.f32.mrb[83].mxu1 }
0x11c3   : > { %6998 = vmatprep.mubr.bf16.mxu1 %v8972_v12  ;;  %v8709_v12 = vpack.c.bf16 %v6835_v55, %v6834_v19  ;;  %6967 = vmatpush1.bf16.msra.mxu1 %v8862_v63 }
0x11c4   : > { %6968 = vmatprep.subr.bf16.mxu1 %v8867_v7 }
0x11c7   : > { %6969 = vmatpush1.bf16.msra.mxu1 %v8865_v8 }
0x11c8   : > { %7465 = vmatprep.subr.msk.bf16.mxu1 %vm1901_vm4, %v7464_v10 }
0x11cb   : > { %6971 = vmatpush1.bf16.msra.mxu1 %v6961_v13 }
0x11d0   : > { %v6279_v51 = vpop.f32.mrb[76].mxu0 }
0x11d1   : > { %v6283_v52 = vadd.f32 %v6279_v51, %v6125_v35  ;;  %v8425_v53 = vpop.f32.mrb[77].mxu0 }
0x11d3   : > { %v6441_v54 = vadd.f32 %v6437_v48, %v6283_v52 }
0x11d4   : > { %v6513_v56 = vpop.f32.mrb[78].mxu0 }
0x11d5   : > { %8460 = vmatmul.mubr.msk.f32.vlgmr.msra.gmra.mrb[80].mxu0 %vm599_vm3, %v6513_v56  ;;  %v8448_v58 = vpop.f32.mrb[79].mxu0 }
0x11d6   : > { %8481 = vmatpush3.msra.mxu0 %v9802_v25  ;;  %8482 = vmatprep.mubr.msk.f32.mxu0 %vm8970_vm0, %v8969_v20  ;;  %v6837_v25 = vld [vmem:[#allocation2 + $0x590] sm:$0xff] }
0x11d7   : > { %8708 = vmatprep.subr.bf16.mxu0 %v8971_v37  ;;  %v8712_v61 = vpack.c.bf16 %v6837_v25, %v6836_v60 }
0x11d9   : > { %8483 = vmatmul.mubr.msk.f32.vlgmr.msra.gmra.mrb[82].mxu0 %vm439_vm1, %v7449_v59 }
0x11da   : > { %8710 = vmatpush3.bf16.msra.mxu0 %v8709_v12  ;;  %8495 = vmatprep.mubr.msk.f32.mxu0 %vm8970_vm0, %v8969_v20 }
0x11db   : > { %8711 = vmatprep.subr.bf16.mxu0 %v8971_v37 }
0x11de   : > { %8713 = vmatpush3.bf16.msra.mxu0 %v8712_v61 }
0x11df   : > { %8493 = vmatprep.subr.mxu0 %v8969_v20 }
0x11e2   : > { %8494 = vmatpush3.msk.msra.mxu0 %vm603_vm2, %v6838_v62 }
0x1295   : > { %v6753_v37 = vpop.f32.mrb[84].mxu1 }
0x1296   : > { %v8479_v1 = vpop.f32.mrb[85].mxu1 }
0x12a8   : > { %v6595_v2 = vpop.f32.mrb[80].mxu0 }
0x12a9   : > { %v6599_v3 = vadd.f32 %v6595_v2, %v6441_v54  ;;  %v8461_v4 = vpop.f32.mrb[81].mxu0 }
0x12ab   : > { %v6757_v5 = vadd.f32 %v6753_v37, %v6599_v3 }
0x12ac   : > { %v6829_v20 = vpop.f32.mrb[82].mxu0 }
0x12ad   : > { %8496 = vmatmul.mubr.msk.f32.vlgmr.msra.gmra.mrb[84].mxu0 %vm599_vm3, %v6829_v20  ;;  %v8484_v6 = vpop.f32.mrb[83].mxu0 }
0x1380   : > { %v6911_v15 = vpop.f32.mrb[84].mxu0 }
0x1381   : > { %v6915_v16 = vadd.f32 %v6911_v15, %v6757_v5  ;;  %v8497_v33 = vpop.f32.mrb[85].mxu0 }
0x1383   : > { %v6923_v18 = vadd.f32 %v6921_v17, %v6915_v16 }
0x1385   : > { %v6924_v21 = vmax.f32 %v6923_v18, 0.0 }
0x1387   : > { %v6925_v22 = vpack.c.bf16 %v6924_v21, %v6924_v21 }
0x1389   : > { %7466 = vmatmul.mubr.msk.bf16.vlgmr.msra.gmra.mrb[88].mxu1 %vm599_vm3, %v6925_v22 }
0x145c   : > { %v7000_v23 = vpop.f32.mrb[88].mxu1 }
0x145d   : > { %v7009_v24 = vrot.slane %v7000_v23, 2  ;;  %v7002_v26 = vpop.f32.mrb[89].mxu1 }
0x145e   : > { %v7010_v27 = vrot.slane %v7002_v26, 2  ;;  %v7004_v28 = vpop.f32.mrb[90].mxu1 }
0x145f   : > { %7013 = vst [vmem:[%s9140_s15] sm:$0xc0] %v7009_v24  ;;  %v7005_v29 = vpop.f32.mrb[91].mxu1 }
0x1460   : > { %7014 = vst [vmem:[%s9140_s15 + $0x8] sm:$0xc0] %v7010_v27 }
0x1461   : > { %8911 = shalt.err (!%p8908_p7)
}
0x1462   : > { %s8912_s13 = scalar_lea.hbm %s9959_s26, 512  ;;  %s8916_s14 = scalar_lea.hbm %s10014_s6, 1024 }
0x1463   : > { %p8913_p8 = scmp.ne.s32.totalorder %s9959_s26, %s8912_s13  ;;  %p8917_p1 = scmp.lt.u32.totalorder %s9959_s26, %s10014_s6 }
0x1464   : > { %p8918_p0 = scmp.lt.u32.totalorder %s8916_s14, %s8912_s13  ;;  %p8920_p6 = scmp.lt.u32.totalorder %s8912_s13, %s9959_s26 }
0x1465   : > { %p8914_p11 = pnand %p8913_p8, %p10025_p9 }
0x1466   : > { %p8919_p5 = por %p8918_p0, %p8917_p1 }
0x1467   : > { %p8915_p13 = pneg %p8914_p11 }
0x1468   : > { %p8921_p10 = por %p8920_p6, %p8919_p5 }
0x146a   : > { %p8922_p12 = pnand %p8921_p10, %p8915_p13 }
0x146c   : > { %8925 = shalt.err (!%p8922_p12)
}
0x146d   : > { %s8974_s17 = smov 256   ;;  %s8975_s19 = smov 16  }
0x146e   : > { %8718 = dma.vmem_to_hbm [thread:$0]  (%p10025_p9), %s9961_s18, 512, %s9959_s26, %s9967_s25, %s8974_s17, %s8974_s17, %s8975_s19  }
0x146f PF: > { %p8730_p2 = scmp.ge.s32.totalorder %s8964_s24, 2  ;;  %s7046_s16 = sand.u32 1, %s8952_s21  }
0x1470   : > { %p10026_p3 = scmp.ne.s32.totalorder %s10019_s8, 0  ;;  %s7047_s28 = scalar_lea.sflag [#allocation4], %s7046_s16 }
0x1472   : > { %p8725_p4 = pnand %p8730_p2, %p10026_p3 }
0x1474   : > { %8947 = dma.done.wait (!%p8725_p4), %s7047_s28, 512  }
0x1475   : > { %8949 = vsyncadd (!%p8725_p4), %s7047_s28, 4294966784  ;;  %p17_p7 = scmp.ge.s32.totalorder %s9036_s27, 4   ;;  %s10027_s21 = smov %s8956_s22 }
0x1476   : > { %s10028_s22 = smov %s8960_s23  ;;  %s10029_s23 = smov %s9047_s30 }
0x1477   : > { %s10030_s24 = smov %s9036_s27  ;;  %19 = sbr.rel (!%p17_p7) target bundleno = 4 (0x4), region = 163 }
0x147e   :  { %7052 = vsyncpa [#allocation3], 1 }
0x147f   :  { %7054 = vsyncpa [#allocation3 + $0x1], 1 }
0x1480   :  { %7055 = vsyncpa [#allocation4], 1 }
0x1481   :  { %7057 = vsyncpa [#allocation4 + $0x1], 1 }

</bundles_post_ra>
